<compile_context>
chip_gen: v6e
topology: v6e:2x2x1
jax: 0.10.0
libtpu: 0.0.40
codegen_flags: <defaults>
</compile_context>

<pallas_src>
import functools

import numpy as np
import jax
import jax.numpy as jnp
from jax import lax
from jax.experimental import pallas as pl
from jax.experimental.pallas import tpu as pltpu

USE_GAMMA = True
LEAKY_SLOPE = 0.1
_OFF = 128  # lane-aligned offset of the padded grid inside each VMEM y-scratch


# ---------------------------------------------------------------------------
# the fused kernel (one batch element per grid step, "parallel" for megacore)
# ---------------------------------------------------------------------------
def _cross_conv_kernel(x0_ref, x1_ref, x2_ref,
                       w_in_ref, b_in_ref,
                       w_g0_ref, b_g0_ref, s_g0_ref,
                       w_g1_ref, b_g1_ref, s_g1_ref,
                       w_g2_ref, b_g2_ref, s_g2_ref,
                       m0_ref, m1_ref, m2_ref,
                       a0_ref, a1_ref, a2_ref,
                       y0_s, y1_s, y2_s,
                       *, dims, slope):
    """All tensors are channel-major with flattened padded-grid spatial on the
    lane axis.  A tap (dy, dx) of a 3x3 conv is the contiguous lane slice at
    offset (dy-1)*(W+2) + (dx-1); grid-border outputs are garbage and are
    either re-zeroed (first stage, via mask) or discarded by the wrapper."""
    x_refs = (x0_ref, x1_ref, x2_ref)
    m_refs = (m0_ref, m1_ref, m2_ref)
    y_scr = (y0_s, y1_s, y2_s)
    w_g = (w_g0_ref, w_g1_ref, w_g2_ref)
    b_g = (b_g0_ref, b_g1_ref, b_g2_ref)
    s_g = (s_g0_ref, s_g1_ref, s_g2_ref)
    a_refs = (a0_ref, a1_ref, a2_ref)

    def tap_patches(slice_fn, rw, n_pos):
        # 9 contiguous lane slices stacked on the contraction axis -> the whole
        # conv is a single wide-K MXU matmul.
        return jnp.concatenate(
            [slice_fn((dy - 1) * rw + (dx - 1), n_pos)
             for dy in range(3) for dx in range(3)], axis=0)

    # -------- stage 1: conv(Cin->Chid) + LeakyReLU, border re-zeroed ---------
    for k in range(3):
        h, w = dims[k]
        rw = w + 2
        n_pos = (h + 2) * rw          # flattened padded-grid positions
        mar = rw + 1                  # zero tap margin built by the wrapper

        def in_slice(delta, length, ref=x_refs[k], base=mar):
            return ref[0, :, base + delta: base + delta + length]

        patches = tap_patches(in_slice, rw, n_pos)                 # (9*Cin, P)
        y = jnp.dot(w_in_ref[k], patches,
                    preferred_element_type=jnp.float32) + b_in_ref[k]
        y = jnp.maximum(y, slope * y)                              # LeakyReLU
        y = y * m_refs[k][...]         # zero the grid border (= next conv's pad)

        # border-only initialisation: just the small never-read-as-valid tap
        # margins are cleared (every step -> megacore-safe); the interior is
        # fully overwritten below.  No full-tensor zero fills.
        chid = y.shape[0]
        y_scr[k][:, :_OFF] = jnp.zeros((chid, _OFF), jnp.float32)
        tail = y_scr[k].shape[1] - _OFF - n_pos
        y_scr[k][:, _OFF + n_pos:] = jnp.zeros((chid, tail), jnp.float32)
        y_scr[k][:, _OFF:_OFF + n_pos] = y

    # -------- stage 2: ONE fused matmul per scale (all branches share it) ----
    # row groups:  scale0: [conv_scale0_1 | down_conv01]
    #              scale1: [conv_scale1_1 | up_conv10 phases(0,0..1,1) | down_conv12]
    #              scale2: [conv_scale2_1 | up_conv21 phases(0,0..1,1)]
    for k in range(3):
        h, w = dims[k]
        rw = w + 2
        n_pos = (h + 2) * rw

        def y_slice(delta, length, scr=y_scr[k]):
            return scr[:, _OFF + delta: _OFF + delta + length]

        patches = tap_patches(y_slice, rw, n_pos)                  # (9*Chid, P)
        acc = jnp.dot(w_g[k][...], patches,
                      preferred_element_type=jnp.float32)          # (M_k, P)
        # bias + gamma epilogue fused; result stays lane-dense (spatial on lanes)
        a_refs[k][0] = (acc + b_g[k][...]) * s_g[k][...]


# ---------------------------------------------------------------------------
# parameter packing (done ONCE, outside the traced forward)
# ---------------------------------------------------------------------------
# conv3x3 after nearest-2x upsample == 4 per-output-phase convs over the
# low-res map; adjacent taps merge.  T[rho][ty, dy] folds original tap row dy
# into effective tap row ty (embedded in a 3x3 grid so the phase kernels share
# the same im2col patches as the other branches).
_PHASE_T = np.array([[[1., 0., 0.], [0., 1., 1.], [0., 0., 0.]],
                     [[0., 0., 0.], [1., 1., 0.], [0., 0., 1.]]], np.float32)


def _pack3x3(w):
    # (Cout, Cin, 3, 3) -> (Cout, 9*Cin); column index = (dy*3+dx)*Cin + cin
    return jnp.transpose(w, (0, 2, 3, 1)).reshape(w.shape[0], -1)


def _phase_weights(w):
    t = jnp.asarray(_PHASE_T)
    return [jnp.einsum('yd,xe,ocde->ocyx', t[r], t[s], w)
            for r in (0, 1) for s in (0, 1)]      # phase order (0,0),(0,1),(1,0),(1,1)


def pack_params(params):
    in_names = ("conv_scale0_0", "conv_scale1_0", "conv_scale2_0")
    w_in = jnp.stack([_pack3x3(params[k]["w"]) for k in in_names])
    b_in = jnp.stack([params[k]["b"].reshape(-1, 1) for k in in_names])

    cout = params["conv_scale0_1"]["w"].shape[0]
    ones = jnp.ones((cout, 1), jnp.float32)
    g0 = params["gamma0"][0] if USE_GAMMA else jnp.float32(1.0)
    g1 = params["gamma1"][0] if USE_GAMMA else jnp.float32(1.0)
    g2 = params["gamma2"][0] if USE_GAMMA else jnp.float32(1.0)

    def bias(name):
        return params[name]["b"].reshape(-1, 1)

    up10 = _phase_weights(params["up_conv10"]["w"])
    up21 = _phase_weights(params["up_conv21"]["w"])

    w_g0 = jnp.concatenate([_pack3x3(params["conv_scale0_1"]["w"]),
                            _pack3x3(params["down_conv01"]["w"])], axis=0)
    b_g0 = jnp.concatenate([bias("conv_scale0_1"), bias("down_conv01")], axis=0)
    s_g0 = jnp.concatenate([g0 * ones, g1 * ones], axis=0)

    w_g1 = jnp.concatenate([_pack3x3(params["conv_scale1_1"]["w"])]
                           + [_pack3x3(p) for p in up10]
                           + [_pack3x3(params["down_conv12"]["w"])], axis=0)
    b_g1 = jnp.concatenate([bias("conv_scale1_1")] + [bias("up_conv10")] * 4
                           + [bias("down_conv12")], axis=0)
    s_g1 = jnp.concatenate([g1 * ones] + [g0 * ones] * 4 + [g2 * ones], axis=0)

    w_g2 = jnp.concatenate([_pack3x3(params["conv_scale2_1"]["w"])]
                           + [_pack3x3(p) for p in up21], axis=0)
    b_g2 = jnp.concatenate([bias("conv_scale2_1")] + [bias("up_conv21")] * 4, axis=0)
    s_g2 = jnp.concatenate([g2 * ones] + [g1 * ones] * 4, axis=0)

    return dict(w_in=w_in, b_in=b_in,
                w_g0=w_g0, b_g0=b_g0, s_g0=s_g0,
                w_g1=w_g1, b_g1=b_g1, s_g1=s_g1,
                w_g2=w_g2, b_g2=b_g2, s_g2=s_g2)


# ---------------------------------------------------------------------------
# CrossConvolutions forward (NCHW in / NCHW out, like the PyTorch module)
# ---------------------------------------------------------------------------
@jax.jit
def cross_convolutions_forward(packed, x0, x1, x2):
    N, Cin, H, W = x0.shape
    assert H % 4 == 0 and W % 4 == 0, "spatial dims must be divisible by 4"
    assert W + 3 <= _OFF
    H1, W1, H2, W2 = H // 2, W // 2, H // 4, W // 4
    dims = ((H, W), (H1, W1), (H2, W2))
    Chid = packed["w_in"].shape[1]
    Cout = packed["w_g0"].shape[0] // 2

    n_pos = [(h + 2) * (w + 2) for h, w in dims]
    rws = [w + 2 for _, w in dims]
    m_rows = (2 * Cout, 6 * Cout, 5 * Cout)

    # channel-major, flattened padded-grid inputs (+ zero tap margins).  NCHW is
    # already channel-major, so this is just a pad + free reshape (Cin is tiny).
    def prep(x, h, w):
        xp = jnp.pad(x, ((0, 0), (0, 0), (1, 1), (1, 1)))
        xf = xp.reshape(N, Cin, (h + 2) * (w + 2))
        return jnp.pad(xf, ((0, 0), (0, 0), (w + 3, w + 3)))

    xf = [prep(x, h, w) for x, (h, w) in zip((x0, x1, x2), dims)]

    # border masks: 1 on the grid interior, 0 on the 1-pixel grid border
    masks = []
    for (h, w) in dims:
        m = np.zeros((h + 2, w + 2), np.float32)
        m[1:h + 1, 1:w + 1] = 1.0
        masks.append(jnp.asarray(m.reshape(1, -1)))

    out_shape = tuple(jax.ShapeDtypeStruct((N, m, l), jnp.float32)
                      for m, l in zip(m_rows, n_pos))

    def full(a):
        return pl.BlockSpec(a.shape, lambda n, nd=a.ndim: (0,) * nd)

    in_specs = (
        [pl.BlockSpec((1, Cin, xf[k].shape[-1]), lambda n: (n, 0, 0))
         for k in range(3)]
        + [full(packed["w_in"]), full(packed["b_in"]),
           full(packed["w_g0"]), full(packed["b_g0"]), full(packed["s_g0"]),
           full(packed["w_g1"]), full(packed["b_g1"]), full(packed["s_g1"]),
           full(packed["w_g2"]), full(packed["b_g2"]), full(packed["s_g2"])]
        + [full(m) for m in masks])
    out_specs = tuple(pl.BlockSpec((1, m, l), lambda n: (n, 0, 0))
                      for m, l in zip(m_rows, n_pos))
    scratch_shapes = [pltpu.VMEM((Chid, _OFF + l + rw + 2), jnp.float32)
                      for l, rw in zip(n_pos, rws)]

    macs = N * sum(9 * Cin * Chid * l + 9 * Chid * m * l
                   for (m, l) in zip(m_rows, n_pos))
    io_bytes = 4 * (sum(int(np.prod(a.shape)) for a in xf)
                    + sum(int(np.prod(v.shape)) for v in packed.values())
                    + sum(N * m * l for m, l in zip(m_rows, n_pos)))

    a0, a1, a2 = pl.pallas_call(
        functools.partial(_cross_conv_kernel, dims=dims, slope=LEAKY_SLOPE),
        out_shape=out_shape,
        grid=(N,),
        in_specs=in_specs,
        out_specs=out_specs,
        scratch_shapes=scratch_shapes,
        compiler_params=pltpu.CompilerParams(
            dimension_semantics=("parallel",),        # batch across TCs
            vmem_limit_bytes=32 * 1024 * 1024),       # explicit; fits v7x 64MiB
        cost_estimate=pl.CostEstimate(flops=2 * macs, transcendentals=0,
                                      bytes_accessed=io_bytes),
    )(xf[0], xf[1], xf[2],
      packed["w_in"], packed["b_in"],
      packed["w_g0"], packed["b_g0"], packed["s_g0"],
      packed["w_g1"], packed["b_g1"], packed["s_g1"],
      packed["w_g2"], packed["b_g2"], packed["s_g2"],
      masks[0], masks[1], masks[2])
    # TODO(synk): for N == 1 on v7x, add a second "parallel" grid axis (e.g.
    # split scale-0 rows) so both TensorCores are busy.

    # ---- tiny index-only assembly on the final (N, Cout, Hs, Ws) outputs ----
    g0v = a0.reshape(N, 2 * Cout, H + 2, W + 2)
    g1v = a1.reshape(N, 6 * Cout, H1 + 2, W1 + 2)
    g2v = a2.reshape(N, 5 * Cout, H2 + 2, W2 + 2)

    out0_same = g0v[:, :Cout, 1:H + 1, 1:W + 1]
    down01 = g0v[:, Cout:, 1:H + 1:2, 1:W + 1:2]                 # stride-2 subsample

    out1_same = g1v[:, :Cout, 1:H1 + 1, 1:W1 + 1]
    up10 = g1v[:, Cout:5 * Cout, 1:H1 + 1, 1:W1 + 1]
    up10 = up10.reshape(N, 2, 2, Cout, H1, W1).transpose(0, 3, 4, 1, 5, 2)
    up10 = up10.reshape(N, Cout, H, W)                           # phase interleave
    down12 = g1v[:, 5 * Cout:, 1:H1 + 1:2, 1:W1 + 1:2]

    out2_same = g2v[:, :Cout, 1:H2 + 1, 1:W2 + 1]
    up21 = g2v[:, Cout:, 1:H2 + 1, 1:W2 + 1]
    up21 = up21.reshape(N, 2, 2, Cout, H2, W2).transpose(0, 3, 4, 1, 5, 2)
    up21 = up21.reshape(N, Cout, H1, W1)

    # gamma was already applied per row group in-kernel, so the adds distribute.
    out0 = out0_same + up10
    out1 = out1_same + down01 + up21
    out2 = out2_same + down12
    return out0, out1, out2


# ---------------------------------------------------------------------------
# Pure-JAX reference (mirrors the PyTorch forward, NCHW / OIHW)
# ---------------------------------------------------------------------------
def reference_forward(params, x0, x1, x2):
    lr = lambda v: jnp.where(v >= 0, v, LEAKY_SLOPE * v)

    def conv(x, p, stride=1):
        o = lax.conv_general_dilated(
            x, p["w"], (stride, stride), [(1, 1), (1, 1)],
            dimension_numbers=("NCHW", "OIHW", "NCHW"))
        return o + p["b"][None, :, None, None]

    up2 = lambda v: jnp.repeat(jnp.repeat(v, 2, axis=2), 2, axis=3)

    y0 = lr(conv(x0, params["conv_scale0_0"]))
    y1 = lr(conv(x1, params["conv_scale1_0"]))
    y2 = lr(conv(x2, params["conv_scale2_0"]))
    out0 = conv(y0, params["conv_scale0_1"])
    out1 = conv(y1, params["conv_scale1_1"])
    out2 = conv(y2, params["conv_scale2_1"])
    y1_up = conv(up2(y1), params["up_conv10"])
    y2_up = conv(up2(y2), params["up_conv21"])
    y0_down = conv(y0, params["down_conv01"], stride=2)
    y1_down = conv(y1, params["down_conv12"], stride=2)
    out0 = out0 + y1_up
    out1 = out1 + y0_down + y2_up
    out2 = out2 + y1_down
    if USE_GAMMA:
        out0 = out0 * params["gamma0"][0]
        out1 = out1 * params["gamma1"][0]
        out2 = out2 * params["gamma2"][0]
    return out0, out1, out2


# ---------------------------------------------------------------------------
# Deterministic parameter init (shapes exactly as in the module's __init__)
# ---------------------------------------------------------------------------
def init_params(key, in_channels, channels, channels_hidden):
    def conv_init(k, cout, cin, ks=3):
        kw, kb = jax.random.split(k)
        bound = 1.0 / (cin * ks * ks) ** 0.5
        return {
            "w": jax.random.uniform(kw, (cout, cin, ks, ks), jnp.float32, -bound, bound),
            "b": jax.random.uniform(kb, (cout,), jnp.float32, -bound, bound),
        }

    names = ["conv_scale0_0", "conv_scale1_0", "conv_scale2_0",
             "conv_scale0_1", "conv_scale1_1", "conv_scale2_1",
             "up_conv10", "up_conv21", "down_conv01", "down_conv12"]
    keys = jax.random.split(key, len(names) + 3)
    params = {}
    for i, name in enumerate(names):
        if name.endswith("_0"):
            params[name] = conv_init(keys[i], channels_hidden, in_channels)
        else:
            params[name] = conv_init(keys[i], channels, channels_hidden)
    # gamma parameters: shape (1,) as in the module (torch inits them to zero;
    # deterministic non-zero values keep the test non-trivial).
    for j, g in enumerate(["gamma0", "gamma1", "gamma2"]):
        params[g] = jax.random.uniform(keys[len(names) + j], (1,), jnp.float32, 0.5, 1.5)
    return params


# ---------------------------------------------------------------------------
if __name__ == "__main__":
    key = jax.random.PRNGKey(0)
    k_p, k0, k1, k2 = jax.random.split(key, 4)

    N, Cin, H, W = 2, 4, 16, 16            # map_size = (16, 16)
    channels, channels_hidden = 8, 32

    params = init_params(k_p, Cin, channels, channels_hidden)
    packed = pack_params(params)           # one-time weight packing (kernel layout)

    x0 = jax.random.normal(k0, (N, Cin, H, W), jnp.float32)
    x1 = jax.random.normal(k1, (N, Cin, H // 2, W // 2), jnp.float32)
    x2 = jax.random.normal(k2, (N, Cin, H // 4, W // 4), jnp.float32)

    out0, out1, out2 = cross_convolutions_forward(packed, x0, x1, x2)
    jax.block_until_ready((out0, out1, out2))

    r0, r1, r2 = reference_forward(params, x0, x1, x2)

    assert out0.shape == (N, channels, H, W)
    assert out1.shape == (N, channels, H // 2, W // 2)
    assert out2.shape == (N, channels, H // 4, W // 4)
    for o, r in ((out0, r0), (out1, r1), (out2, r2)):
        err = float(jnp.max(jnp.abs(o - r)))
        assert jnp.allclose(o, r, atol=5e-4, rtol=5e-4), f"mismatch, max abs err = {err}"

    print("KERNEL_OK")
</pallas_src>

<mosaic_0001>
module attributes {stable_mosaic.version = 11 : i64} {
  func.func @_cross_conv_kernel(%arg0: i32, %arg1: memref<1x4x362xf32, #tpu.memory_space<vmem>>, %arg2: memref<1x4x122xf32, #tpu.memory_space<vmem>>, %arg3: memref<1x4x50xf32, #tpu.memory_space<vmem>>, %arg4: memref<3x32x36xf32, #tpu.memory_space<vmem>>, %arg5: memref<3x32x1xf32, #tpu.memory_space<vmem>>, %arg6: memref<16x288xf32, #tpu.memory_space<vmem>>, %arg7: memref<16x1xf32, #tpu.memory_space<vmem>>, %arg8: memref<16x1xf32, #tpu.memory_space<vmem>>, %arg9: memref<48x288xf32, #tpu.memory_space<vmem>>, %arg10: memref<48x1xf32, #tpu.memory_space<vmem>>, %arg11: memref<48x1xf32, #tpu.memory_space<vmem>>, %arg12: memref<40x288xf32, #tpu.memory_space<vmem>>, %arg13: memref<40x1xf32, #tpu.memory_space<vmem>>, %arg14: memref<40x1xf32, #tpu.memory_space<vmem>>, %arg15: memref<1x324xf32, #tpu.memory_space<vmem>>, %arg16: memref<1x100xf32, #tpu.memory_space<vmem>>, %arg17: memref<1x36xf32, #tpu.memory_space<vmem>>, %arg18: memref<1x16x324xf32, #tpu.memory_space<vmem>>, %arg19: memref<1x48x100xf32, #tpu.memory_space<vmem>>, %arg20: memref<1x40x36xf32, #tpu.memory_space<vmem>>, %arg21: memref<32x472xf32, #tpu.memory_space<vmem>>, %arg22: memref<32x240xf32, #tpu.memory_space<vmem>>, %arg23: memref<32x172xf32, #tpu.memory_space<vmem>>) attributes {dimension_semantics = [#tpu.dimension_semantics<parallel>], iteration_bounds = array<i64: 2>, scalar_prefetch = 0 : i64, scratch_operands = 3 : i64, tpu.core_type = #tpu.core_type<tc>, window_params = [{transform_indices = @transform_0, window_bounds = array<i64: 1, 4, 362>}, {transform_indices = @transform_1, window_bounds = array<i64: 1, 4, 122>}, {transform_indices = @transform_2, window_bounds = array<i64: 1, 4, 50>}, {pipeline_mode = #tpu.pipeline_mode<synchronous>, transform_indices = @transform_3, window_bounds = array<i64: 3, 32, 36>}, {pipeline_mode = #tpu.pipeline_mode<synchronous>, transform_indices = @transform_4, window_bounds = array<i64: 3, 32, 1>}, {pipeline_mode = #tpu.pipeline_mode<synchronous>, transform_indices = @transform_5, window_bounds = array<i64: 16, 288>}, {pipeline_mode = #tpu.pipeline_mode<synchronous>, transform_indices = @transform_6, window_bounds = array<i64: 16, 1>}, {pipeline_mode = #tpu.pipeline_mode<synchronous>, transform_indices = @transform_7, window_bounds = array<i64: 16, 1>}, {pipeline_mode = #tpu.pipeline_mode<synchronous>, transform_indices = @transform_8, window_bounds = array<i64: 48, 288>}, {pipeline_mode = #tpu.pipeline_mode<synchronous>, transform_indices = @transform_9, window_bounds = array<i64: 48, 1>}, {pipeline_mode = #tpu.pipeline_mode<synchronous>, transform_indices = @transform_10, window_bounds = array<i64: 48, 1>}, {pipeline_mode = #tpu.pipeline_mode<synchronous>, transform_indices = @transform_11, window_bounds = array<i64: 40, 288>}, {pipeline_mode = #tpu.pipeline_mode<synchronous>, transform_indices = @transform_12, window_bounds = array<i64: 40, 1>}, {pipeline_mode = #tpu.pipeline_mode<synchronous>, transform_indices = @transform_13, window_bounds = array<i64: 40, 1>}, {pipeline_mode = #tpu.pipeline_mode<synchronous>, transform_indices = @transform_14, window_bounds = array<i64: 1, 324>}, {pipeline_mode = #tpu.pipeline_mode<synchronous>, transform_indices = @transform_15, window_bounds = array<i64: 1, 100>}, {pipeline_mode = #tpu.pipeline_mode<synchronous>, transform_indices = @transform_16, window_bounds = array<i64: 1, 36>}, {transform_indices = @transform_17, window_bounds = array<i64: 1, 16, 324>}, {transform_indices = @transform_18, window_bounds = array<i64: 1, 48, 100>}, {transform_indices = @transform_19, window_bounds = array<i64: 1, 40, 36>}]} {
    %c0 = arith.constant 0 : index
    %c0_0 = arith.constant 0 : index
    %c0_1 = arith.constant 0 : index
    %0 = vector.load %arg1[%c0, %c0_0, %c0_1] : memref<1x4x362xf32, #tpu.memory_space<vmem>>, vector<1x4x324xf32>
    %1 = vector.shape_cast %0 : vector<1x4x324xf32> to vector<4x324xf32>
    %c0_2 = arith.constant 0 : index
    %c0_3 = arith.constant 0 : index
    %c1 = arith.constant 1 : index
    %2 = vector.load %arg1[%c0_2, %c0_3, %c1] : memref<1x4x362xf32, #tpu.memory_space<vmem>>, vector<1x4x324xf32>
    %3 = vector.shape_cast %2 : vector<1x4x324xf32> to vector<4x324xf32>
    %c0_4 = arith.constant 0 : index
    %c0_5 = arith.constant 0 : index
    %c2 = arith.constant 2 : index
    %4 = vector.load %arg1[%c0_4, %c0_5, %c2] : memref<1x4x362xf32, #tpu.memory_space<vmem>>, vector<1x4x324xf32>
    %5 = vector.shape_cast %4 : vector<1x4x324xf32> to vector<4x324xf32>
    %c0_6 = arith.constant 0 : index
    %c0_7 = arith.constant 0 : index
    %c18 = arith.constant 18 : index
    %6 = vector.load %arg1[%c0_6, %c0_7, %c18] : memref<1x4x362xf32, #tpu.memory_space<vmem>>, vector<1x4x324xf32>
    %7 = vector.shape_cast %6 : vector<1x4x324xf32> to vector<4x324xf32>
    %c0_8 = arith.constant 0 : index
    %c0_9 = arith.constant 0 : index
    %c19 = arith.constant 19 : index
    %8 = vector.load %arg1[%c0_8, %c0_9, %c19] : memref<1x4x362xf32, #tpu.memory_space<vmem>>, vector<1x4x324xf32>
    %9 = vector.shape_cast %8 : vector<1x4x324xf32> to vector<4x324xf32>
    %c0_10 = arith.constant 0 : index
    %c0_11 = arith.constant 0 : index
    %c20 = arith.constant 20 : index
    %10 = vector.load %arg1[%c0_10, %c0_11, %c20] : memref<1x4x362xf32, #tpu.memory_space<vmem>>, vector<1x4x324xf32>
    %11 = vector.shape_cast %10 : vector<1x4x324xf32> to vector<4x324xf32>
    %c0_12 = arith.constant 0 : index
    %c0_13 = arith.constant 0 : index
    %c36 = arith.constant 36 : index
    %12 = vector.load %arg1[%c0_12, %c0_13, %c36] : memref<1x4x362xf32, #tpu.memory_space<vmem>>, vector<1x4x324xf32>
    %13 = vector.shape_cast %12 : vector<1x4x324xf32> to vector<4x324xf32>
    %c0_14 = arith.constant 0 : index
    %c0_15 = arith.constant 0 : index
    %c37 = arith.constant 37 : index
    %14 = vector.load %arg1[%c0_14, %c0_15, %c37] : memref<1x4x362xf32, #tpu.memory_space<vmem>>, vector<1x4x324xf32>
    %15 = vector.shape_cast %14 : vector<1x4x324xf32> to vector<4x324xf32>
    %c0_16 = arith.constant 0 : index
    %c0_17 = arith.constant 0 : index
    %c38 = arith.constant 38 : index
    %16 = vector.load %arg1[%c0_16, %c0_17, %c38] : memref<1x4x362xf32, #tpu.memory_space<vmem>>, vector<1x4x324xf32>
    %17 = vector.shape_cast %16 : vector<1x4x324xf32> to vector<4x324xf32>
    %18 = tpu.concatenate %1, %3, %5, %7, %9, %11, %13, %15, %17 in 0 : vector<4x324xf32>, vector<4x324xf32>, vector<4x324xf32>, vector<4x324xf32>, vector<4x324xf32>, vector<4x324xf32>, vector<4x324xf32>, vector<4x324xf32>, vector<4x324xf32> -> vector<36x324xf32>
    %c0_18 = arith.constant 0 : index
    %c0_19 = arith.constant 0 : index
    %c0_20 = arith.constant 0 : index
    %19 = vector.load %arg4[%c0_18, %c0_19, %c0_20] : memref<3x32x36xf32, #tpu.memory_space<vmem>>, vector<1x32x36xf32>
    %20 = vector.shape_cast %19 : vector<1x32x36xf32> to vector<32x36xf32>
    %cst = arith.constant dense<0.000000e+00> : vector<32x324xf32>
    %21 = tpu.matmul %20, %18, %cst {dimension_numbers = #tpu.dot_dimension_numbers<[1], [0], [0], [1], [0, 0, 1, 1], [], []>} : vector<32x36xf32>, vector<36x324xf32>, vector<32x324xf32> -> vector<32x324xf32>
    %c0_21 = arith.constant 0 : index
    %c0_22 = arith.constant 0 : index
    %c0_23 = arith.constant 0 : index
    %22 = vector.load %arg5[%c0_21, %c0_22, %c0_23] : memref<3x32x1xf32, #tpu.memory_space<vmem>>, vector<1x32x1xf32>
    %23 = vector.shape_cast %22 : vector<1x32x1xf32> to vector<32x1xf32>
    %24 = vector.broadcast %23 : vector<32x1xf32> to vector<32x324xf32>
    %25 = arith.addf %21, %24 : vector<32x324xf32>
    %cst_24 = arith.constant 1.000000e-01 : f32
    %26 = vector.broadcast %cst_24 : f32 to vector<32x324xf32>
    %27 = arith.mulf %26, %25 : vector<32x324xf32>
    %28 = arith.maximumf %25, %27 : vector<32x324xf32>
    %c0_25 = arith.constant 0 : index
    %c0_26 = arith.constant 0 : index
    %29 = vector.load %arg15[%c0_25, %c0_26] : memref<1x324xf32, #tpu.memory_space<vmem>>, vector<1x324xf32>
    %30 = vector.broadcast %29 : vector<1x324xf32> to vector<32x324xf32>
    %31 = arith.mulf %28, %30 : vector<32x324xf32>
    %cst_27 = arith.constant 0.000000e+00 : f32
    %32 = vector.broadcast %cst_27 : f32 to vector<32x128xf32>
    %c0_28 = arith.constant 0 : index
    %c0_29 = arith.constant 0 : index
    %33 = vector.load %arg21[%c0_28, %c0_29] : memref<32x472xf32, #tpu.memory_space<vmem>>, vector<32x128xf32>
    tpu.vector_store %arg21[%c0_28, %c0_29], %32 {strides = array<i32>} : memref<32x472xf32, #tpu.memory_space<vmem>>, vector<32x128xf32>,
    %cst_30 = arith.constant 0.000000e+00 : f32
    %34 = vector.broadcast %cst_30 : f32 to vector<32x20xf32>
    %c0_31 = arith.constant 0 : index
    %c452 = arith.constant 452 : index
    %35 = vector.load %arg21[%c0_31, %c452] : memref<32x472xf32, #tpu.memory_space<vmem>>, vector<32x20xf32>
    tpu.vector_store %arg21[%c0_31, %c452], %34 {strides = array<i32>} : memref<32x472xf32, #tpu.memory_space<vmem>>, vector<32x20xf32>,
    %c0_32 = arith.constant 0 : index
    %c128 = arith.constant 128 : index
    %36 = vector.load %arg21[%c0_32, %c128] : memref<32x472xf32, #tpu.memory_space<vmem>>, vector<32x324xf32>
    tpu.vector_store %arg21[%c0_32, %c128], %31 {strides = array<i32>} : memref<32x472xf32, #tpu.memory_space<vmem>>, vector<32x324xf32>,
    %c0_33 = arith.constant 0 : index
    %c0_34 = arith.constant 0 : index
    %c0_35 = arith.constant 0 : index
    %37 = vector.load %arg2[%c0_33, %c0_34, %c0_35] : memref<1x4x122xf32, #tpu.memory_space<vmem>>, vector<1x4x100xf32>
    %38 = vector.shape_cast %37 : vector<1x4x100xf32> to vector<4x100xf32>
    %c0_36 = arith.constant 0 : index
    %c0_37 = arith.constant 0 : index
    %c1_38 = arith.constant 1 : index
    %39 = vector.load %arg2[%c0_36, %c0_37, %c1_38] : memref<1x4x122xf32, #tpu.memory_space<vmem>>, vector<1x4x100xf32>
    %40 = vector.shape_cast %39 : vector<1x4x100xf32> to vector<4x100xf32>
    %c0_39 = arith.constant 0 : index
    %c0_40 = arith.constant 0 : index
    %c2_41 = arith.constant 2 : index
    %41 = vector.load %arg2[%c0_39, %c0_40, %c2_41] : memref<1x4x122xf32, #tpu.memory_space<vmem>>, vector<1x4x100xf32>
    %42 = vector.shape_cast %41 : vector<1x4x100xf32> to vector<4x100xf32>
    %c0_42 = arith.constant 0 : index
    %c0_43 = arith.constant 0 : index
    %c10 = arith.constant 10 : index
    %43 = vector.load %arg2[%c0_42, %c0_43, %c10] : memref<1x4x122xf32, #tpu.memory_space<vmem>>, vector<1x4x100xf32>
    %44 = vector.shape_cast %43 : vector<1x4x100xf32> to vector<4x100xf32>
    %c0_44 = arith.constant 0 : index
    %c0_45 = arith.constant 0 : index
    %c11 = arith.constant 11 : index
    %45 = vector.load %arg2[%c0_44, %c0_45, %c11] : memref<1x4x122xf32, #tpu.memory_space<vmem>>, vector<1x4x100xf32>
    %46 = vector.shape_cast %45 : vector<1x4x100xf32> to vector<4x100xf32>
    %c0_46 = arith.constant 0 : index
    %c0_47 = arith.constant 0 : index
    %c12 = arith.constant 12 : index
    %47 = vector.load %arg2[%c0_46, %c0_47, %c12] : memref<1x4x122xf32, #tpu.memory_space<vmem>>, vector<1x4x100xf32>
    %48 = vector.shape_cast %47 : vector<1x4x100xf32> to vector<4x100xf32>
    %c0_48 = arith.constant 0 : index
    %c0_49 = arith.constant 0 : index
    %c20_50 = arith.constant 20 : index
    %49 = vector.load %arg2[%c0_48, %c0_49, %c20_50] : memref<1x4x122xf32, #tpu.memory_space<vmem>>, vector<1x4x100xf32>
    %50 = vector.shape_cast %49 : vector<1x4x100xf32> to vector<4x100xf32>
    %c0_51 = arith.constant 0 : index
    %c0_52 = arith.constant 0 : index
    %c21 = arith.constant 21 : index
    %51 = vector.load %arg2[%c0_51, %c0_52, %c21] : memref<1x4x122xf32, #tpu.memory_space<vmem>>, vector<1x4x100xf32>
    %52 = vector.shape_cast %51 : vector<1x4x100xf32> to vector<4x100xf32>
    %c0_53 = arith.constant 0 : index
    %c0_54 = arith.constant 0 : index
    %c22 = arith.constant 22 : index
    %53 = vector.load %arg2[%c0_53, %c0_54, %c22] : memref<1x4x122xf32, #tpu.memory_space<vmem>>, vector<1x4x100xf32>
    %54 = vector.shape_cast %53 : vector<1x4x100xf32> to vector<4x100xf32>
    %55 = tpu.concatenate %38, %40, %42, %44, %46, %48, %50, %52, %54 in 0 : vector<4x100xf32>, vector<4x100xf32>, vector<4x100xf32>, vector<4x100xf32>, vector<4x100xf32>, vector<4x100xf32>, vector<4x100xf32>, vector<4x100xf32>, vector<4x100xf32> -> vector<36x100xf32>
    %c1_55 = arith.constant 1 : index
    %c0_56 = arith.constant 0 : index
    %c0_57 = arith.constant 0 : index
    %56 = vector.load %arg4[%c1_55, %c0_56, %c0_57] : memref<3x32x36xf32, #tpu.memory_space<vmem>>, vector<1x32x36xf32>
    %57 = vector.shape_cast %56 : vector<1x32x36xf32> to vector<32x36xf32>
    %cst_58 = arith.constant dense<0.000000e+00> : vector<32x100xf32>
    %58 = tpu.matmul %57, %55, %cst_58 {dimension_numbers = #tpu.dot_dimension_numbers<[1], [0], [0], [1], [0, 0, 1, 1], [], []>} : vector<32x36xf32>, vector<36x100xf32>, vector<32x100xf32> -> vector<32x100xf32>
    %c1_59 = arith.constant 1 : index
    %c0_60 = arith.constant 0 : index
    %c0_61 = arith.constant 0 : index
    %59 = vector.load %arg5[%c1_59, %c0_60, %c0_61] : memref<3x32x1xf32, #tpu.memory_space<vmem>>, vector<1x32x1xf32>
    %60 = vector.shape_cast %59 : vector<1x32x1xf32> to vector<32x1xf32>
    %61 = vector.broadcast %60 : vector<32x1xf32> to vector<32x100xf32>
    %62 = arith.addf %58, %61 : vector<32x100xf32>
    %cst_62 = arith.constant 1.000000e-01 : f32
    %63 = vector.broadcast %cst_62 : f32 to vector<32x100xf32>
    %64 = arith.mulf %63, %62 : vector<32x100xf32>
    %65 = arith.maximumf %62, %64 : vector<32x100xf32>
    %c0_63 = arith.constant 0 : index
    %c0_64 = arith.constant 0 : index
    %66 = vector.load %arg16[%c0_63, %c0_64] : memref<1x100xf32, #tpu.memory_space<vmem>>, vector<1x100xf32>
    %67 = vector.broadcast %66 : vector<1x100xf32> to vector<32x100xf32>
    %68 = arith.mulf %65, %67 : vector<32x100xf32>
    %cst_65 = arith.constant 0.000000e+00 : f32
    %69 = vector.broadcast %cst_65 : f32 to vector<32x128xf32>
    %c0_66 = arith.constant 0 : index
    %c0_67 = arith.constant 0 : index
    %70 = vector.load %arg22[%c0_66, %c0_67] : memref<32x240xf32, #tpu.memory_space<vmem>>, vector<32x128xf32>
    tpu.vector_store %arg22[%c0_66, %c0_67], %69 {strides = array<i32>} : memref<32x240xf32, #tpu.memory_space<vmem>>, vector<32x128xf32>,
    %cst_68 = arith.constant 0.000000e+00 : f32
    %71 = vector.broadcast %cst_68 : f32 to vector<32x12xf32>
    %c0_69 = arith.constant 0 : index
    %c228 = arith.constant 228 : index
    %72 = vector.load %arg22[%c0_69, %c228] : memref<32x240xf32, #tpu.memory_space<vmem>>, vector<32x12xf32>
    tpu.vector_store %arg22[%c0_69, %c228], %71 {strides = array<i32>} : memref<32x240xf32, #tpu.memory_space<vmem>>, vector<32x12xf32>,
    %c0_70 = arith.constant 0 : index
    %c128_71 = arith.constant 128 : index
    %73 = vector.load %arg22[%c0_70, %c128_71] : memref<32x240xf32, #tpu.memory_space<vmem>>, vector<32x100xf32>
    tpu.vector_store %arg22[%c0_70, %c128_71], %68 {strides = array<i32>} : memref<32x240xf32, #tpu.memory_space<vmem>>, vector<32x100xf32>,
    %c0_72 = arith.constant 0 : index
    %c0_73 = arith.constant 0 : index
    %c0_74 = arith.constant 0 : index
    %74 = vector.load %arg3[%c0_72, %c0_73, %c0_74] : memref<1x4x50xf32, #tpu.memory_space<vmem>>, vector<1x4x36xf32>
    %75 = vector.shape_cast %74 : vector<1x4x36xf32> to vector<4x36xf32>
    %c0_75 = arith.constant 0 : index
    %c0_76 = arith.constant 0 : index
    %c1_77 = arith.constant 1 : index
    %76 = vector.load %arg3[%c0_75, %c0_76, %c1_77] : memref<1x4x50xf32, #tpu.memory_space<vmem>>, vector<1x4x36xf32>
    %77 = vector.shape_cast %76 : vector<1x4x36xf32> to vector<4x36xf32>
    %c0_78 = arith.constant 0 : index
    %c0_79 = arith.constant 0 : index
    %c2_80 = arith.constant 2 : index
    %78 = vector.load %arg3[%c0_78, %c0_79, %c2_80] : memref<1x4x50xf32, #tpu.memory_space<vmem>>, vector<1x4x36xf32>
    %79 = vector.shape_cast %78 : vector<1x4x36xf32> to vector<4x36xf32>
    %c0_81 = arith.constant 0 : index
    %c0_82 = arith.constant 0 : index
    %c6 = arith.constant 6 : index
    %80 = vector.load %arg3[%c0_81, %c0_82, %c6] : memref<1x4x50xf32, #tpu.memory_space<vmem>>, vector<1x4x36xf32>
    %81 = vector.shape_cast %80 : vector<1x4x36xf32> to vector<4x36xf32>
    %c0_83 = arith.constant 0 : index
    %c0_84 = arith.constant 0 : index
    %c7 = arith.constant 7 : index
    %82 = vector.load %arg3[%c0_83, %c0_84, %c7] : memref<1x4x50xf32, #tpu.memory_space<vmem>>, vector<1x4x36xf32>
    %83 = vector.shape_cast %82 : vector<1x4x36xf32> to vector<4x36xf32>
    %c0_85 = arith.constant 0 : index
    %c0_86 = arith.constant 0 : index
    %c8 = arith.constant 8 : index
    %84 = vector.load %arg3[%c0_85, %c0_86, %c8] : memref<1x4x50xf32, #tpu.memory_space<vmem>>, vector<1x4x36xf32>
    %85 = vector.shape_cast %84 : vector<1x4x36xf32> to vector<4x36xf32>
    %c0_87 = arith.constant 0 : index
    %c0_88 = arith.constant 0 : index
    %c12_89 = arith.constant 12 : index
    %86 = vector.load %arg3[%c0_87, %c0_88, %c12_89] : memref<1x4x50xf32, #tpu.memory_space<vmem>>, vector<1x4x36xf32>
    %87 = vector.shape_cast %86 : vector<1x4x36xf32> to vector<4x36xf32>
    %c0_90 = arith.constant 0 : index
    %c0_91 = arith.constant 0 : index
    %c13 = arith.constant 13 : index
    %88 = vector.load %arg3[%c0_90, %c0_91, %c13] : memref<1x4x50xf32, #tpu.memory_space<vmem>>, vector<1x4x36xf32>
    %89 = vector.shape_cast %88 : vector<1x4x36xf32> to vector<4x36xf32>
    %c0_92 = arith.constant 0 : index
    %c0_93 = arith.constant 0 : index
    %c14 = arith.constant 14 : index
    %90 = vector.load %arg3[%c0_92, %c0_93, %c14] : memref<1x4x50xf32, #tpu.memory_space<vmem>>, vector<1x4x36xf32>
    %91 = vector.shape_cast %90 : vector<1x4x36xf32> to vector<4x36xf32>
    %92 = tpu.concatenate %75, %77, %79, %81, %83, %85, %87, %89, %91 in 0 : vector<4x36xf32>, vector<4x36xf32>, vector<4x36xf32>, vector<4x36xf32>, vector<4x36xf32>, vector<4x36xf32>, vector<4x36xf32>, vector<4x36xf32>, vector<4x36xf32> -> vector<36x36xf32>
    %c2_94 = arith.constant 2 : index
    %c0_95 = arith.constant 0 : index
    %c0_96 = arith.constant 0 : index
    %93 = vector.load %arg4[%c2_94, %c0_95, %c0_96] : memref<3x32x36xf32, #tpu.memory_space<vmem>>, vector<1x32x36xf32>
    %94 = vector.shape_cast %93 : vector<1x32x36xf32> to vector<32x36xf32>
    %cst_97 = arith.constant dense<0.000000e+00> : vector<32x36xf32>
    %95 = tpu.matmul %94, %92, %cst_97 {dimension_numbers = #tpu.dot_dimension_numbers<[1], [0], [0], [1], [0, 0, 1, 1], [], []>} : vector<32x36xf32>, vector<36x36xf32>, vector<32x36xf32> -> vector<32x36xf32>
    %c2_98 = arith.constant 2 : index
    %c0_99 = arith.constant 0 : index
    %c0_100 = arith.constant 0 : index
    %96 = vector.load %arg5[%c2_98, %c0_99, %c0_100] : memref<3x32x1xf32, #tpu.memory_space<vmem>>, vector<1x32x1xf32>
    %97 = vector.shape_cast %96 : vector<1x32x1xf32> to vector<32x1xf32>
    %98 = vector.broadcast %97 : vector<32x1xf32> to vector<32x36xf32>
    %99 = arith.addf %95, %98 : vector<32x36xf32>
    %cst_101 = arith.constant 1.000000e-01 : f32
    %100 = vector.broadcast %cst_101 : f32 to vector<32x36xf32>
    %101 = arith.mulf %100, %99 : vector<32x36xf32>
    %102 = arith.maximumf %99, %101 : vector<32x36xf32>
    %c0_102 = arith.constant 0 : index
    %c0_103 = arith.constant 0 : index
    %103 = vector.load %arg17[%c0_102, %c0_103] : memref<1x36xf32, #tpu.memory_space<vmem>>, vector<1x36xf32>
    %104 = vector.broadcast %103 : vector<1x36xf32> to vector<32x36xf32>
    %105 = arith.mulf %102, %104 : vector<32x36xf32>
    %cst_104 = arith.constant 0.000000e+00 : f32
    %106 = vector.broadcast %cst_104 : f32 to vector<32x128xf32>
    %c0_105 = arith.constant 0 : index
    %c0_106 = arith.constant 0 : index
    %107 = vector.load %arg23[%c0_105, %c0_106] : memref<32x172xf32, #tpu.memory_space<vmem>>, vector<32x128xf32>
    tpu.vector_store %arg23[%c0_105, %c0_106], %106 {strides = array<i32>} : memref<32x172xf32, #tpu.memory_space<vmem>>, vector<32x128xf32>,
    %cst_107 = arith.constant 0.000000e+00 : f32
    %108 = vector.broadcast %cst_107 : f32 to vector<32x8xf32>
    %c0_108 = arith.constant 0 : index
    %c164 = arith.constant 164 : index
    %109 = vector.load %arg23[%c0_108, %c164] : memref<32x172xf32, #tpu.memory_space<vmem>>, vector<32x8xf32>
    tpu.vector_store %arg23[%c0_108, %c164], %108 {strides = array<i32>} : memref<32x172xf32, #tpu.memory_space<vmem>>, vector<32x8xf32>,
    %c0_109 = arith.constant 0 : index
    %c128_110 = arith.constant 128 : index
    %110 = vector.load %arg23[%c0_109, %c128_110] : memref<32x172xf32, #tpu.memory_space<vmem>>, vector<32x36xf32>
    tpu.vector_store %arg23[%c0_109, %c128_110], %105 {strides = array<i32>} : memref<32x172xf32, #tpu.memory_space<vmem>>, vector<32x36xf32>,
    %c0_111 = arith.constant 0 : index
    %c109 = arith.constant 109 : index
    %111 = vector.load %arg21[%c0_111, %c109] : memref<32x472xf32, #tpu.memory_space<vmem>>, vector<32x324xf32>
    %c0_112 = arith.constant 0 : index
    %c110 = arith.constant 110 : index
    %112 = vector.load %arg21[%c0_112, %c110] : memref<32x472xf32, #tpu.memory_space<vmem>>, vector<32x324xf32>
    %c0_113 = arith.constant 0 : index
    %c111 = arith.constant 111 : index
    %113 = vector.load %arg21[%c0_113, %c111] : memref<32x472xf32, #tpu.memory_space<vmem>>, vector<32x324xf32>
    %c0_114 = arith.constant 0 : index
    %c127 = arith.constant 127 : index
    %114 = vector.load %arg21[%c0_114, %c127] : memref<32x472xf32, #tpu.memory_space<vmem>>, vector<32x324xf32>
    %c0_115 = arith.constant 0 : index
    %c128_116 = arith.constant 128 : index
    %115 = vector.load %arg21[%c0_115, %c128_116] : memref<32x472xf32, #tpu.memory_space<vmem>>, vector<32x324xf32>
    %c0_117 = arith.constant 0 : index
    %c129 = arith.constant 129 : index
    %116 = vector.load %arg21[%c0_117, %c129] : memref<32x472xf32, #tpu.memory_space<vmem>>, vector<32x324xf32>
    %c0_118 = arith.constant 0 : index
    %c145 = arith.constant 145 : index
    %117 = vector.load %arg21[%c0_118, %c145] : memref<32x472xf32, #tpu.memory_space<vmem>>, vector<32x324xf32>
    %c0_119 = arith.constant 0 : index
    %c146 = arith.constant 146 : index
    %118 = vector.load %arg21[%c0_119, %c146] : memref<32x472xf32, #tpu.memory_space<vmem>>, vector<32x324xf32>
    %c0_120 = arith.constant 0 : index
    %c147 = arith.constant 147 : index
    %119 = vector.load %arg21[%c0_120, %c147] : memref<32x472xf32, #tpu.memory_space<vmem>>, vector<32x324xf32>
    %120 = tpu.concatenate %111, %112, %113, %114, %115, %116, %117, %118, %119 in 0 : vector<32x324xf32>, vector<32x324xf32>, vector<32x324xf32>, vector<32x324xf32>, vector<32x324xf32>, vector<32x324xf32>, vector<32x324xf32>, vector<32x324xf32>, vector<32x324xf32> -> vector<288x324xf32>
    %c0_121 = arith.constant 0 : index
    %c0_122 = arith.constant 0 : index
    %121 = vector.load %arg6[%c0_121, %c0_122] : memref<16x288xf32, #tpu.memory_space<vmem>>, vector<16x288xf32>
    %cst_123 = arith.constant dense<0.000000e+00> : vector<16x324xf32>
    %122 = tpu.matmul %121, %120, %cst_123 {dimension_numbers = #tpu.dot_dimension_numbers<[1], [0], [0], [1], [0, 0, 1, 1], [], []>} : vector<16x288xf32>, vector<288x324xf32>, vector<16x324xf32> -> vector<16x324xf32>
    %c0_124 = arith.constant 0 : index
    %c0_125 = arith.constant 0 : index
    %123 = vector.load %arg7[%c0_124, %c0_125] : memref<16x1xf32, #tpu.memory_space<vmem>>, vector<16x1xf32>
    %124 = vector.broadcast %123 : vector<16x1xf32> to vector<16x324xf32>
    %125 = arith.addf %122, %124 : vector<16x324xf32>
    %c0_126 = arith.constant 0 : index
    %c0_127 = arith.constant 0 : index
    %126 = vector.load %arg8[%c0_126, %c0_127] : memref<16x1xf32, #tpu.memory_space<vmem>>, vector<16x1xf32>
    %127 = vector.broadcast %126 : vector<16x1xf32> to vector<16x324xf32>
    %128 = arith.mulf %125, %127 : vector<16x324xf32>
    %c0_128 = arith.constant 0 : index
    %c0_129 = arith.constant 0 : index
    %c0_130 = arith.constant 0 : index
    %129 = vector.load %arg18[%c0_128, %c0_129, %c0_130] : memref<1x16x324xf32, #tpu.memory_space<vmem>>, vector<1x16x324xf32>
    %130 = vector.shape_cast %129 : vector<1x16x324xf32> to vector<16x324xf32>
    %131 = vector.shape_cast %128 : vector<16x324xf32> to vector<1x16x324xf32>
    tpu.vector_store %arg18[%c0_128, %c0_129, %c0_130], %131 {strides = array<i32>} : memref<1x16x324xf32, #tpu.memory_space<vmem>>, vector<1x16x324xf32>,
    %c0_131 = arith.constant 0 : index
    %c117 = arith.constant 117 : index
    %132 = vector.load %arg22[%c0_131, %c117] : memref<32x240xf32, #tpu.memory_space<vmem>>, vector<32x100xf32>
    %c0_132 = arith.constant 0 : index
    %c118 = arith.constant 118 : index
    %133 = vector.load %arg22[%c0_132, %c118] : memref<32x240xf32, #tpu.memory_space<vmem>>, vector<32x100xf32>
    %c0_133 = arith.constant 0 : index
    %c119 = arith.constant 119 : index
    %134 = vector.load %arg22[%c0_133, %c119] : memref<32x240xf32, #tpu.memory_space<vmem>>, vector<32x100xf32>
    %c0_134 = arith.constant 0 : index
    %c127_135 = arith.constant 127 : index
    %135 = vector.load %arg22[%c0_134, %c127_135] : memref<32x240xf32, #tpu.memory_space<vmem>>, vector<32x100xf32>
    %c0_136 = arith.constant 0 : index
    %c128_137 = arith.constant 128 : index
    %136 = vector.load %arg22[%c0_136, %c128_137] : memref<32x240xf32, #tpu.memory_space<vmem>>, vector<32x100xf32>
    %c0_138 = arith.constant 0 : index
    %c129_139 = arith.constant 129 : index
    %137 = vector.load %arg22[%c0_138, %c129_139] : memref<32x240xf32, #tpu.memory_space<vmem>>, vector<32x100xf32>
    %c0_140 = arith.constant 0 : index
    %c137 = arith.constant 137 : index
    %138 = vector.load %arg22[%c0_140, %c137] : memref<32x240xf32, #tpu.memory_space<vmem>>, vector<32x100xf32>
    %c0_141 = arith.constant 0 : index
    %c138 = arith.constant 138 : index
    %139 = vector.load %arg22[%c0_141, %c138] : memref<32x240xf32, #tpu.memory_space<vmem>>, vector<32x100xf32>
    %c0_142 = arith.constant 0 : index
    %c139 = arith.constant 139 : index
    %140 = vector.load %arg22[%c0_142, %c139] : memref<32x240xf32, #tpu.memory_space<vmem>>, vector<32x100xf32>
    %141 = tpu.concatenate %132, %133, %134, %135, %136, %137, %138, %139, %140 in 0 : vector<32x100xf32>, vector<32x100xf32>, vector<32x100xf32>, vector<32x100xf32>, vector<32x100xf32>, vector<32x100xf32>, vector<32x100xf32>, vector<32x100xf32>, vector<32x100xf32> -> vector<288x100xf32>
    %c0_143 = arith.constant 0 : index
    %c0_144 = arith.constant 0 : index
    %142 = vector.load %arg9[%c0_143, %c0_144] : memref<48x288xf32, #tpu.memory_space<vmem>>, vector<48x288xf32>
    %cst_145 = arith.constant dense<0.000000e+00> : vector<48x100xf32>
    %143 = tpu.matmul %142, %141, %cst_145 {dimension_numbers = #tpu.dot_dimension_numbers<[1], [0], [0], [1], [0, 0, 1, 1], [], []>} : vector<48x288xf32>, vector<288x100xf32>, vector<48x100xf32> -> vector<48x100xf32>
    %c0_146 = arith.constant 0 : index
    %c0_147 = arith.constant 0 : index
    %144 = vector.load %arg10[%c0_146, %c0_147] : memref<48x1xf32, #tpu.memory_space<vmem>>, vector<48x1xf32>
    %145 = vector.broadcast %144 : vector<48x1xf32> to vector<48x100xf32>
    %146 = arith.addf %143, %145 : vector<48x100xf32>
    %c0_148 = arith.constant 0 : index
    %c0_149 = arith.constant 0 : index
    %147 = vector.load %arg11[%c0_148, %c0_149] : memref<48x1xf32, #tpu.memory_space<vmem>>, vector<48x1xf32>
    %148 = vector.broadcast %147 : vector<48x1xf32> to vector<48x100xf32>
    %149 = arith.mulf %146, %148 : vector<48x100xf32>
    %c0_150 = arith.constant 0 : index
    %c0_151 = arith.constant 0 : index
    %c0_152 = arith.constant 0 : index
    %150 = vector.load %arg19[%c0_150, %c0_151, %c0_152] : memref<1x48x100xf32, #tpu.memory_space<vmem>>, vector<1x48x100xf32>
    %151 = vector.shape_cast %150 : vector<1x48x100xf32> to vector<48x100xf32>
    %152 = vector.shape_cast %149 : vector<48x100xf32> to vector<1x48x100xf32>
    tpu.vector_store %arg19[%c0_150, %c0_151, %c0_152], %152 {strides = array<i32>} : memref<1x48x100xf32, #tpu.memory_space<vmem>>, vector<1x48x100xf32>,
    %c0_153 = arith.constant 0 : index
    %c121 = arith.constant 121 : index
    %153 = vector.load %arg23[%c0_153, %c121] : memref<32x172xf32, #tpu.memory_space<vmem>>, vector<32x36xf32>
    %c0_154 = arith.constant 0 : index
    %c122 = arith.constant 122 : index
    %154 = vector.load %arg23[%c0_154, %c122] : memref<32x172xf32, #tpu.memory_space<vmem>>, vector<32x36xf32>
    %c0_155 = arith.constant 0 : index
    %c123 = arith.constant 123 : index
    %155 = vector.load %arg23[%c0_155, %c123] : memref<32x172xf32, #tpu.memory_space<vmem>>, vector<32x36xf32>
    %c0_156 = arith.constant 0 : index
    %c127_157 = arith.constant 127 : index
    %156 = vector.load %arg23[%c0_156, %c127_157] : memref<32x172xf32, #tpu.memory_space<vmem>>, vector<32x36xf32>
    %c0_158 = arith.constant 0 : index
    %c128_159 = arith.constant 128 : index
    %157 = vector.load %arg23[%c0_158, %c128_159] : memref<32x172xf32, #tpu.memory_space<vmem>>, vector<32x36xf32>
    %c0_160 = arith.constant 0 : index
    %c129_161 = arith.constant 129 : index
    %158 = vector.load %arg23[%c0_160, %c129_161] : memref<32x172xf32, #tpu.memory_space<vmem>>, vector<32x36xf32>
    %c0_162 = arith.constant 0 : index
    %c133 = arith.constant 133 : index
    %159 = vector.load %arg23[%c0_162, %c133] : memref<32x172xf32, #tpu.memory_space<vmem>>, vector<32x36xf32>
    %c0_163 = arith.constant 0 : index
    %c134 = arith.constant 134 : index
    %160 = vector.load %arg23[%c0_163, %c134] : memref<32x172xf32, #tpu.memory_space<vmem>>, vector<32x36xf32>
    %c0_164 = arith.constant 0 : index
    %c135 = arith.constant 135 : index
    %161 = vector.load %arg23[%c0_164, %c135] : memref<32x172xf32, #tpu.memory_space<vmem>>, vector<32x36xf32>
    %162 = tpu.concatenate %153, %154, %155, %156, %157, %158, %159, %160, %161 in 0 : vector<32x36xf32>, vector<32x36xf32>, vector<32x36xf32>, vector<32x36xf32>, vector<32x36xf32>, vector<32x36xf32>, vector<32x36xf32>, vector<32x36xf32>, vector<32x36xf32> -> vector<288x36xf32>
    %c0_165 = arith.constant 0 : index
    %c0_166 = arith.constant 0 : index
    %163 = vector.load %arg12[%c0_165, %c0_166] : memref<40x288xf32, #tpu.memory_space<vmem>>, vector<40x288xf32>
    %cst_167 = arith.constant dense<0.000000e+00> : vector<40x36xf32>
    %164 = tpu.matmul %163, %162, %cst_167 {dimension_numbers = #tpu.dot_dimension_numbers<[1], [0], [0], [1], [0, 0, 1, 1], [], []>} : vector<40x288xf32>, vector<288x36xf32>, vector<40x36xf32> -> vector<40x36xf32>
    %c0_168 = arith.constant 0 : index
    %c0_169 = arith.constant 0 : index
    %165 = vector.load %arg13[%c0_168, %c0_169] : memref<40x1xf32, #tpu.memory_space<vmem>>, vector<40x1xf32>
    %166 = vector.broadcast %165 : vector<40x1xf32> to vector<40x36xf32>
    %167 = arith.addf %164, %166 : vector<40x36xf32>
    %c0_170 = arith.constant 0 : index
    %c0_171 = arith.constant 0 : index
    %168 = vector.load %arg14[%c0_170, %c0_171] : memref<40x1xf32, #tpu.memory_space<vmem>>, vector<40x1xf32>
    %169 = vector.broadcast %168 : vector<40x1xf32> to vector<40x36xf32>
    %170 = arith.mulf %167, %169 : vector<40x36xf32>
    %c0_172 = arith.constant 0 : index
    %c0_173 = arith.constant 0 : index
    %c0_174 = arith.constant 0 : index
    %171 = vector.load %arg20[%c0_172, %c0_173, %c0_174] : memref<1x40x36xf32, #tpu.memory_space<vmem>>, vector<1x40x36xf32>
    %172 = vector.shape_cast %171 : vector<1x40x36xf32> to vector<40x36xf32>
    %173 = vector.shape_cast %170 : vector<40x36xf32> to vector<1x40x36xf32>
    tpu.vector_store %arg20[%c0_172, %c0_173, %c0_174], %173 {strides = array<i32>} : memref<1x40x36xf32, #tpu.memory_space<vmem>>, vector<1x40x36xf32>,
    return
  }
  func.func @transform_0(%arg0: i32) -> (i32, i32, i32) {
    %c0_i32 = arith.constant 0 : i32
    %c0_i32_0 = arith.constant 0 : i32
    %c0_i32_1 = arith.constant 0 : i32
    return %arg0, %c0_i32, %c0_i32_0 : i32, i32, i32
  }
  func.func @transform_1(%arg0: i32) -> (i32, i32, i32) {
    %c0_i32 = arith.constant 0 : i32
    %c0_i32_0 = arith.constant 0 : i32
    %c0_i32_1 = arith.constant 0 : i32
    return %arg0, %c0_i32, %c0_i32_0 : i32, i32, i32
  }
  func.func @transform_2(%arg0: i32) -> (i32, i32, i32) {
    %c0_i32 = arith.constant 0 : i32
    %c0_i32_0 = arith.constant 0 : i32
    %c0_i32_1 = arith.constant 0 : i32
    return %arg0, %c0_i32, %c0_i32_0 : i32, i32, i32
  }
  func.func @transform_3(%arg0: i32) -> (i32, i32, i32) {
    %c0_i32 = arith.constant 0 : i32
    %c0_i32_0 = arith.constant 0 : i32
    %c0_i32_1 = arith.constant 0 : i32
    %c0_i32_2 = arith.constant 0 : i32
    return %c0_i32, %c0_i32_0, %c0_i32_1 : i32, i32, i32
  }
  func.func @transform_4(%arg0: i32) -> (i32, i32, i32) {
    %c0_i32 = arith.constant 0 : i32
    %c0_i32_0 = arith.constant 0 : i32
    %c0_i32_1 = arith.constant 0 : i32
    %c0_i32_2 = arith.constant 0 : i32
    return %c0_i32, %c0_i32_0, %c0_i32_1 : i32, i32, i32
  }
  func.func @transform_5(%arg0: i32) -> (i32, i32) {
    %c0_i32 = arith.constant 0 : i32
    %c0_i32_0 = arith.constant 0 : i32
    %c0_i32_1 = arith.constant 0 : i32
    return %c0_i32, %c0_i32_0 : i32, i32
  }
  func.func @transform_6(%arg0: i32) -> (i32, i32) {
    %c0_i32 = arith.constant 0 : i32
    %c0_i32_0 = arith.constant 0 : i32
    %c0_i32_1 = arith.constant 0 : i32
    return %c0_i32, %c0_i32_0 : i32, i32
  }
  func.func @transform_7(%arg0: i32) -> (i32, i32) {
    %c0_i32 = arith.constant 0 : i32
    %c0_i32_0 = arith.constant 0 : i32
    %c0_i32_1 = arith.constant 0 : i32
    return %c0_i32, %c0_i32_0 : i32, i32
  }
  func.func @transform_8(%arg0: i32) -> (i32, i32) {
    %c0_i32 = arith.constant 0 : i32
    %c0_i32_0 = arith.constant 0 : i32
    %c0_i32_1 = arith.constant 0 : i32
    return %c0_i32, %c0_i32_0 : i32, i32
  }
  func.func @transform_9(%arg0: i32) -> (i32, i32) {
    %c0_i32 = arith.constant 0 : i32
    %c0_i32_0 = arith.constant 0 : i32
    %c0_i32_1 = arith.constant 0 : i32
    return %c0_i32, %c0_i32_0 : i32, i32
  }
  func.func @transform_10(%arg0: i32) -> (i32, i32) {
    %c0_i32 = arith.constant 0 : i32
    %c0_i32_0 = arith.constant 0 : i32
    %c0_i32_1 = arith.constant 0 : i32
    return %c0_i32, %c0_i32_0 : i32, i32
  }
  func.func @transform_11(%arg0: i32) -> (i32, i32) {
    %c0_i32 = arith.constant 0 : i32
    %c0_i32_0 = arith.constant 0 : i32
    %c0_i32_1 = arith.constant 0 : i32
    return %c0_i32, %c0_i32_0 : i32, i32
  }
  func.func @transform_12(%arg0: i32) -> (i32, i32) {
    %c0_i32 = arith.constant 0 : i32
    %c0_i32_0 = arith.constant 0 : i32
    %c0_i32_1 = arith.constant 0 : i32
    return %c0_i32, %c0_i32_0 : i32, i32
  }
  func.func @transform_13(%arg0: i32) -> (i32, i32) {
    %c0_i32 = arith.constant 0 : i32
    %c0_i32_0 = arith.constant 0 : i32
    %c0_i32_1 = arith.constant 0 : i32
    return %c0_i32, %c0_i32_0 : i32, i32
  }
  func.func @transform_14(%arg0: i32) -> (i32, i32) {
    %c0_i32 = arith.constant 0 : i32
    %c0_i32_0 = arith.constant 0 : i32
    %c0_i32_1 = arith.constant 0 : i32
    return %c0_i32, %c0_i32_0 : i32, i32
  }
  func.func @transform_15(%arg0: i32) -> (i32, i32) {
    %c0_i32 = arith.constant 0 : i32
    %c0_i32_0 = arith.constant 0 : i32
    %c0_i32_1 = arith.constant 0 : i32
    return %c0_i32, %c0_i32_0 : i32, i32
  }
  func.func @transform_16(%arg0: i32) -> (i32, i32) {
    %c0_i32 = arith.constant 0 : i32
    %c0_i32_0 = arith.constant 0 : i32
    %c0_i32_1 = arith.constant 0 : i32
    return %c0_i32, %c0_i32_0 : i32, i32
  }
  func.func @transform_17(%arg0: i32) -> (i32, i32, i32) {
    %c0_i32 = arith.constant 0 : i32
    %c0_i32_0 = arith.constant 0 : i32
    %c0_i32_1 = arith.constant 0 : i32
    return %arg0, %c0_i32, %c0_i32_0 : i32, i32, i32
  }
  func.func @transform_18(%arg0: i32) -> (i32, i32, i32) {
    %c0_i32 = arith.constant 0 : i32
    %c0_i32_0 = arith.constant 0 : i32
    %c0_i32_1 = arith.constant 0 : i32
    return %arg0, %c0_i32, %c0_i32_0 : i32, i32, i32
  }
  func.func @transform_19(%arg0: i32) -> (i32, i32, i32) {
    %c0_i32 = arith.constant 0 : i32
    %c0_i32_0 = arith.constant 0 : i32
    %c0_i32_1 = arith.constant 0 : i32
    return %arg0, %c0_i32, %c0_i32_0 : i32, i32, i32
  }
}

</mosaic_0001>

<bundles_post_ra>
// kernel: cross_convolutions_forward.1
= control target key start
LH: loop header
LB: loop body
LE: loop exit
PB: predicated region body
PF: predicated region fallthrough
CT: control target
= control target key end

     0   :  { %s7181_s0 = inlined_call_operand.vmem [shape: f32[2,4,362], index: 0, kind: input, shape index: {}]   ;;  %s7182_s1 = inlined_call_operand.vmem [shape: f32[2,4,122], index: 1, kind: input, shape index: {}]   ;;  %s7183_s2 = inlined_call_operand.vmem [shape: f32[2,4,50], index: 2, kind: input, shape index: {}]   ;;  %s7184_s3 = inlined_call_operand.vmem [shape: f32[3,32,36], index: 3, kind: input, shape index: {}]   ;;  %s7185_s4 = inlined_call_operand.vmem [shape: f32[3,32,1], index: 4, kind: input, shape index: {}]   ;;  %s7186_s5 = inlined_call_operand.vmem [shape: f32[16,288], index: 5, kind: input, shape index: {}]   ;;  %s7187_s6 = inlined_call_operand.vmem [shape: f32[16,1], index: 6, kind: input, shape index: {}]   ;;  %s7188_s7 = inlined_call_operand.vmem [shape: f32[16,1], index: 7, kind: input, shape index: {}]   ;;  %s7189_s8 = inlined_call_operand.vmem [shape: f32[48,288], index: 8, kind: input, shape index: {}]   ;;  %s7190_s9 = inlined_call_operand.vmem [shape: f32[48,1], index: 9, kind: input, shape index: {}]   ;;  %s7191_s10 = inlined_call_operand.vmem [shape: f32[48,1], index: 10, kind: input, shape index: {}]   ;;  %s7192_s11 = inlined_call_operand.vmem [shape: f32[40,288], index: 11, kind: input, shape index: {}]   ;;  %s7193_s12 = inlined_call_operand.vmem [shape: f32[40,1], index: 12, kind: input, shape index: {}]   ;;  %s7194_s13 = inlined_call_operand.vmem [shape: f32[40,1], index: 13, kind: input, shape index: {}]   ;;  %s7195_s14 = inlined_call_operand.vmem [shape: f32[1,324], index: 14, kind: input, shape index: {}]   ;;  %s7196_s15 = inlined_call_operand.vmem [shape: f32[1,100], index: 15, kind: input, shape index: {}]   ;;  %s7197_s16 = inlined_call_operand.vmem [shape: f32[1,36], index: 16, kind: input, shape index: {}]   ;;  %s7198_s17 = inlined_call_operand.vmem [shape: f32[2,16,324], index: 17, kind: output, shape index: {0}]   ;;  %s7199_s18 = inlined_call_operand.vmem [shape: f32[2,48,100], index: 18, kind: output, shape index: {1}]   ;;  %s7200_s19 = inlined_call_operand.vmem [shape: f32[2,40,36], index: 19, kind: output, shape index: {2}]  }
   0x1   :  { %7269 = sst [smem:[#allocation55_spill]] %s7181_s0  ;;  %s4573_s0 = smov 0  }
   0x2   :  { %7270 = sst [smem:[#allocation56_spill]] %s7182_s1 }
   0x3   :  { %7271 = sst [smem:[#allocation57_spill]] %s7183_s2 }
   0x4   :  { %7272 = sst [smem:[#allocation58_spill]] %s7184_s3 }
   0x5   :  { %7273 = sst [smem:[#allocation59_spill]] %s7194_s13 }
   0x6   :  { %7274 = sst [smem:[#allocation60_spill]] %s7199_s18 }
   0x7   :  { %7275 = sst [smem:[#allocation61_spill]] %s7200_s19 }
   0x8 LB: > { %7276 = sst [smem:[#allocation5_spill]] %s4447_s0  ;;  %s3920_s30 = sadd.s32 4294967295, %s4447_s0   ;;  %s4447_s0 = sphi %s4573_s0, %s30_s0  }
   0x9   : > { %p3924_p0 = scmp.ge.s32.totalorder %s4447_s0, 1  ;;  %p560_p1 = scmp.lt.s32.totalorder %s4447_s0, 3 }
   0xb   : > { %p561_p2 = pnand %p3924_p0, %p560_p1 }
   0xd   : > { %564 = sbr.rel (%p561_p2) target bundleno = 1593 (0x639), region = 88 }
  0x12   : > { %p634_p3 = scmp.lt.s32.totalorder %s3920_s30, 1  ;;  %v4449_v0 = vmov 0   ;;  %s7277_s22 = sld [smem:[#allocation55_spill]]  ;;  %vm804_vm0 = vcmask 293888   ;;  %v4458_v7 = vmov 0.0   ;;  %v780_v8 = vld [vmem:[%s7185_s4] sm:$0xff] }
  0x13   : > { %4308 = vset.pattern.permute.xlu0 %v4449_v0  ;;  %4309 = vset.pattern.permute.xlu1 %v4449_v0  ;;  %s7214_s23 = smov 126   ;;  %s7212_s24 = smov 127   ;;  %1050 = vst [vmem:[#allocation2] sm:$0xff] %v4458_v7  ;;  %v781_v9 = vld [vmem:[%s7185_s4 + $0x8] sm:$0xff]  ;;  %v783_v10 = vld [vmem:[%s7185_s4 + $0x18] sm:$0xff]  ;;  %v782_v11 = vld [vmem:[%s7185_s4 + $0x10] sm:$0xff] }
  0x14   : > { %s7433_s30 = smov (!%p634_p3, %s3920_s30), 1  ;;  %s7208_s25 = smov 110   ;;  %887 = vmatprep.mubr.f32.mxu0 %v4458_v7  ;;  %v3947_v14 = vld [vmem:[%s7185_s4 + $0x28] sm:$0xff]  ;;  %v3946_v15 = vld [vmem:[%s7185_s4 + $0x20] sm:$0xff]  ;;  %v3949_v16 = vld [vmem:[%s7185_s4 + $0x38] sm:$0xff]  ;;  %vm748_vm1 = vcmask 744448  }
  0x15   : > { %s4273_s20 = smul.u32 12, %s7433_s30  ;;  %s7206_s3 = smov 109   ;;  %v3948_v17 = vld [vmem:[%s7185_s4 + $0x30] sm:$0xff]  ;;  %v3960_v20 = vld [vmem:[%s7185_s4 + $0x40] sm:$0xff]  ;;  %v3961_v22 = vld [vmem:[%s7185_s4 + $0x48] sm:$0xff]  ;;  %vm760_vm2 = vcmask 736256  }
  0x16   : > { %s7210_s26 = smov 108   ;;  %s7204_s27 = smov 92   ;;  %v3962_v21 = vld [vmem:[%s7185_s4 + $0x50] sm:$0xff]  ;;  %v3963_v23 = vld [vmem:[%s7185_s4 + $0x58] sm:$0xff]  ;;  %v1785_v24 = vld [vmem:[%s7187_s6] sm:$0xff]  ;;  %vm676_vm3 = vcmask 1039360  }
  0x17   : > { %s7202_s28 = smov 91   ;;  %s7278_s21 = sld [smem:[#allocation58_spill]]  ;;  %v1786_v29 = vld [vmem:[%s7187_s6 + $0x8] sm:$0xff]  ;;  %vm700_vm4 = vcmask 900096   ;;  %vm736_vm5 = vcmask 752640   ;;  %vm763_vm6 = vcmask 1043456  }
  0x18   : > { %s638_s2 = scalar_lea.vmem %s7277_s22, %s4273_s20  ;;  %s7216_s1 = smov 90   ;;  %vm712_vm7 = vcmask 891904   ;;  %vm724_vm8 = vcmask 883712   ;;  %vm688_vm9 = vcmask 1031168   ;;  %vm1054_vm10 = vcmask 720416  }
  0x19   : > { %v4587_v1 = vld [vmem:[%s638_s2] sm:$0xff]  ;;  %v4595_v3 = vld [vmem:[%s638_s2 + $0x8] sm:$0xf]  ;;  %s3926_s22 = sshll.u32 %s7433_s30, 2  ;;  %s7282_s0 = smov 108   ;;  %1056 = vst.msk [vmem:[#allocation2 + $0x38] sm:$0xff] %vm1054_vm10, %v4458_v7 }
  0x1a   : > { %682 = vrot.lane.b32.xlu1 %v4587_v1, %s7214_s23  ;;  %672 = vrot.lane.b32.xlu0 %v4587_v1, %s7212_s24  ;;  %v668_v2 = vcombine.low %v4587_v1, %v4587_v1  ;;  %v669_v4 = vcombine.low %v4595_v3, %v4595_v3  ;;  %v4604_v5 = vcombine.high %v4587_v1, %v4587_v1  ;;  %s7283_s19 = sld [smem:[#allocation57_spill]]  ;;  %s4465_s18 = smov 122   ;;  %vm1254_vm11 = vcmask 917280  }
  0x1b   : > { %s7284_s13 = smov 116   ;;  %1055 = vst.msk [vmem:[#allocation2 + $0x18] sm:$0xff] %vm1054_vm10, %v4458_v7  ;;  %1057 = vst.msk [vmem:[#allocation2 + $0x58] sm:$0xff] %vm1054_vm10, %v4458_v7  ;;  %s4469_s29 = smov 19   ;;  %vm1446_vm12 = vcmask 359712   ;;  %vm1061_vm13 = vcmask 556032  }
  0x1c   : > { %1058 = vst.msk [vmem:[#allocation2 + $0x78] sm:$0xff] %vm1054_vm10, %v4458_v7  ;;  %s7289_s2 = smov 90   ;;  %vm1259_vm14 = vcmask 818176   ;;  %vm2085_vm15 = vcmask 154624  }
  0x1d   : > { %v4635_v6 = vld [vmem:[%s7278_s21] sm:$0xff]  ;;  %1256 = vst.msk [vmem:[#allocation3 + $0x18] sm:$0xff] %vm1254_vm11, %v4458_v7  ;;  %1255 = vst.msk [vmem:[#allocation3 + $0x8] sm:$0xff] %vm1254_vm11, %v4458_v7 }
  0x1e   : > { %686 = vrot.lane.b32.xlu1 %v4595_v3, %s7214_s23  ;;  %670 = vrot.lane.b32.xlu0 %v668_v2, %s7212_s24  ;;  %1257 = vst.msk [vmem:[#allocation3 + $0x28] sm:$0xff] %vm1254_vm11, %v4458_v7  ;;  %1258 = vst.msk [vmem:[#allocation3 + $0x38] sm:$0xff] %vm1254_vm11, %v4458_v7 }
  0x1f   : > { %4184 = vmatprep.mubr.msk.f32.mxu1 %vm804_vm0, %v4635_v6  ;;  %1448 = vst.msk [vmem:[#allocation4 + $0x18] sm:$0xff] %vm1446_vm12, %v4458_v7  ;;  %1447 = vst.msk [vmem:[#allocation4 + $0x8] sm:$0xff] %vm1446_vm12, %v4458_v7 }
  0x20   : > { %1449 = vst.msk [vmem:[#allocation4 + $0x28] sm:$0xff] %vm1446_vm12, %v4458_v7  ;;  %1450 = vst.msk [vmem:[#allocation4 + $0x38] sm:$0xff] %vm1446_vm12, %v4458_v7 }
  0x22   : > { %674 = vrot.lane.b32.xlu1 %v669_v4, %s7212_s24  ;;  %684 = vrot.lane.b32.xlu0 %v4604_v5, %s7214_s23  ;;  %s7221_s23 = smov 118   ;;  %s7223_s24 = smov 116  }
  0x26   : > { %696 = vrot.lane.b32.xlu1 %v4587_v1, %s7208_s25  ;;  %694 = vrot.lane.b32.xlu0 %v668_v2, %s7208_s25 }
  0x2a   : > { %706 = vrot.lane.b32.xlu1 %v4587_v1, %s7206_s3  ;;  %698 = vrot.lane.b32.xlu0 %v669_v4, %s7208_s25  ;;  %s7279_s25 = sld [smem:[#allocation56_spill]] }
  0x2e   : > { %710 = vrot.lane.b32.xlu1 %v4595_v3, %s7206_s3  ;;  %708 = vrot.lane.b32.xlu0 %v4604_v5, %s7206_s3  ;;  %s7219_s3 = smov 117  }
  0x32   : > { %720 = vrot.lane.b32.xlu1 %v4587_v1, %s7210_s26  ;;  %718 = vrot.lane.b32.xlu0 %v668_v2, %s7210_s26 }
  0x36   : > { %730 = vrot.lane.b32.xlu1 %v4587_v1, %s7204_s27  ;;  %722 = vrot.lane.b32.xlu0 %v669_v4, %s7210_s26  ;;  %s642_s26 = scalar_lea.vmem %s7279_s25, %s3926_s22  ;;  %s7281_s25 = smov 127  }
  0x37   : > { %v4666_v12 = vld [vmem:[%s642_s26] sm:$0xf]  ;;  %s7225_s26 = smov 106  }
  0x38   : > { %v1074_v13 = vrot.slane %v4666_v12, 4 }
  0x3a   : > { %734 = vrot.lane.b32.xlu1 %v4595_v3, %s7204_s27  ;;  %732 = vrot.lane.b32.xlu0 %v4604_v5, %s7204_s27  ;;  %s7227_s27 = smov 107  }
  0x3e   : > { %744 = vrot.lane.b32.xlu1 %v4587_v1, %s7202_s28  ;;  %742 = vrot.lane.b32.xlu0 %v668_v2, %s7202_s28 }
  0x42   : > { %754 = vrot.lane.b32.xlu1 %v4587_v1, %s7216_s1  ;;  %746 = vrot.lane.b32.xlu0 %v669_v4, %s7202_s28  ;;  %s7280_s28 = smov 126  }
  0x46   : > { %758 = vrot.lane.b32.xlu1 %v4595_v3, %s7216_s1  ;;  %756 = vrot.lane.b32.xlu0 %v4604_v5, %s7216_s1  ;;  %s7288_s1 = smov 91  }
  0x4a   : > { %786 = vperm.xlu0 %4308, %v780_v8   ;;  %791 = vperm.xlu1 %4309, %v781_v9  }
  0x4e   : > { %801 = vperm.xlu0 %4308, %v783_v10   ;;  %796 = vperm.xlu1 %4309, %v782_v11  }
  0x52   : > { %1078 = vrot.lane.b32.xlu0 %v4666_v12, %s7280_s28  ;;  %1075 = vrot.lane.b32.xlu1 %v1074_v13, %s7281_s25 }
  0x56   : > { %1084 = vrot.lane.b32.xlu0 %v4666_v12, %s7219_s3  ;;  %1081 = vrot.lane.b32.xlu1 %v1074_v13, %s7221_s23  ;;  %s7230_s3 = smov 114   ;;  %s4468_s23 = smov 115  }
  0x5a   : > { %1090 = vrot.lane.b32.xlu0 %v4666_v12, %s7282_s0  ;;  %1087 = vrot.lane.b32.xlu1 %v1074_v13, %s7223_s24  ;;  %s646_s24 = scalar_lea.vmem %s7283_s19, %s3926_s22  ;;  %s4464_s19 = smov 121  }
  0x5b   : > { %v4698_v18 = vld [vmem:[%s646_s24] sm:$0xf]  ;;  %s4466_s22 = smov 120   ;;  %s7285_s24 = smov 110  }
  0x5c   : > { %v1266_v19 = vrot.slane %v4698_v18, 4 }
  0x5e   : > { %1096 = vrot.lane.b32.xlu0 %v4666_v12, %s7225_s26  ;;  %1093 = vrot.lane.b32.xlu1 %v1074_v13, %s7227_s27  ;;  %s7286_s27 = smov 109   ;;  %s7373_s26 = smov 117  }
  0x62   : > { %1119 = vperm.xlu0 %4308, %v3947_v14   ;;  %1114 = vperm.xlu1 %4309, %v3946_v15  }
  0x66   : > { %1129 = vperm.xlu0 %4308, %v3949_v16   ;;  %1124 = vperm.xlu1 %4309, %v3948_v17  }
  0x6a   : > { %1270 = vrot.lane.b32.xlu0 %v4698_v18, %s7280_s28  ;;  %1267 = vrot.lane.b32.xlu1 %v1266_v19, %s7281_s25 }
  0x6e   : > { %1276 = vrot.lane.b32.xlu0 %v4698_v18, %s4464_s19  ;;  %1273 = vrot.lane.b32.xlu1 %v1266_v19, %s4465_s18 }
  0x72   : > { %1282 = vrot.lane.b32.xlu0 %v4698_v18, %s7284_s13  ;;  %1279 = vrot.lane.b32.xlu1 %v1266_v19, %s4466_s22 }
  0x76   : > { %1288 = vrot.lane.b32.xlu0 %v4698_v18, %s7230_s3  ;;  %1285 = vrot.lane.b32.xlu1 %v1266_v19, %s4468_s23  ;;  %v777_v19 = vld [vmem:[%s7278_s21 + $0x8] sm:$0xff]  ;;  %s7287_s3 = smov 92  }
  0x7a   : > { %1306 = vperm.xlu1 %4309, %v3960_v20   ;;  %1311 = vperm.xlu0 %4308, %v3961_v22  }
  0x7e   : > { %1316 = vperm.xlu1 %4309, %v3962_v21   ;;  %1321 = vperm.xlu0 %4308, %v3963_v23   ;;  %v778_v21 = vld [vmem:[%s7278_s21 + $0x10] sm:$0xff] }
  0x82   : > { %4311 = vrot.lane.b32.xlu1 %v4458_v7, %s7281_s25  ;;  %4316 = vrot.lane.b32.xlu0 %v4458_v7, %s7281_s25 }
  0x86   : > { %4321 = vrot.lane.b32.xlu1 %v4458_v7, %s7280_s28  ;;  %4326 = vrot.lane.b32.xlu0 %v4458_v7, %s7280_s28 }
  0x8a   : > { %4331 = vrot.lane.b32.xlu1 %v4458_v7, %s7285_s24  ;;  %4336 = vrot.lane.b32.xlu0 %v4458_v7, %s7285_s24 }
  0x8c   : > { %v4736_v25 = vpop.permute.xlu1 %682  ;;  %v4738_v26 = vpop.permute.xlu0 %672 }
  0x8e   : > { %1789 = vperm.xlu1 %4309, %v1785_v24   ;;  %1794 = vperm.xlu0 %4308, %v1786_v29  }
  0x90   : > { %v4742_v27 = vpop.permute.xlu1 %686  ;;  %v4744_v28 = vpop.permute.xlu0 %670 }
  0x91   : > { %v677_v13 = vsel %vm676_vm3, %v4744_v28, %v4738_v26 }
  0x92   : > { %v764_v22 = vsel %vm763_vm6, %v4587_v1, %v677_v13  ;;  %v3942_v1 = vld [vmem:[%s7278_s21 + $0x20] sm:$0xff]  ;;  %4341 = vrot.lane.b32.xlu1 %v4458_v7, %s4469_s29  ;;  %4346 = vrot.lane.b32.xlu0 %v4458_v7, %s4469_s29 }
  0x94   : > { %v4751_v30 = vpop.permute.xlu1 %674  ;;  %v4753_v31 = vpop.permute.xlu0 %684 }
  0x95   : > { %v678_v48 = vsel %vm676_vm3, %v4738_v26, %v4751_v30  ;;  %v690_v9 = vsel %vm688_vm9, %v4753_v31, %v4742_v27  ;;  %v689_v14 = vsel %vm688_vm9, %v4736_v25, %v4753_v31  ;;  %v766_v17 = vsel %vm763_vm6, %v4595_v3, %v4751_v30  ;;  %v779_v3 = vld [vmem:[%s7278_s21 + $0x18] sm:$0xff] }
  0x96   : > { %v765_v20 = vsel %vm763_vm6, %v4604_v5, %v678_v48 }
  0x98   : > { %v697_v32 = vpop.permute.xlu1 %696  ;;  %v695_v33 = vpop.permute.xlu0 %694 }
  0x99   : > { %v701_v2 = vsel %vm700_vm4, %v695_v33, %v697_v32 }
  0x9a   : > { %v767_v16 = vsel %vm763_vm6, %v689_v14, %v701_v2 }
  0x9c   : > { %v707_v34 = vpop.permute.xlu1 %706  ;;  %v699_v35 = vpop.permute.xlu0 %698 }
  0x9d   : > { %v702_v52 = vsel %vm700_vm4, %v697_v32, %v699_v35  ;;  %v769_v11 = vsel %vm763_vm6, %v4742_v27, %v699_v35  ;;  %v3956_v27 = vld [vmem:[%s7278_s21 + $0x40] sm:$0xff] }
  0x9e   : > { %v768_v15 = vsel %vm763_vm6, %v690_v9, %v702_v52 }
  0xa0   : > { %v711_v36 = vpop.permute.xlu1 %710  ;;  %v709_v37 = vpop.permute.xlu0 %708 }
  0xa1   : > { %v714_v62 = vsel %vm712_vm7, %v709_v37, %v711_v36  ;;  %v713_v4 = vsel %vm712_vm7, %v707_v34, %v709_v37 }
  0xa4   : > { %v721_v38 = vpop.permute.xlu1 %720  ;;  %v719_v39 = vpop.permute.xlu0 %718 }
  0xa5   : > { %v725_v59 = vsel %vm724_vm8, %v719_v39, %v721_v38 }
  0xa6   : > { %v770_v10 = vsel %vm763_vm6, %v713_v4, %v725_v59 }
  0xa8   : > { %v731_v40 = vpop.permute.xlu1 %730  ;;  %v723_v41 = vpop.permute.xlu0 %722 }
  0xa9   : > { %v726_v56 = vsel %vm724_vm8, %v721_v38, %v723_v41  ;;  %v772_v0 = vsel %vm763_vm6, %v711_v36, %v723_v41 }
  0xaa   : > { %v771_v8 = vsel %vm763_vm6, %v714_v62, %v726_v56  ;;  %v3957_v56 = vld [vmem:[%s7278_s21 + $0x48] sm:$0xff]  ;;  %v1021_v62 = vld [vmem:[%s7195_s14] sm:$0x7] }
  0xac   : > { %v735_v42 = vpop.permute.xlu1 %734  ;;  %v733_v43 = vpop.permute.xlu0 %732 }
  0xad   : > { %v738_v57 = vsel %vm736_vm5, %v733_v43, %v735_v42  ;;  %v737_v60 = vsel %vm736_vm5, %v731_v40, %v733_v43  ;;  %v3944_v43 = vld [vmem:[%s7278_s21 + $0x30] sm:$0xff] }
  0xb0   : > { %v745_v44 = vpop.permute.xlu1 %744  ;;  %v743_v45 = vpop.permute.xlu0 %742 }
  0xb1   : > { %v749_v53 = vsel %vm748_vm1, %v743_v45, %v745_v44  ;;  %v3945_v45 = vld [vmem:[%s7278_s21 + $0x38] sm:$0xff] }
  0xb2   : > { %v773_v63 = vsel %vm763_vm6, %v737_v60, %v749_v53 }
  0xb4   : > { %v755_v46 = vpop.permute.xlu1 %754  ;;  %v747_v47 = vpop.permute.xlu0 %746 }
  0xb5   : > { %v750_v49 = vsel %vm748_vm1, %v745_v44, %v747_v47  ;;  %v775_v58 = vsel %vm763_vm6, %v735_v42, %v747_v47  ;;  %v3943_v42 = vld [vmem:[%s7278_s21 + $0x28] sm:$0xff] }
  0xb6   : > { %v774_v61 = vsel %vm763_vm6, %v738_v57, %v750_v49  ;;  %v3958_v57 = vld [vmem:[%s7278_s21 + $0x50] sm:$0xff] }
  0xb8   : > { %v759_v50 = vpop.permute.xlu1 %758  ;;  %v757_v51 = vpop.permute.xlu0 %756 }
  0xb9   : > { %4174 = vmatprep.subr.msk.mxu1 %vm763_vm6, %v759_v50  ;;  %v762_v54 = vsel %vm760_vm2, %v757_v51, %v759_v50  ;;  %v761_v55 = vsel %vm760_vm2, %v755_v46, %v757_v51 }
  0xba   : > { %3931 = vmatprep.subr.msk.mxu0 %vm763_vm6, %v762_v54  ;;  %4175 = vmatpush3.msk.msra.mxu1 %vm763_vm6, %v759_v50 }
  0xbb   : > { %3932 = vmatpush1.msk.msra.mxu0 %vm763_vm6, %v761_v55  ;;  %4176 = vmatprep.subr.mxu1 %v775_v58 }
  0xbc   : > { %847 = vmatprep.subr.mxu0 %v774_v61  ;;  %4177 = vmatpush3.msra.mxu1 %v775_v58  ;;  %v1023_v58 = vlaneseq }
  0xbd   : > { %848 = vmatpush1.msra.mxu0 %v773_v63  ;;  %4178 = vmatprep.subr.mxu1 %v772_v0 }
  0xbe   : > { %849 = vmatprep.subr.mxu0 %v771_v8  ;;  %4179 = vmatpush3.msra.mxu1 %v772_v0  ;;  %v1024_v59 = vshrl.u32 %v1023_v58, 7 }
  0xbf   : > { %850 = vmatpush1.msra.mxu0 %v770_v10  ;;  %4180 = vmatprep.subr.mxu1 %v769_v11 }
  0xc0   : > { %851 = vmatprep.subr.mxu0 %v768_v15  ;;  %4181 = vmatpush3.msra.mxu1 %v769_v11  ;;  %v1033_v60 = vsub.s32 2, %v1024_v59  ;;  %v1025_v2 = vsub.s32 0, %v1024_v59  ;;  %v1029_v9 = vsub.s32 1, %v1024_v59 }
  0xc1   : > { %852 = vmatpush1.msra.mxu0 %v767_v16  ;;  %4182 = vmatprep.subr.mxu1 %v766_v17 }
  0xc2   : > { %853 = vmatprep.subr.mxu0 %v765_v20  ;;  %4183 = vmatpush3.msra.mxu1 %v766_v17  ;;  %v1034_v11 = vrot.slane %v1021_v62, %v1033_v60 }
  0xc3   : > { %854 = vmatpush1.msra.mxu0 %v764_v22  ;;  %4185 = vmatmul.mubr.msk.f32.vlgmr.msra.gmra.mxu1 %vm804_vm0, %v777_v19 }
  0xc4   : > { %3933 = vmatmul.mubr.msk.f32.vlgmr.msra.gmra.mxu0 %vm804_vm0, %v4635_v6  ;;  %4187 = vmatprep.mubr.msk.f32.mxu1 %vm804_vm0, %v778_v21 }
  0xc5   : > { %v4813_v5 = vpop.permute.xlu0 %786  ;;  %v4815_v23 = vpop.permute.xlu1 %791  ;;  %893 = vmatprep.mubr.f32.mxu0 %v4458_v7 }
  0xc7   : > { %4188 = vmatmul.mubr.msk.f32.gmra.mxu1 %vm804_vm0, %v779_v3 }
  0xc8   : > { %3934 = vmatmul.mubr.msk.f32.gmra.mxu0 %vm804_vm0, %v777_v19  ;;  %4200 = vmatprep.mubr.msk.f32.mxu1 %vm804_vm0, %v3942_v1  ;;  %v1026_v19 = vrot.slane %v1021_v62, %v1025_v2 }
  0xc9   : > { %v4824_v6 = vpop.permute.xlu0 %801  ;;  %v4826_v24 = vpop.permute.xlu1 %796  ;;  %899 = vmatprep.mubr.f32.mxu0 %v4458_v7 }
  0xcc   : > { %3935 = vmatmul.mubr.msk.f32.gmra.mxu0 %vm804_vm0, %v778_v21 }
  0xcd   : > { %v1079_v25 = vpop.permute.xlu0 %1078  ;;  %v1076_v26 = vpop.permute.xlu1 %1075  ;;  %905 = vmatprep.mubr.f32.mxu0 %v4458_v7 }
  0xce   : > { %v1098_v39 = vsel %vm763_vm6, %v4666_v12, %v1076_v26 }
  0xd0   : > { %3936 = vmatmul.mubr.msk.f32.gmra.mxu0 %vm804_vm0, %v779_v3 }
  0xd1   : > { %v1085_v28 = vpop.permute.xlu0 %1084  ;;  %v1082_v29 = vpop.permute.xlu1 %1081  ;;  %4216 = vmatprep.mubr.msk.f32.mxu0 %vm804_vm0, %v3956_v27 }
  0xd2   : > { %v1099_v38 = vsel %vm763_vm6, %v1079_v25, %v1082_v29  ;;  %v1030_v25 = vrot.slane %v1021_v62, %v1029_v9 }
  0xd5   : > { %v1091_v30 = vpop.permute.xlu0 %1090  ;;  %v1088_v31 = vpop.permute.xlu1 %1087 }
  0xd6   : > { %v1100_v35 = vsel %vm763_vm6, %v1085_v28, %v1088_v31 }
  0xd9   : > { %v1097_v32 = vpop.permute.xlu0 %1096  ;;  %v1094_v33 = vpop.permute.xlu1 %1093 }
  0xda   : > { %4190 = vmatprep.subr.msk.mxu1 %vm763_vm6, %v1097_v32  ;;  %v1101_v34 = vsel %vm763_vm6, %v1091_v30, %v1094_v33 }
  0xdb   : > { %4191 = vmatpush3.msk.msra.mxu1 %vm763_vm6, %v1097_v32 }
  0xdc   : > { %4192 = vmatprep.subr.mxu1 %v1101_v34 }
  0xdd   : > { %4193 = vmatpush3.msra.mxu1 %v1101_v34  ;;  %v4840_v36 = vpop.permute.xlu0 %1119  ;;  %v4842_v37 = vpop.permute.xlu1 %1114 }
  0xde   : > { %4194 = vmatprep.subr.mxu1 %v1100_v35 }
  0xdf   : > { %4195 = vmatpush3.msra.mxu1 %v1100_v35 }
  0xe0   : > { %4196 = vmatprep.subr.mxu1 %v1099_v38 }
  0xe1   : > { %4197 = vmatpush3.msra.mxu1 %v1099_v38  ;;  %v4847_v40 = vpop.permute.xlu0 %1129  ;;  %v4849_v41 = vpop.permute.xlu1 %1124 }
  0xe2   : > { %4198 = vmatprep.subr.mxu1 %v1098_v39 }
  0xe3   : > { %4199 = vmatpush3.msra.mxu1 %v1098_v39 }
  0xe4   : > { %4201 = vmatmul.mubr.msk.f32.vlgmr.msra.gmra.mxu1 %vm804_vm0, %v3943_v42 }
  0xe5   : > { %v1271_v44 = vpop.permute.xlu0 %1270  ;;  %v1268_v12 = vpop.permute.xlu1 %1267  ;;  %4203 = vmatprep.mubr.msk.f32.mxu1 %vm804_vm0, %v3944_v43 }
  0xe6   : > { %v1290_v55 = vsel %vm763_vm6, %v4698_v18, %v1268_v12  ;;  %v3959_v18 = vld [vmem:[%s7278_s21 + $0x58] sm:$0xff] }
  0xe8   : > { %4204 = vmatmul.mubr.msk.f32.gmra.mxu1 %vm804_vm0, %v3945_v45 }
  0xe9   : > { %v1277_v46 = vpop.permute.xlu0 %1276  ;;  %v1274_v47 = vpop.permute.xlu1 %1273 }
  0xea   : > { %v1291_v54 = vsel %vm763_vm6, %v1271_v44, %v1274_v47 }
  0xed   : > { %v1283_v48 = vpop.permute.xlu0 %1282  ;;  %v1280_v49 = vpop.permute.xlu1 %1279 }
  0xee   : > { %v1292_v53 = vsel %vm763_vm6, %v1277_v46, %v1280_v49 }
  0xf1   : > { %v1289_v50 = vpop.permute.xlu0 %1288  ;;  %v1286_v51 = vpop.permute.xlu1 %1285 }
  0xf2   : > { %4206 = vmatprep.subr.msk.mxu0 %vm763_vm6, %v1289_v50  ;;  %v1293_v52 = vsel %vm763_vm6, %v1283_v48, %v1286_v51 }
  0xf3   : > { %4207 = vmatpush3.msk.msra.mxu0 %vm763_vm6, %v1289_v50  ;;  %vm4472_vm6 = vmmov 0  }
  0xf4   : > { %4208 = vmatprep.subr.mxu0 %v1293_v52 }
  0xf5   : > { %4209 = vmatpush3.msra.mxu0 %v1293_v52 }
  0xf6   : > { %4210 = vmatprep.subr.mxu0 %v1292_v53 }
  0xf7   : > { %4211 = vmatpush3.msra.mxu0 %v1292_v53 }
  0xf8   : > { %4212 = vmatprep.subr.mxu0 %v1291_v54 }
  0xf9   : > { %4213 = vmatpush3.msra.mxu0 %v1291_v54 }
  0xfa   : > { %4214 = vmatprep.subr.mxu0 %v1290_v55 }
  0xfb   : > { %4215 = vmatpush3.msra.mxu0 %v1290_v55 }
  0xfc   : > { %4217 = vmatmul.mubr.msk.f32.vlgmr.msra.gmra.mxu0 %vm804_vm0, %v3957_v56 }
  0xfd   : > { %4219 = vmatprep.mubr.msk.f32.mxu0 %vm804_vm0, %v3958_v57 }
 0x100   : > { %4220 = vmatmul.mubr.msk.f32.gmra.mxu0 %vm804_vm0, %v3959_v18 }
 0x101   : > { %2450 = vmatprep.mubr.f32.mxu0 %v4458_v7 }
 0x183   : > { %v4186_v61 = vpop.f32.mrf.mxu1 }
 0x184   : > { %v984_v63 = vadd.f32 %v4186_v61, %v4815_v23  ;;  %v889_v0 = vpop.f32.mrf.mxu0 }
 0x185   : > { %v890_v4 = vadd.f32 %v889_v0, %v4813_v5  ;;  %v978_v8 = vpop.f32.mrf.mxu1 }
 0x186   : > { %v1002_v10 = vmul.f32 0.1, %v984_v63  ;;  %v979_v7 = vadd.f32 %v978_v8, %v4813_v5  ;;  %v891_v13 = vpop.f32.mrf.mxu0 }
 0x187   : > { %v997_v14 = vmul.f32 0.1, %v890_v4  ;;  %v892_v15 = vadd.f32 %v891_v13, %v4813_v5  ;;  %v4189_v16 = vpop.f32.mrf.mxu1 }
 0x188   : > { %v1014_v17 = vmax.f32 %v984_v63, %v1002_v10  ;;  %v999_v20 = vmul.f32 0.1, %v979_v7  ;;  %v994_v21 = vadd.f32 %v4189_v16, %v4824_v6  ;;  %v895_v22 = vpop.f32.mrf.mxu0 }
 0x189   : > { %v1009_v3 = vmax.f32 %v890_v4, %v997_v14  ;;  %v998_v1 = vmul.f32 0.1, %v892_v15  ;;  %v896_v26 = vadd.f32 %v895_v22, %v4815_v23  ;;  %v988_v27 = vpop.f32.mrf.mxu1 }
 0x18a   : > { %v1043_v28 = vmul.f32 %v1034_v11, %v1014_v17  ;;  %v1011_v29 = vmax.f32 %v979_v7, %v999_v20  ;;  %v1008_v30 = vmul.f32 0.1, %v994_v21  ;;  %v989_v31 = vadd.f32 %v988_v27, %v4826_v24  ;;  %v897_v32 = vpop.f32.mrf.mxu0 }
 0x18b   : > { %v4909_v5 = vmul.f32 %v1026_v19, %v1009_v3  ;;  %v1010_v33 = vmax.f32 %v892_v15, %v998_v1  ;;  %v1000_v34 = vmul.f32 0.1, %v896_v26  ;;  %v898_v35 = vadd.f32 %v897_v32, %v4815_v23  ;;  %v3955_v15 = vld [vmem:[%s7196_s15] ss:$0 sm:$0xff] }
 0x18c   : > { %1065 = vst.msk [vmem:[#allocation2 + $0x38] sm:$0xff] %vm1061_vm13, %v1043_v28  ;;  %v1040_v38 = vmul.f32 %v1034_v11, %v1011_v29  ;;  %v1020_v39 = vmax.f32 %v994_v21, %v1008_v30  ;;  %v1005_v42 = vmul.f32 0.1, %v989_v31  ;;  %v901_v43 = vpop.f32.mrf.mxu0  ;;  %v1312_v28 = vpop.permute.xlu0 %1311 }
 0x18d   : > { %v4913_v44 = vmul.f32 %v1030_v25, %v1010_v33  ;;  %v1012_v12 = vmax.f32 %v896_v26, %v1000_v34  ;;  %v1001_v45 = vmul.f32 0.1, %v898_v35  ;;  %v902_v46 = vadd.f32 %v901_v43, %v4826_v24  ;;  %v1307_v29 = vpop.permute.xlu1 %1306 }
 0x18e   : > { %1062 = vst.msk [vmem:[#allocation2 + $0x18] sm:$0xff] %vm1061_vm13, %v1040_v38  ;;  %v1049_v47 = vmul.f32 %v1034_v11, %v1020_v39  ;;  %v1017_v48 = vmax.f32 %v989_v31, %v1005_v42  ;;  %v903_v49 = vpop.f32.mrf.mxu0  ;;  %v3969_v38 = vld [vmem:[%s7197_s16] ss:$0 sm:$0xff] }
 0x18f   : > { %v4917_v50 = vmul.f32 %v1026_v19, %v1012_v12  ;;  %v1013_v23 = vmax.f32 %v898_v35, %v1001_v45  ;;  %v1003_v51 = vmul.f32 0.1, %v902_v46  ;;  %v904_v52 = vadd.f32 %v903_v49, %v4826_v24 }
 0x190   : > { %1071 = vst.msk [vmem:[#allocation2 + $0x78] sm:$0xff] %vm1061_vm13, %v1049_v47  ;;  %v1046_v53 = vmul.f32 %v1034_v11, %v1017_v48  ;;  %v907_v54 = vpop.f32.mrf.mxu0  ;;  %v1322_v35 = vpop.permute.xlu0 %1321 }
 0x191   : > { %v4921_v55 = vmul.f32 %v1030_v25, %v1013_v23  ;;  %v1015_v56 = vmax.f32 %v902_v46, %v1003_v51  ;;  %v1004_v57 = vmul.f32 0.1, %v904_v52  ;;  %v908_v18 = vadd.f32 %v907_v54, %v4824_v6  ;;  %v1317_v45 = vpop.permute.xlu1 %1316 }
 0x192   : > { %1068 = vst.msk [vmem:[#allocation2 + $0x58] sm:$0xff] %vm1061_vm13, %v1046_v53  ;;  %v909_v58 = vpop.f32.mrf.mxu0 }
 0x193   : > { %v4925_v59 = vmul.f32 %v1026_v19, %v1015_v56  ;;  %v1016_v60 = vmax.f32 %v904_v52, %v1004_v57  ;;  %v1006_v61 = vmul.f32 0.1, %v908_v18  ;;  %v1462_v62 = vld [vmem:[#allocation2 + $0x38] sm:$0xff]  ;;  %v910_v24 = vadd.f32 %v909_v58, %v4824_v6 }
 0x194   : > { %1629 = vrot.lane.b32.xlu0 %v1462_v62, %s7286_s27  ;;  %1501 = vrot.lane.b32.xlu1 %v1462_v62, %s7281_s25 }
 0x195   : > { %v4930_v63 = vmul.f32 %v1030_v25, %v1016_v60  ;;  %v1018_v0 = vmax.f32 %v908_v18, %v1006_v61  ;;  %v1007_v2 = vmul.f32 0.1, %v910_v24  ;;  %v4947_v14 = vld [vmem:[#allocation2 + $0x18] sm:$0xff]  ;;  %v5025_v58 = vpop.permute.xlu1 %4311  ;;  %v5027_v60 = vpop.permute.xlu0 %4316 }
 0x197   : > { %v4932_v4 = vmul.f32 %v1026_v19, %v1018_v0  ;;  %v1019_v8 = vmax.f32 %v910_v24, %v1007_v2  ;;  %v1470_v57 = vld [vmem:[#allocation2 + $0x78] sm:$0xff] }
 0x198   : > { %1661 = vrot.lane.b32.xlu0 %v1462_v62, %s7282_s0  ;;  %1545 = vrot.lane.b32.xlu1 %v1462_v62, %s7280_s28 }
 0x199   : > { %v4936_v9 = vmul.f32 %v1030_v25, %v1019_v8  ;;  %v1466_v18 = vld [vmem:[#allocation2 + $0x58] sm:$0xff]  ;;  %v5033_v61 = vpop.permute.xlu1 %4321 }
 0x19c   : > { %1693 = vrot.lane.b32.xlu0 %v1462_v62, %s7287_s3  ;;  %1589 = vrot.lane.b32.xlu1 %v1462_v62, %s7285_s24 }
 0x19d   : > { %v5042_v24 = vpop.permute.xlu1 %4331 }
 0x1a0   : > { %1725 = vrot.lane.b32.xlu0 %v1462_v62, %s7288_s1  ;;  %1811 = vrot.lane.b32.xlu1 %v1462_v62, %s4469_s29 }
 0x1a1   : > { %v5048_v2 = vpop.permute.xlu1 %1789 }
 0x1a2   : > { %7290 = vst [vmem:[#allocation6_spill] sm:$0xff] %v5048_v2 }
 0x1a4   : > { %1757 = vrot.lane.b32.xlu0 %v1462_v62, %s7289_s2  ;;  %v4202_v6 = vpop.f32.mrf.mxu1  ;;  %1619 = vrot.lane.b32.xlu1 %v4909_v5, %s7286_s27  ;;  %v5035_v62 = vpop.permute.xlu0 %4326 }
 0x1a5   : > { %v1218_v10 = vadd.f32 %v4202_v6, %v4840_v36 }
 0x1a6   : > { %v1212_v11 = vpop.f32.mrf.mxu1 }
 0x1a7   : > { %v1232_v7 = vmul.f32 0.1, %v1218_v10  ;;  %v1213_v13 = vadd.f32 %v1212_v11, %v4842_v37 }
 0x1a8   : > { %v4205_v16 = vpop.f32.mrf.mxu1  ;;  %1623 = vrot.lane.b32.xlu1 %v4947_v14, %s7286_s27  ;;  %1489 = vrot.lane.b32.xlu0 %v4909_v5, %s7281_s25  ;;  %v5044_v0 = vpop.permute.xlu0 %4336 }
 0x1a9   : > { %v1236_v17 = vmax.f32 %v1218_v10, %v1232_v7  ;;  %v1231_v19 = vmul.f32 0.1, %v1213_v13  ;;  %v1228_v36 = vadd.f32 %v4205_v16, %v4847_v40 }
 0x1aa   : > { %v1222_v20 = vpop.f32.mrf.mxu1 }
 0x1ab   : > { %v1247_v37 = vmul.f32 %v3955_v15, %v1236_v17  ;;  %v1235_v21 = vmax.f32 %v1213_v13, %v1231_v19  ;;  %v1234_v22 = vmul.f32 0.1, %v1228_v36  ;;  %v1223_v3 = vadd.f32 %v1222_v20, %v4849_v41 }
 0x1ac   : > { %1651 = vrot.lane.b32.xlu1 %v4909_v5, %s7282_s0  ;;  %1493 = vrot.lane.b32.xlu0 %v4947_v14, %s7281_s25  ;;  %v5050_v8 = vpop.permute.xlu0 %1794 }
 0x1ad   : > { %1261 = vst.msk [vmem:[#allocation3 + $0x18] sm:$0xff] %vm1259_vm14, %v1247_v37  ;;  %v1246_v1 = vmul.f32 %v3955_v15, %v1235_v21  ;;  %v1238_v25 = vmax.f32 %v1228_v36, %v1234_v22  ;;  %v1233_v26 = vmul.f32 0.1, %v1223_v3  ;;  %7291 = vst [vmem:[#allocation7_spill] sm:$0xff] %v5050_v8 }
 0x1af   : > { %1260 = vst.msk [vmem:[#allocation3 + $0x8] sm:$0xff] %vm1259_vm14, %v1246_v1  ;;  %v1249_v40 = vmul.f32 %v3955_v15, %v1238_v25  ;;  %v1237_v27 = vmax.f32 %v1223_v3, %v1233_v26 }
 0x1b0   : > { %1655 = vrot.lane.b32.xlu1 %v4947_v14, %s7282_s0  ;;  %1533 = vrot.lane.b32.xlu0 %v4909_v5, %s7280_s28  ;;  %v5059_v6 = vpop.permute.xlu0 %4346 }
 0x1b1   : > { %1263 = vst.msk [vmem:[#allocation3 + $0x38] sm:$0xff] %vm1259_vm14, %v1249_v40  ;;  %v1248_v41 = vmul.f32 %v3955_v15, %v1237_v27  ;;  %7293 = vst [vmem:[#allocation9_spill] sm:$0xff] %v5059_v6 }
 0x1b3   : > { %1262 = vst.msk [vmem:[#allocation3 + $0x28] sm:$0xff] %vm1259_vm14, %v1248_v41 }
 0x1b4   : > { %1683 = vrot.lane.b32.xlu1 %v4909_v5, %s7287_s3  ;;  %1537 = vrot.lane.b32.xlu0 %v4947_v14, %s7280_s28 }
 0x1b8   : > { %1687 = vrot.lane.b32.xlu1 %v4947_v14, %s7287_s3  ;;  %1577 = vrot.lane.b32.xlu0 %v4909_v5, %s7285_s24 }
 0x1bc   : > { %v4218_v30 = vpop.f32.mrf.mxu0  ;;  %1715 = vrot.lane.b32.xlu1 %v4909_v5, %s7288_s1  ;;  %1581 = vrot.lane.b32.xlu0 %v4947_v14, %s7285_s24 }
 0x1bd   : > { %v1410_v31 = vadd.f32 %v4218_v30, %v1312_v28 }
 0x1be   : > { %v1404_v32 = vpop.f32.mrf.mxu0 }
 0x1bf   : > { %v1424_v33 = vmul.f32 0.1, %v1410_v31  ;;  %v1405_v34 = vadd.f32 %v1404_v32, %v1307_v29 }
 0x1c0   : > { %v4221_v39 = vpop.f32.mrf.mxu0  ;;  %1719 = vrot.lane.b32.xlu1 %v4947_v14, %s7288_s1  ;;  %1799 = vrot.lane.b32.xlu0 %v4909_v5, %s4469_s29 }
 0x1c1   : > { %v1428_v42 = vmax.f32 %v1410_v31, %v1424_v33  ;;  %v1423_v43 = vmul.f32 0.1, %v1405_v34  ;;  %v1420_v12 = vadd.f32 %v4221_v39, %v1322_v35 }
 0x1c2   : > { %v1414_v46 = vpop.f32.mrf.mxu0 }
 0x1c3   : > { %v1439_v47 = vmul.f32 %v3969_v38, %v1428_v42  ;;  %v1427_v48 = vmax.f32 %v1405_v34, %v1423_v43  ;;  %v1426_v49 = vmul.f32 0.1, %v1420_v12  ;;  %v1415_v23 = vadd.f32 %v1414_v46, %v1317_v45 }
 0x1c4   : > { %1747 = vrot.lane.b32.xlu1 %v4909_v5, %s7289_s2  ;;  %1803 = vrot.lane.b32.xlu0 %v4947_v14, %s4469_s29 }
 0x1c5   : > { %1452 = vst.msk [vmem:[#allocation4 + $0x18] sm:$0xff] %vm804_vm0, %v1439_v47  ;;  %v1438_v51 = vmul.f32 %v3969_v38, %v1427_v48  ;;  %v1430_v52 = vmax.f32 %v1420_v12, %v1426_v49  ;;  %v1425_v53 = vmul.f32 0.1, %v1415_v23 }
 0x1c7   : > { %1451 = vst.msk [vmem:[#allocation4 + $0x8] sm:$0xff] %vm804_vm0, %v1438_v51  ;;  %v1441_v54 = vmul.f32 %v3969_v38, %v1430_v52  ;;  %v1429_v56 = vmax.f32 %v1415_v23, %v1425_v53 }
 0x1c8   : > { %1751 = vrot.lane.b32.xlu1 %v4947_v14, %s7289_s2  ;;  %1517 = vrot.lane.b32.xlu0 %v1470_v57, %s7281_s25 }
 0x1c9   : > { %1454 = vst.msk [vmem:[#allocation4 + $0x38] sm:$0xff] %vm804_vm0, %v1441_v54  ;;  %v1440_v5 = vmul.f32 %v3969_v38, %v1429_v56 }
 0x1cb   : > { %1453 = vst.msk [vmem:[#allocation4 + $0x28] sm:$0xff] %vm804_vm0, %v1440_v5 }
 0x1cc   : > { %1491 = vrot.lane.b32.xlu1 %v4913_v44, %s7281_s25  ;;  %1561 = vrot.lane.b32.xlu0 %v1470_v57, %s7280_s28 }
 0x1d0   : > { %1535 = vrot.lane.b32.xlu1 %v4913_v44, %s7280_s28  ;;  %1605 = vrot.lane.b32.xlu0 %v1470_v57, %s7285_s24 }
 0x1d4   : > { %1579 = vrot.lane.b32.xlu1 %v4913_v44, %s7285_s24  ;;  %1621 = vrot.lane.b32.xlu0 %v4913_v44, %s7286_s27 }
 0x1d8   : > { %1801 = vrot.lane.b32.xlu1 %v4913_v44, %s4469_s29  ;;  %1641 = vrot.lane.b32.xlu0 %v1470_v57, %s7286_s27 }
 0x1dc   : > { %1497 = vrot.lane.b32.xlu1 %v4917_v50, %s7281_s25  ;;  %1653 = vrot.lane.b32.xlu0 %v4913_v44, %s7282_s0 }
 0x1e0   : > { %1509 = vrot.lane.b32.xlu1 %v1466_v18, %s7281_s25  ;;  %1673 = vrot.lane.b32.xlu0 %v1470_v57, %s7282_s0 }
 0x1e4   : > { %1541 = vrot.lane.b32.xlu1 %v4917_v50, %s7280_s28  ;;  %1685 = vrot.lane.b32.xlu0 %v4913_v44, %s7287_s3 }
 0x1e8   : > { %1553 = vrot.lane.b32.xlu1 %v1466_v18, %s7280_s28  ;;  %1705 = vrot.lane.b32.xlu0 %v1470_v57, %s7287_s3 }
 0x1ec   : > { %1585 = vrot.lane.b32.xlu1 %v4917_v50, %s7285_s24  ;;  %1717 = vrot.lane.b32.xlu0 %v4913_v44, %s7288_s1 }
 0x1f0   : > { %1597 = vrot.lane.b32.xlu1 %v1466_v18, %s7285_s24  ;;  %1737 = vrot.lane.b32.xlu0 %v1470_v57, %s7288_s1 }
 0x1f4   : > { %1635 = vrot.lane.b32.xlu1 %v1466_v18, %s7286_s27  ;;  %1749 = vrot.lane.b32.xlu0 %v4913_v44, %s7289_s2  ;;  %v5057_v44 = vpop.permute.xlu1 %4341 }
 0x1f5   : > { %7292 = vst [vmem:[#allocation8_spill] sm:$0xff] %v5057_v44 }
 0x1f8   : > { %1667 = vrot.lane.b32.xlu1 %v1466_v18, %s7282_s0  ;;  %1769 = vrot.lane.b32.xlu0 %v1470_v57, %s7289_s2 }
 0x1fc   : > { %1699 = vrot.lane.b32.xlu1 %v1466_v18, %s7287_s3  ;;  %1827 = vrot.lane.b32.xlu0 %v1470_v57, %s4469_s29 }
 0x200   : > { %1731 = vrot.lane.b32.xlu1 %v1466_v18, %s7288_s1  ;;  %1625 = vrot.lane.b32.xlu0 %v4917_v50, %s7286_s27 }
 0x204   : > { %1763 = vrot.lane.b32.xlu1 %v1466_v18, %s7289_s2  ;;  %1657 = vrot.lane.b32.xlu0 %v4917_v50, %s7282_s0 }
 0x206   : > { %v5064_v10 = vpop.permute.xlu1 %1501  ;;  %v5066_v11 = vpop.permute.xlu0 %1629 }
 0x208   : > { %1807 = vrot.lane.b32.xlu1 %v4917_v50, %s4469_s29  ;;  %1689 = vrot.lane.b32.xlu0 %v4917_v50, %s7287_s3 }
 0x20a   : > { %v5072_v7 = vpop.permute.xlu1 %1545  ;;  %v5074_v13 = vpop.permute.xlu0 %1661 }
 0x20c   : > { %1819 = vrot.lane.b32.xlu1 %v1466_v18, %s4469_s29  ;;  %1721 = vrot.lane.b32.xlu0 %v4917_v50, %s7288_s1 }
 0x20e   : > { %v5079_v14 = vpop.permute.xlu1 %1589  ;;  %v5081_v15 = vpop.permute.xlu0 %1693 }
 0x210   : > { %1627 = vrot.lane.b32.xlu1 %v4921_v55, %s7286_s27  ;;  %1753 = vrot.lane.b32.xlu0 %v4917_v50, %s7289_s2 }
 0x212   : > { %v5087_v16 = vpop.permute.xlu1 %1811  ;;  %v5089_v17 = vpop.permute.xlu0 %1725 }
 0x213   : > { %7294 = vst [vmem:[#allocation10_spill] sm:$0xff] %v5087_v16  ;;  %7295 = vst [vmem:[#allocation11_spill] sm:$0xff] %v5089_v17 }
 0x214   : > { %1659 = vrot.lane.b32.xlu1 %v4921_v55, %s7282_s0  ;;  %1499 = vrot.lane.b32.xlu0 %v4921_v55, %s7281_s25 }
 0x216   : > { %v5095_v19 = vpop.permute.xlu0 %1757  ;;  %v5097_v36 = vpop.permute.xlu1 %1619 }
 0x217   : > { %7296 = vst [vmem:[#allocation12_spill] sm:$0xff] %v5095_v19 }
 0x218   : > { %1691 = vrot.lane.b32.xlu1 %v4921_v55, %s7287_s3  ;;  %1543 = vrot.lane.b32.xlu0 %v4921_v55, %s7280_s28 }
 0x21a   : > { %v5103_v50 = vpop.permute.xlu1 %1623  ;;  %v5105_v20 = vpop.permute.xlu0 %1489 }
 0x21c   : > { %1723 = vrot.lane.b32.xlu1 %v4921_v55, %s7288_s1  ;;  %1587 = vrot.lane.b32.xlu0 %v4921_v55, %s7285_s24 }
 0x21e   : > { %v5111_v37 = vpop.permute.xlu1 %1651  ;;  %v5113_v21 = vpop.permute.xlu0 %1493 }
 0x220   : > { %1755 = vrot.lane.b32.xlu1 %v4921_v55, %s7289_s2  ;;  %1809 = vrot.lane.b32.xlu0 %v4921_v55, %s4469_s29 }
 0x222   : > { %v5119_v22 = vpop.permute.xlu1 %1655  ;;  %v5121_v3 = vpop.permute.xlu0 %1533 }
 0x224   : > { %1505 = vrot.lane.b32.xlu1 %v4925_v59, %s7281_s25  ;;  %1507 = vrot.lane.b32.xlu0 %v4930_v63, %s7281_s25 }
 0x226   : > { %v5127_v1 = vpop.permute.xlu1 %1683  ;;  %v5129_v25 = vpop.permute.xlu0 %1537 }
 0x228   : > { %1549 = vrot.lane.b32.xlu1 %v4925_v59, %s7280_s28  ;;  %1551 = vrot.lane.b32.xlu0 %v4930_v63, %s7280_s28 }
 0x22a   : > { %v5135_v55 = vpop.permute.xlu1 %1687  ;;  %v5137_v26 = vpop.permute.xlu0 %1577 }
 0x22c   : > { %1593 = vrot.lane.b32.xlu1 %v4925_v59, %s7285_s24  ;;  %1595 = vrot.lane.b32.xlu0 %v4930_v63, %s7285_s24 }
 0x22e   : > { %v5143_v40 = vpop.permute.xlu1 %1715  ;;  %v5145_v27 = vpop.permute.xlu0 %1581 }
 0x230   : > { %1631 = vrot.lane.b32.xlu1 %v4925_v59, %s7286_s27  ;;  %1633 = vrot.lane.b32.xlu0 %v4930_v63, %s7286_s27 }
 0x232   : > { %v5151_v41 = vpop.permute.xlu1 %1719  ;;  %v5153_v28 = vpop.permute.xlu0 %1799 }
 0x233   : > { %7297 = vst [vmem:[#allocation13_spill] sm:$0xff] %v5153_v28 }
 0x234   : > { %1663 = vrot.lane.b32.xlu1 %v4925_v59, %s7282_s0  ;;  %1665 = vrot.lane.b32.xlu0 %v4930_v63, %s7282_s0 }
 0x236   : > { %v5159_v29 = vpop.permute.xlu1 %1747  ;;  %v5161_v30 = vpop.permute.xlu0 %1803 }
 0x237   : > { %7298 = vst [vmem:[#allocation14_spill] sm:$0xff] %v5159_v29  ;;  %7299 = vst [vmem:[#allocation15_spill] sm:$0xff] %v5161_v30 }
 0x238   : > { %1695 = vrot.lane.b32.xlu1 %v4925_v59, %s7287_s3  ;;  %1697 = vrot.lane.b32.xlu0 %v4930_v63, %s7287_s3 }
 0x23a   : > { %v5167_v31 = vpop.permute.xlu1 %1751  ;;  %v5169_v32 = vpop.permute.xlu0 %1517 }
 0x23b   : > { %7300 = vst [vmem:[#allocation16_spill] sm:$0xff] %v5167_v31 }
 0x23c   : > { %1727 = vrot.lane.b32.xlu1 %v4925_v59, %s7288_s1  ;;  %1729 = vrot.lane.b32.xlu0 %v4930_v63, %s7288_s1 }
 0x23e   : > { %v5175_v33 = vpop.permute.xlu1 %1491  ;;  %v5177_v34 = vpop.permute.xlu0 %1561 }
 0x240   : > { %1759 = vrot.lane.b32.xlu1 %v4925_v59, %s7289_s2  ;;  %1761 = vrot.lane.b32.xlu0 %v4930_v63, %s7289_s2 }
 0x242   : > { %v5183_v35 = vpop.permute.xlu1 %1535  ;;  %v5185_v38 = vpop.permute.xlu0 %1605 }
 0x243   : > { %v1564_v17 = vsel %vm688_vm9, %v5121_v3, %v5183_v35 }
 0x244   : > { %1815 = vrot.lane.b32.xlu1 %v4925_v59, %s4469_s29  ;;  %1817 = vrot.lane.b32.xlu0 %v4930_v63, %s4469_s29 }
 0x246   : > { %v5191_v39 = vpop.permute.xlu1 %1579  ;;  %v5193_v42 = vpop.permute.xlu0 %1621 }
 0x248   : > { %1515 = vrot.lane.b32.xlu1 %v4936_v9, %s7281_s25  ;;  %1513 = vrot.lane.b32.xlu0 %v4932_v4, %s7281_s25 }
 0x24a   : > { %v5199_v43 = vpop.permute.xlu1 %1801  ;;  %v5201_v12 = vpop.permute.xlu0 %1641 }
 0x24b   : > { %7301 = vst [vmem:[#allocation17_spill] sm:$0xff] %v5199_v43 }
 0x24c   : > { %1559 = vrot.lane.b32.xlu1 %v4936_v9, %s7280_s28  ;;  %1557 = vrot.lane.b32.xlu0 %v4932_v4, %s7280_s28 }
 0x24e   : > { %v5207_v59 = vpop.permute.xlu1 %1497  ;;  %v5209_v63 = vpop.permute.xlu0 %1653 }
 0x250   : > { %1603 = vrot.lane.b32.xlu1 %v4936_v9, %s7285_s24  ;;  %1601 = vrot.lane.b32.xlu0 %v4932_v4, %s7285_s24  ;;  %s7377_s24 = smov 107  }
 0x252   : > { %v5215_v45 = vpop.permute.xlu1 %1509  ;;  %v5217_v46 = vpop.permute.xlu0 %1673 }
 0x254   : > { %1639 = vrot.lane.b32.xlu1 %v4936_v9, %s7286_s27  ;;  %1637 = vrot.lane.b32.xlu0 %v4932_v4, %s7286_s27 }
 0x256   : > { %v5223_v47 = vpop.permute.xlu1 %1541  ;;  %v5225_v48 = vpop.permute.xlu0 %1685 }
 0x258   : > { %1671 = vrot.lane.b32.xlu1 %v4936_v9, %s7282_s0  ;;  %1669 = vrot.lane.b32.xlu0 %v4932_v4, %s7282_s0 }
 0x25a   : > { %v5231_v49 = vpop.permute.xlu1 %1553  ;;  %v5233_v23 = vpop.permute.xlu0 %1705 }
 0x25c   : > { %1703 = vrot.lane.b32.xlu1 %v4936_v9, %s7287_s3  ;;  %1701 = vrot.lane.b32.xlu0 %v4932_v4, %s7287_s3 }
 0x25e   : > { %v5239_v51 = vpop.permute.xlu1 %1585  ;;  %v5241_v52 = vpop.permute.xlu0 %1717 }
 0x260   : > { %1735 = vrot.lane.b32.xlu1 %v4936_v9, %s7288_s1  ;;  %1733 = vrot.lane.b32.xlu0 %v4932_v4, %s7288_s1 }
 0x262   : > { %v5247_v53 = vpop.permute.xlu1 %1597  ;;  %v5249_v54 = vpop.permute.xlu0 %1737 }
 0x263   : > { %7302 = vst [vmem:[#allocation18_spill] sm:$0xff] %v5249_v54 }
 0x264   : > { %1767 = vrot.lane.b32.xlu1 %v4936_v9, %s7289_s2  ;;  %1765 = vrot.lane.b32.xlu0 %v4932_v4, %s7289_s2  ;;  %s7429_s2 = sld [smem:[#allocation60_spill]] }
 0x266   : > { %v5255_v56 = vpop.permute.xlu1 %1635  ;;  %v5257_v57 = vpop.permute.xlu0 %1749 }
 0x267   : > { %7303 = vst [vmem:[#allocation19_spill] sm:$0xff] %v5257_v57 }
 0x268   : > { %1825 = vrot.lane.b32.xlu1 %v4936_v9, %s4469_s29  ;;  %1823 = vrot.lane.b32.xlu0 %v4932_v4, %s4469_s29  ;;  %v4313_v4 = vunpack.i.l.bf16 %v5025_v58 }
 0x26a   : > { %v5263_v5 = vpop.permute.xlu1 %1667  ;;  %v5265_v18 = vpop.permute.xlu0 %1769  ;;  %v1519_v16 = vsel %vm676_vm3, %v4313_v4, %v5105_v20  ;;  %v4333_v4 = vunpack.i.l.bf16 %v5042_v24 }
 0x26b   : > { %7304 = vst [vmem:[#allocation20_spill] sm:$0xff] %v5265_v18 }
 0x26c   : > { %1925 = vrot.lane.b32.xlu1 %v5097_v36, %s4469_s29  ;;  %1843 = vrot.lane.b32.xlu0 %v5064_v10, %s4469_s29  ;;  %v1607_v18 = vsel %vm700_vm4, %v4333_v4, %v5137_v26 }
 0x26e   : > { %v5271_v8 = vpop.permute.xlu1 %1699  ;;  %v5273_v2 = vpop.permute.xlu0 %1827 }
 0x26f   : > { %7305 = vst [vmem:[#allocation21_spill] sm:$0xff] %v5273_v2  ;;  %v4323_v2 = vunpack.i.l.bf16 %v5033_v61 }
 0x270   : > { %1957 = vrot.lane.b32.xlu1 %v5111_v37, %s4469_s29  ;;  %1875 = vrot.lane.b32.xlu0 %v5072_v7, %s4469_s29 }
 0x271   : > { %v1563_v44 = vsel %vm688_vm9, %v4323_v2, %v5121_v3 }
 0x272   : > { %v5280_v9 = vpop.permute.xlu1 %1731  ;;  %v5282_v30 = vpop.permute.xlu0 %1625 }
 0x273   : > { %7306 = vst [vmem:[#allocation22_spill] sm:$0xff] %v5280_v9 }
 0x274   : > { %1829 = vrot.lane.b32.xlu1 %v1519_v16, %s4469_s29  ;;  %1907 = vrot.lane.b32.xlu0 %v5079_v14, %s4469_s29 }
 0x276   : > { %v5290_v28 = vpop.permute.xlu1 %1763  ;;  %v5292_v43 = vpop.permute.xlu0 %1657 }
 0x277   : > { %7307 = vst [vmem:[#allocation23_spill] sm:$0xff] %v5290_v28  ;;  %v1521_v28 = vsel %vm676_vm3, %v5175_v33, %v5113_v21 }
 0x278   : > { %1861 = vrot.lane.b32.xlu1 %v1563_v44, %s4469_s29  ;;  %1939 = vrot.lane.b32.xlu0 %v5066_v11, %s4469_s29 }
 0x27a   : > { %v5300_v16 = vpop.permute.xlu1 %1807  ;;  %v5302_v6 = vpop.permute.xlu0 %1689 }
 0x27b   : > { %7308 = vst [vmem:[#allocation24_spill] sm:$0xff] %v5300_v16 }
 0x27c   : > { %1893 = vrot.lane.b32.xlu1 %v1607_v18, %s4469_s29  ;;  %1835 = vrot.lane.b32.xlu0 %v5113_v21, %s4469_s29  ;;  %v1565_v18 = vsel %vm688_vm9, %v5183_v35, %v5129_v25  ;;  %v1643_v35 = vsel %vm712_vm7, %v5097_v36, %v5193_v42 }
 0x27e   : > { %v5309_v2 = vpop.permute.xlu1 %1819  ;;  %v5311_v44 = vpop.permute.xlu0 %1721 }
 0x27f   : > { %7309 = vst [vmem:[#allocation25_spill] sm:$0xff] %v5309_v2 }
 0x280   : > { %1833 = vrot.lane.b32.xlu1 %v1521_v28, %s4469_s29  ;;  %1867 = vrot.lane.b32.xlu0 %v5129_v25, %s4469_s29  ;;  %v1609_v28 = vsel %vm700_vm4, %v5191_v39, %v5145_v27 }
 0x282   : > { %v5319_v16 = vpop.permute.xlu1 %1627  ;;  %v5321_v4 = vpop.permute.xlu0 %1753 }
 0x283   : > { %7310 = vst [vmem:[#allocation26_spill] sm:$0xff] %v5321_v4 }
 0x284   : > { %1865 = vrot.lane.b32.xlu1 %v1565_v18, %s4469_s29  ;;  %1899 = vrot.lane.b32.xlu0 %v5145_v27, %s4469_s29  ;;  %v1644_v18 = vsel %vm712_vm7, %v5193_v42, %v5103_v50 }
 0x286   : > { %v5329_v2 = vpop.permute.xlu1 %1659  ;;  %v5331_v21 = vpop.permute.xlu0 %1499 }
 0x288   : > { %1897 = vrot.lane.b32.xlu1 %v1609_v28, %s4469_s29  ;;  %1931 = vrot.lane.b32.xlu0 %v5103_v50, %s4469_s29  ;;  %v1676_v28 = vsel %vm724_vm8, %v5209_v63, %v5119_v22 }
 0x28a   : > { %v5339_v19 = vpop.permute.xlu1 %1691  ;;  %v5341_v25 = vpop.permute.xlu0 %1543 }
 0x28c   : > { %1859 = vrot.lane.b32.xlu0 %v5169_v32, %s4469_s29  ;;  %1929 = vrot.lane.b32.xlu1 %v1644_v18, %s4469_s29  ;;  %v4314_v18 = vunpack.i.h.bf16 %v5025_v58  ;;  %v1520_v58 = vsel %vm676_vm3, %v5105_v20, %v5175_v33 }
 0x28e   : > { %v5349_v4 = vpop.permute.xlu1 %1723  ;;  %v5351_v27 = vpop.permute.xlu0 %1587  ;;  %v1522_v54 = vsel %vm676_vm3, %v4314_v18, %v5207_v59  ;;  %v4334_v18 = vunpack.i.h.bf16 %v5042_v24  ;;  %v1608_v24 = vsel %vm700_vm4, %v5137_v26, %v5191_v39  ;;  %v1568_v26 = vsel %vm688_vm9, %v5341_v25, %v5072_v7 }
 0x28f   : > { %v1612_v36 = vsel %vm700_vm4, %v5351_v27, %v5079_v14 }
 0x290   : > { %1891 = vrot.lane.b32.xlu0 %v5177_v34, %s4469_s29  ;;  %1961 = vrot.lane.b32.xlu1 %v1676_v28, %s4469_s29  ;;  %v4324_v28 = vunpack.i.h.bf16 %v5033_v61  ;;  %v1610_v20 = vsel %vm700_vm4, %v4334_v18, %v5239_v51  ;;  %v1646_v18 = vsel %vm712_vm7, %v5319_v16, %v5066_v11 }
 0x292   : > { %v5359_v31 = vpop.permute.xlu1 %1755  ;;  %v5361_v50 = vpop.permute.xlu0 %1809  ;;  %v1566_v9 = vsel %vm688_vm9, %v4324_v28, %v5223_v47  ;;  %v1524_v28 = vsel %vm676_vm3, %v5331_v21, %v5064_v10 }
 0x293   : > { %7311 = vst [vmem:[#allocation27_spill] sm:$0xff] %v5359_v31  ;;  %7312 = vst [vmem:[#allocation28_spill] sm:$0xff] %v5361_v50 }
 0x294   : > { %1923 = vrot.lane.b32.xlu0 %v5185_v38, %s4469_s29  ;;  %1933 = vrot.lane.b32.xlu1 %v5282_v30, %s4469_s29 }
 0x296   : > { %v5368_v29 = vpop.permute.xlu1 %1505  ;;  %v5370_v57 = vpop.permute.xlu0 %1507 }
 0x298   : > { %1955 = vrot.lane.b32.xlu0 %v5201_v12, %s4469_s29  ;;  %1837 = vrot.lane.b32.xlu1 %v1522_v54, %s4469_s29 }
 0x29a   : > { %v5378_v50 = vpop.permute.xlu1 %1549  ;;  %v5380_v31 = vpop.permute.xlu0 %1551 }
 0x29c   : > { %1831 = vrot.lane.b32.xlu0 %v1520_v58, %s4469_s29  ;;  %1869 = vrot.lane.b32.xlu1 %v1566_v9, %s4469_s29  ;;  %v1675_v58 = vsel %vm724_vm8, %v5111_v37, %v5209_v63  ;;  %v4318_v63 = vunpack.i.l.bf16 %v5027_v60 }
 0x29e   : > { %v5390_v54 = vpop.permute.xlu1 %1593  ;;  %v5392_v61 = vpop.permute.xlu0 %1595 }
 0x2a0   : > { %1863 = vrot.lane.b32.xlu0 %v1564_v17, %s4469_s29  ;;  %1901 = vrot.lane.b32.xlu1 %v1610_v20, %s4469_s29 }
 0x2a2   : > { %v5401_v33 = vpop.permute.xlu1 %1631  ;;  %v5403_v9 = vpop.permute.xlu0 %1633 }
 0x2a4   : > { %1895 = vrot.lane.b32.xlu0 %v1608_v24, %s4469_s29  ;;  %1841 = vrot.lane.b32.xlu1 %v1524_v28, %s4469_s29  ;;  %v1525_v24 = vsel %vm676_vm3, %v4318_v63, %v5368_v29  ;;  %v4328_v28 = vunpack.i.l.bf16 %v5035_v62 }
 0x2a6   : > { %v5413_v3 = vpop.permute.xlu1 %1663  ;;  %v5415_v17 = vpop.permute.xlu0 %1665 }
 0x2a8   : > { %1927 = vrot.lane.b32.xlu0 %v1643_v35, %s4469_s29  ;;  %1873 = vrot.lane.b32.xlu1 %v1568_v26, %s4469_s29 }
 0x2aa   : > { %v5425_v10 = vpop.permute.xlu1 %1695  ;;  %v5427_v39 = vpop.permute.xlu0 %1697 }
 0x2ac   : > { %1959 = vrot.lane.b32.xlu0 %v1675_v58, %s4469_s29  ;;  %1905 = vrot.lane.b32.xlu1 %v1612_v36, %s4469_s29  ;;  %v1569_v58 = vsel %vm688_vm9, %v4328_v28, %v5378_v50  ;;  %v4338_v36 = vunpack.i.l.bf16 %v5044_v0 }
 0x2ae   : > { %v5437_v7 = vpop.permute.xlu1 %1727  ;;  %v5439_v42 = vpop.permute.xlu0 %1729 }
 0x2b0   : > { %1851 = vrot.lane.b32.xlu0 %v5215_v45, %s4469_s29  ;;  %1937 = vrot.lane.b32.xlu1 %v1646_v18, %s4469_s29 }
 0x2b2   : > { %v5447_v37 = vpop.permute.xlu1 %1759  ;;  %v5449_v14 = vpop.permute.xlu0 %1761 }
 0x2b3   : > { %7313 = vst [vmem:[#allocation29_spill] sm:$0xff] %v5447_v37  ;;  %v1527_v37 = vsel %vm676_vm3, %v5370_v57, %v5215_v45 }
 0x2b4   : > { %1883 = vrot.lane.b32.xlu0 %v5231_v49, %s4469_s29  ;;  %1941 = vrot.lane.b32.xlu1 %v5401_v33, %s4469_s29 }
 0x2b6   : > { %v5456_v20 = vpop.permute.xlu1 %1815  ;;  %v5458_v11 = vpop.permute.xlu0 %1817 }
 0x2b7   : > { %7314 = vst [vmem:[#allocation30_spill] sm:$0xff] %v5456_v20  ;;  %7315 = vst [vmem:[#allocation31_spill] sm:$0xff] %v5458_v11  ;;  %v1613_v20 = vsel %vm700_vm4, %v4338_v36, %v5390_v54  ;;  %v1571_v36 = vsel %vm688_vm9, %v5380_v31, %v5231_v49 }
 0x2b8   : > { %1915 = vrot.lane.b32.xlu0 %v5247_v53, %s4469_s29  ;;  %1845 = vrot.lane.b32.xlu1 %v1525_v24, %s4469_s29  ;;  %v1523_v24 = vsel %vm676_vm3, %v5207_v59, %v5331_v21 }
 0x2ba   : > { %v5466_v35 = vpop.permute.xlu1 %1515  ;;  %v1514_v26 = vpop.permute.xlu0 %1513 }
 0x2bc   : > { %1947 = vrot.lane.b32.xlu0 %v5255_v56, %s4469_s29  ;;  %1877 = vrot.lane.b32.xlu1 %v1569_v58, %s4469_s29  ;;  %v1567_v58 = vsel %vm688_vm9, %v5223_v47, %v5341_v25  ;;  %v1645_v25 = vsel %vm712_vm7, %v5282_v30, %v5319_v16  ;;  %v1648_v30 = vsel %vm712_vm7, %v5403_v9, %v5255_v56 }
 0x2be   : > { %v5474_v18 = vpop.permute.xlu1 %1559  ;;  %v1558_v63 = vpop.permute.xlu0 %1557 }
 0x2c0   : > { %1839 = vrot.lane.b32.xlu0 %v1523_v24, %s4469_s29  ;;  %1909 = vrot.lane.b32.xlu1 %v1613_v20, %s4469_s29  ;;  %v1611_v20 = vsel %vm700_vm4, %v5239_v51, %v5351_v27  ;;  %v1615_v51 = vsel %vm700_vm4, %v5392_v61, %v5247_v53  ;;  %v1570_v24 = vsel %vm688_vm9, %v5378_v50, %v5380_v31  ;;  %v4329_v31 = vunpack.i.h.bf16 %v5035_v62 }
 0x2c1   : > { %v1529_v62 = vsel %vm676_vm3, %v1514_v26, %v5466_v35 }
 0x2c2   : > { %v5483_v28 = vpop.permute.xlu1 %1603  ;;  %v1602_v11 = vpop.permute.xlu0 %1601 }
 0x2c4   : > { %1871 = vrot.lane.b32.xlu0 %v1567_v58, %s4469_s29  ;;  %1849 = vrot.lane.b32.xlu1 %v1527_v37, %s4469_s29  ;;  %v1526_v37 = vsel %vm676_vm3, %v5368_v29, %v5370_v57  ;;  %v4319_v29 = vunpack.i.h.bf16 %v5027_v60  ;;  %v1614_v58 = vsel %vm700_vm4, %v5390_v54, %v5392_v61  ;;  %v1647_v60 = vsel %vm712_vm7, %v5401_v33, %v5403_v9 }
 0x2c5   : > { %v4339_v54 = vunpack.i.h.bf16 %v5044_v0  ;;  %v1573_v0 = vsel %vm688_vm9, %v1558_v63, %v5474_v18 }
 0x2c6   : > { %v5493_v59 = vpop.permute.xlu1 %1639  ;;  %v1638_v21 = vpop.permute.xlu0 %1637 }
 0x2c8   : > { %1903 = vrot.lane.b32.xlu0 %v1611_v20, %s4469_s29  ;;  %1881 = vrot.lane.b32.xlu1 %v1571_v36, %s4469_s29  ;;  %v1528_v20 = vsel %vm676_vm3, %v4319_v29, %v1514_v26  ;;  %v1617_v29 = vsel %vm700_vm4, %v1602_v11, %v5483_v28 }
 0x2ca   : > { %v5503_v45 = vpop.permute.xlu1 %1671  ;;  %v5505_v47 = vpop.permute.xlu0 %1669 }
 0x2cc   : > { %1935 = vrot.lane.b32.xlu0 %v1645_v25, %s4469_s29  ;;  %1913 = vrot.lane.b32.xlu1 %v1615_v51, %s4469_s29  ;;  %v1572_v25 = vsel %vm688_vm9, %v4329_v31, %v1558_v63  ;;  %v1649_v63 = vsel %vm712_vm7, %v1638_v21, %v5493_v59 }
 0x2ce   : > { %v5515_v49 = vpop.permute.xlu1 %1703  ;;  %v5517_v27 = vpop.permute.xlu0 %1701 }
 0x2d0   : > { %1847 = vrot.lane.b32.xlu0 %v1526_v37, %s4469_s29  ;;  %1945 = vrot.lane.b32.xlu1 %v1648_v30, %s4469_s29  ;;  %v1616_v37 = vsel %vm700_vm4, %v4339_v54, %v1602_v11  ;;  %v1530_v30 = vsel %vm676_vm3, %v5466_v35, %v5169_v32 }
 0x2d2   : > { %v5527_v53 = vpop.permute.xlu1 %1735  ;;  %v5529_v16 = vpop.permute.xlu0 %1733 }
 0x2d4   : > { %1879 = vrot.lane.b32.xlu0 %v1570_v24, %s4469_s29  ;;  %1949 = vrot.lane.b32.xlu1 %v1638_v21, %s4469_s29 }
 0x2d6   : > { %v5537_v57 = vpop.permute.xlu1 %1767  ;;  %v5539_v56 = vpop.permute.xlu0 %1765 }
 0x2d8   : > { %1911 = vrot.lane.b32.xlu0 %v1614_v58, %s4469_s29  ;;  %1853 = vrot.lane.b32.xlu1 %v1528_v20, %s4469_s29  ;;  %v1574_v58 = vsel %vm688_vm9, %v5474_v18, %v5177_v34  ;;  %v1618_v20 = vsel %vm700_vm4, %v5483_v28, %v5185_v38  ;;  %v1650_v18 = vsel %vm712_vm7, %v5493_v59, %v5201_v12  ;;  %vm3293_vm4 = vcmask 998400  }
 0x2d9   : > { %v1677_v28 = vsel %vm724_vm8, %v5292_v43, %v5329_v2 }
 0x2da   : > { %v5548_v50 = vpop.permute.xlu1 %1825  ;;  %v5550_v36 = vpop.permute.xlu0 %1823 }
 0x2db   : > { %7316 = vst [vmem:[#allocation32_spill] sm:$0xff] %v5548_v50 }
 0x2dc   : > { %1943 = vrot.lane.b32.xlu0 %v1647_v60, %s4469_s29  ;;  %1885 = vrot.lane.b32.xlu1 %v1572_v25, %s4469_s29 }
 0x2de   : > { %v5559_v61 = vpop.permute.xlu1 %1925  ;;  %v5561_v51 = vpop.permute.xlu0 %1843 }
 0x2df   : > { %7317 = vst [vmem:[#allocation33_spill] sm:$0xff] %v5561_v51 }
 0x2e0   : > { %1855 = vrot.lane.b32.xlu0 %v1529_v62, %s4469_s29  ;;  %1917 = vrot.lane.b32.xlu1 %v1616_v37, %s4469_s29 }
 0x2e2   : > { %v5568_v33 = vpop.permute.xlu1 %1957  ;;  %v5570_v9 = vpop.permute.xlu0 %1875 }
 0x2e3   : > { %7318 = vst [vmem:[#allocation34_spill] sm:$0xff] %v5570_v9 }
 0x2e4   : > { %1887 = vrot.lane.b32.xlu0 %v1573_v0, %s4469_s29  ;;  %1857 = vrot.lane.b32.xlu1 %v1530_v30, %s4469_s29 }
 0x2e6   : > { %v5579_v26 = vpop.permute.xlu1 %1829  ;;  %v5581_v24 = vpop.permute.xlu0 %1907 }
 0x2e7   : > { %7319 = vst [vmem:[#allocation35_spill] sm:$0xff] %v5581_v24 }
 0x2e8   : > { %1919 = vrot.lane.b32.xlu0 %v1617_v29, %s4469_s29  ;;  %1889 = vrot.lane.b32.xlu1 %v1574_v58, %s4469_s29 }
 0x2ea   : > { %v5590_v32 = vpop.permute.xlu1 %1861  ;;  %v5592_v35 = vpop.permute.xlu0 %1939 }
 0x2eb   : > { %7320 = vst [vmem:[#allocation36_spill] sm:$0xff] %v5592_v35 }
 0x2ec   : > { %1951 = vrot.lane.b32.xlu0 %v1649_v63, %s4469_s29  ;;  %1921 = vrot.lane.b32.xlu1 %v1618_v20, %s4469_s29 }
 0x2ee   : > { %v5601_v34 = vpop.permute.xlu1 %1893  ;;  %v5603_v11 = vpop.permute.xlu0 %1835 }
 0x2ef   : > { %7321 = vst [vmem:[#allocation37_spill] sm:$0xff] %v5603_v11 }
 0x2f0   : > { %1963 = vrot.lane.b32.xlu0 %v5119_v22, %s4469_s29  ;;  %1953 = vrot.lane.b32.xlu1 %v1650_v18, %s4469_s29  ;;  %v1678_v22 = vsel %vm724_vm8, %v5329_v2, %v5074_v13 }
 0x2f2   : > { %v5611_v21 = vpop.permute.xlu1 %1833  ;;  %v5613_v38 = vpop.permute.xlu0 %1867 }
 0x2f3   : > { %7322 = vst [vmem:[#allocation38_spill] sm:$0xff] %v5611_v21  ;;  %7323 = vst [vmem:[#allocation39_spill] sm:$0xff] %v5613_v38  ;;  %v7349_v38 = vld [vmem:[#allocation12_spill] sm:$0xff] }
 0x2f4   : > { %1967 = vrot.lane.b32.xlu0 %v1677_v28, %s4469_s29  ;;  %1965 = vrot.lane.b32.xlu1 %v5292_v43, %s4469_s29  ;;  %v1679_v43 = vsel %vm724_vm8, %v5413_v3, %v5415_v17 }
 0x2f6   : > { %v5621_v31 = vpop.permute.xlu1 %1865  ;;  %v5623_v12 = vpop.permute.xlu0 %1899 }
 0x2f7   : > { %7324 = vst [vmem:[#allocation40_spill] sm:$0xff] %v5621_v31  ;;  %7325 = vst [vmem:[#allocation41_spill] sm:$0xff] %v5623_v12 }
 0x2f8   : > { %1971 = vrot.lane.b32.xlu0 %v5074_v13, %s4469_s29  ;;  %1969 = vrot.lane.b32.xlu1 %v1678_v22, %s4469_s29  ;;  %v1680_v13 = vsel %vm724_vm8, %v5415_v17, %v5263_v5 }
 0x2fa   : > { %v5631_v59 = vpop.permute.xlu1 %1897  ;;  %v5633_v60 = vpop.permute.xlu0 %1931 }
 0x2fb   : > { %7326 = vst [vmem:[#allocation42_spill] sm:$0xff] %v5631_v59  ;;  %7327 = vst [vmem:[#allocation43_spill] sm:$0xff] %v5633_v60 }
 0x2fc   : > { %1975 = vrot.lane.b32.xlu0 %v1679_v43, %s4469_s29  ;;  %1973 = vrot.lane.b32.xlu1 %v5413_v3, %s4469_s29  ;;  %v1681_v3 = vsel %vm724_vm8, %v5505_v47, %v5503_v45 }
 0x2fe   : > { %v5641_v25 = vpop.permute.xlu1 %1929  ;;  %v5643_v2 = vpop.permute.xlu0 %1859 }
 0x2ff   : > { %7328 = vst [vmem:[#allocation44_spill] sm:$0xff] %v5643_v2  ;;  %v7347_v2 = vld [vmem:[#allocation26_spill] sm:$0xff] }
 0x300   : > { %1979 = vrot.lane.b32.xlu0 %v5263_v5, %s4469_s29  ;;  %1977 = vrot.lane.b32.xlu1 %v1680_v13, %s4469_s29  ;;  %v1682_v5 = vsel %vm724_vm8, %v5503_v45, %v5217_v46 }
 0x302   : > { %v5651_v54 = vpop.permute.xlu1 %1961  ;;  %v5653_v62 = vpop.permute.xlu0 %1891 }
 0x303   : > { %7329 = vst [vmem:[#allocation45_spill] sm:$0xff] %v5653_v62 }
 0x304   : > { %1983 = vrot.lane.b32.xlu0 %v1681_v3, %s4469_s29  ;;  %1981 = vrot.lane.b32.xlu1 %v5505_v47, %s4469_s29  ;;  %v1707_v47 = vsel %vm736_vm5, %v5127_v1, %v5225_v48 }
 0x306   : > { %v5661_v37 = vpop.permute.xlu1 %1933  ;;  %v5663_v17 = vpop.permute.xlu0 %1923 }
 0x308   : > { %1987 = vrot.lane.b32.xlu0 %v5217_v46, %s4469_s29  ;;  %1985 = vrot.lane.b32.xlu1 %v1682_v5, %s4469_s29  ;;  %v1708_v46 = vsel %vm736_vm5, %v5225_v48, %v5135_v55 }
 0x30a   : > { %v5671_v0 = vpop.permute.xlu1 %1837  ;;  %v5673_v30 = vpop.permute.xlu0 %1955 }
 0x30b   : > { %7330 = vst [vmem:[#allocation46_spill] sm:$0xff] %v5673_v30 }
 0x30c   : > { %1991 = vrot.lane.b32.xlu0 %v1707_v47, %s4469_s29  ;;  %1989 = vrot.lane.b32.xlu1 %v5127_v1, %s4469_s29  ;;  %v1709_v1 = vsel %vm736_vm5, %v5302_v6, %v5339_v19 }
 0x30e   : > { %v5681_v29 = vpop.permute.xlu1 %1869  ;;  %v5683_v45 = vpop.permute.xlu0 %1831 }
 0x310   : > { %1995 = vrot.lane.b32.xlu0 %v5135_v55, %s4469_s29  ;;  %1993 = vrot.lane.b32.xlu1 %v1708_v46, %s4469_s29  ;;  %v1710_v55 = vsel %vm736_vm5, %v5339_v19, %v5081_v15 }
 0x312   : > { %v5691_v58 = vpop.permute.xlu1 %1901  ;;  %v5693_v63 = vpop.permute.xlu0 %1863 }
 0x314   : > { %1999 = vrot.lane.b32.xlu0 %v1709_v1, %s4469_s29  ;;  %1997 = vrot.lane.b32.xlu1 %v5302_v6, %s4469_s29  ;;  %v1711_v6 = vsel %vm736_vm5, %v5425_v10, %v5427_v39 }
 0x316   : > { %v5701_v20 = vpop.permute.xlu1 %1841  ;;  %v5703_v48 = vpop.permute.xlu0 %1895 }
 0x317   : > { %7331 = vst [vmem:[#allocation47_spill] sm:$0xff] %v5701_v20 }
 0x318   : > { %2003 = vrot.lane.b32.xlu0 %v5081_v15, %s4469_s29  ;;  %2001 = vrot.lane.b32.xlu1 %v1710_v55, %s4469_s29  ;;  %v1712_v15 = vsel %vm736_vm5, %v5427_v39, %v5271_v8 }
 0x31a   : > { %v5711_v18 = vpop.permute.xlu1 %1873  ;;  %v5713_v28 = vpop.permute.xlu0 %1927 }
 0x31b   : > { %7332 = vst [vmem:[#allocation48_spill] sm:$0xff] %v5711_v18 }
 0x31c   : > { %2007 = vrot.lane.b32.xlu0 %v1711_v6, %s4469_s29  ;;  %2005 = vrot.lane.b32.xlu1 %v5425_v10, %s4469_s29  ;;  %v1713_v10 = vsel %vm736_vm5, %v5517_v27, %v5515_v49 }
 0x31e   : > { %v5721_v22 = vpop.permute.xlu1 %1905  ;;  %v5723_v19 = vpop.permute.xlu0 %1959 }
 0x31f   : > { %7333 = vst [vmem:[#allocation49_spill] sm:$0xff] %v5721_v22 }
 0x320   : > { %2009 = vrot.lane.b32.xlu1 %v1712_v15, %s4469_s29  ;;  %2011 = vrot.lane.b32.xlu0 %v5271_v8, %s4469_s29  ;;  %v1714_v8 = vsel %vm736_vm5, %v5515_v49, %v5233_v23  ;;  %v7338_v15 = vld [vmem:[#allocation11_spill] sm:$0xff]  ;;  %vm2912_vm5 = vcmask 89088  }
 0x322   : > { %v5731_v43 = vpop.permute.xlu1 %1937  ;;  %v5733_v13 = vpop.permute.xlu0 %1851 }
 0x323   : > { %7334 = vst [vmem:[#allocation50_spill] sm:$0xff] %v5733_v13  ;;  %v7346_v13 = vld [vmem:[#allocation27_spill] sm:$0xff] }
 0x324   : > { %2013 = vrot.lane.b32.xlu1 %v5517_v27, %s4469_s29  ;;  %2015 = vrot.lane.b32.xlu0 %v1713_v10, %s4469_s29  ;;  %v1739_v27 = vsel %vm748_vm1, %v5143_v40, %v5241_v52 }
 0x326   : > { %v5741_v3 = vpop.permute.xlu1 %1941  ;;  %v5743_v39 = vpop.permute.xlu0 %1883 }
 0x327   : > { %7335 = vst [vmem:[#allocation51_spill] sm:$0xff] %v5743_v39  ;;  %v7351_v39 = vld [vmem:[#allocation29_spill] sm:$0xff] }
 0x328   : > { %2017 = vrot.lane.b32.xlu1 %v1714_v8, %s4469_s29  ;;  %2019 = vrot.lane.b32.xlu0 %v5233_v23, %s4469_s29  ;;  %v1740_v23 = vsel %vm748_vm1, %v5241_v52, %v5151_v41 }
 0x32a   : > { %v5751_v5 = vpop.permute.xlu1 %1845  ;;  %v5753_v47 = vpop.permute.xlu0 %1915 }
 0x32c   : > { %2021 = vrot.lane.b32.xlu1 %v5143_v40, %s4469_s29  ;;  %2023 = vrot.lane.b32.xlu0 %v1739_v27, %s4469_s29  ;;  %v1741_v40 = vsel %vm748_vm1, %v5311_v44, %v5349_v4 }
 0x32e   : > { %v5761_v46 = vpop.permute.xlu1 %1877  ;;  %v5763_v49 = vpop.permute.xlu0 %1947 }
 0x32f   : > { %7336 = vst [vmem:[#allocation52_spill] sm:$0xff] %v5763_v49  ;;  %v7343_v49 = vld [vmem:[#allocation19_spill] sm:$0xff] }
 0x330   : > { %2025 = vrot.lane.b32.xlu1 %v1740_v23, %s4469_s29  ;;  %2027 = vrot.lane.b32.xlu0 %v5151_v41, %s4469_s29  ;;  %v1742_v41 = vsel %vm748_vm1, %v5349_v4, %v7338_v15  ;;  %v7341_v23 = vld [vmem:[#allocation22_spill] sm:$0xff] }
 0x332   : > { %v5771_v1 = vpop.permute.xlu1 %1909  ;;  %v5773_v55 = vpop.permute.xlu0 %1839 }
 0x334   : > { %2029 = vrot.lane.b32.xlu1 %v5311_v44, %s4469_s29  ;;  %2031 = vrot.lane.b32.xlu0 %v1741_v40, %s4469_s29  ;;  %v1743_v44 = vsel %vm748_vm1, %v5437_v7, %v5439_v42  ;;  %v1744_v40 = vsel %vm748_vm1, %v5439_v42, %v7341_v23 }
 0x336   : > { %v5781_v6 = vpop.permute.xlu1 %1849  ;;  %v5783_v52 = vpop.permute.xlu0 %1871 }
 0x337   : > { %7337 = vst [vmem:[#allocation53_spill] sm:$0xff] %v5781_v6 }
 0x338   : > { %2033 = vrot.lane.b32.xlu1 %v1742_v41, %s4469_s29  ;;  %2035 = vrot.lane.b32.xlu0 %v7338_v15, %s4469_s29 }
 0x33a   : > { %v5791_v10 = vpop.permute.xlu1 %1881  ;;  %v5793_v8 = vpop.permute.xlu0 %1903 }
 0x33b   : > { %7339 = vst [vmem:[#allocation11_spill] sm:$0xff] %v5791_v10 }
 0x33c   : > { %2037 = vrot.lane.b32.xlu1 %v5437_v7, %s4469_s29  ;;  %2039 = vrot.lane.b32.xlu0 %v1743_v44, %s4469_s29  ;;  %v1745_v7 = vsel %vm748_vm1, %v5529_v16, %v5527_v53 }
 0x33e   : > { %v5801_v27 = vpop.permute.xlu1 %1913  ;;  %v5803_v4 = vpop.permute.xlu0 %1935 }
 0x33f   : > { %7340 = vst [vmem:[#allocation54_spill] sm:$0xff] %v5801_v27 }
 0x340   : > { %2041 = vrot.lane.b32.xlu1 %v1744_v40, %s4469_s29  ;;  %2043 = vrot.lane.b32.xlu0 %v7341_v23, %s4469_s29  ;;  %v7342_v40 = vld [vmem:[#allocation18_spill] sm:$0xff] }
 0x341   : > { %v1746_v23 = vsel %vm748_vm1, %v5527_v53, %v7342_v40  ;;  %v7345_v53 = vld [vmem:[#allocation16_spill] sm:$0xff]  ;;  %vm2302_vm1 = vcmask 261120  }
 0x342   : > { %v5811_v15 = vpop.permute.xlu1 %1945  ;;  %v5813_v41 = vpop.permute.xlu0 %1847 }
 0x344   : > { %2045 = vrot.lane.b32.xlu1 %v5529_v16, %s4469_s29  ;;  %2047 = vrot.lane.b32.xlu0 %v1745_v7, %s4469_s29  ;;  %v7344_v16 = vld [vmem:[#allocation14_spill] sm:$0xff] }
 0x345   : > { %v1771_v7 = vsel %vm760_vm2, %v7344_v16, %v7343_v49 }
 0x346   : > { %v5821_v44 = vpop.permute.xlu1 %1949  ;;  %v5823_v42 = vpop.permute.xlu0 %1879 }
 0x348   : > { %2049 = vrot.lane.b32.xlu1 %v1746_v23, %s4469_s29  ;;  %2051 = vrot.lane.b32.xlu0 %v7342_v40, %s4469_s29  ;;  %v1772_v23 = vsel %vm760_vm2, %v7343_v49, %v7345_v53 }
 0x34a   : > { %v5831_v60 = vpop.permute.xlu1 %1853  ;;  %v1912_v35 = vpop.permute.xlu0 %1911 }
 0x34c   : > { %2053 = vrot.lane.b32.xlu1 %v7344_v16, %s4469_s29  ;;  %2055 = vrot.lane.b32.xlu0 %v1771_v7, %s4469_s29  ;;  %v1773_v16 = vsel %vm760_vm2, %v7347_v2, %v7346_v13 }
 0x34e   : > { %v1886_v30 = vpop.permute.xlu1 %1885  ;;  %v5839_v11 = vpop.permute.xlu0 %1943 }
 0x350   : > { %2057 = vrot.lane.b32.xlu1 %v1772_v23, %s4469_s29  ;;  %2059 = vrot.lane.b32.xlu0 %v7345_v53, %s4469_s29  ;;  %v1774_v23 = vsel %vm760_vm2, %v7346_v13, %v7349_v38 }
 0x352   : > { %v1918_v40 = vpop.permute.xlu1 %1917  ;;  %v5847_v51 = vpop.permute.xlu0 %1855 }
 0x354   : > { %2061 = vrot.lane.b32.xlu1 %v7347_v2, %s4469_s29  ;;  %2063 = vrot.lane.b32.xlu0 %v1773_v16, %s4469_s29  ;;  %v1775_v2 = vsel %vm760_vm2, %v7351_v39, %v5449_v14  ;;  %v5871_v16 = vld [vmem:[%s7186_s5 + $0x8] sm:$0xff] }
 0x355   : > { %7352 = vst [vmem:[#allocation19_spill] sm:$0xff] %v5871_v16  ;;  %2373 = vmatprep.mubr.f32.mxu1 %v5871_v16  ;;  %v2129_v16 = vsel %vm2085_vm15, %v1912_v35, %v5801_v27 }
 0x356   : > { %v5855_v7 = vpop.permute.xlu1 %1857  ;;  %v1888_v49 = vpop.permute.xlu0 %1887 }
 0x357   : > { %7348 = vst [vmem:[#allocation22_spill] sm:$0xff] %v5855_v7 }
 0x358   : > { %2065 = vrot.lane.b32.xlu1 %v1774_v23, %s4469_s29  ;;  %2067 = vrot.lane.b32.xlu0 %v7349_v38, %s4469_s29  ;;  %v7353_v23 = vld [vmem:[#allocation23_spill] sm:$0xff] }
 0x359   : > { %v1776_v62 = vsel %vm760_vm2, %v5449_v14, %v7353_v23  ;;  %v2128_v14 = vsel %vm2085_vm15, %v5771_v1, %v1912_v35  ;;  %v2123_v1 = vsel %vm2085_vm15, %v5703_v48, %v5631_v59 }
 0x35a   : > { %v5863_v53 = vpop.permute.xlu1 %1889  ;;  %v1920_v9 = vpop.permute.xlu0 %1919 }
 0x35b   : > { %7350 = vst [vmem:[#allocation18_spill] sm:$0xff] %v5863_v53 }
 0x35c   : > { %2069 = vrot.lane.b32.xlu1 %v7351_v39, %s4469_s29  ;;  %2071 = vrot.lane.b32.xlu0 %v1775_v2, %s4469_s29  ;;  %v2131_v39 = vsel %vm2085_vm15, %v1918_v40, %v1920_v9 }
 0x35e   : > { %v5877_v38 = vpop.permute.xlu1 %1921  ;;  %v5879_v13 = vpop.permute.xlu0 %1951 }
 0x35f   : > { %v2132_v12 = vsel %vm2085_vm15, %v1920_v9, %v5877_v38  ;;  %v1777_v9 = vsel %vm760_vm2, %v5539_v56, %v5537_v57 }
 0x360   : > { %2073 = vrot.lane.b32.xlu1 %v1776_v62, %s4469_s29  ;;  %2075 = vrot.lane.b32.xlu0 %v7353_v23, %s4469_s29  ;;  %v2125_v62 = vsel %vm2085_vm15, %v5691_v58, %v5793_v8  ;;  %v2120_v58 = vsel %vm2085_vm15, %v1888_v49, %v5863_v53  ;;  %v2772_v53 = vld [vmem:[%s7190_s9] sm:$0xff] }
 0x361   : > { %2309 = vmatprep.subr.mxu1 %v2132_v12  ;;  %v2126_v12 = vsel %vm2085_vm15, %v5793_v8, %v5721_v22  ;;  %v2119_v8 = vsel %vm2085_vm15, %v1886_v30, %v1888_v49  ;;  %v2116_v30 = vsel %vm2085_vm15, %v5761_v46, %v5823_v42  ;;  %v2114_v49 = vsel %vm2085_vm15, %v5783_v52, %v5711_v18 }
 0x362   : > { %2310 = vmatpush1.msra.mxu1 %v2131_v39  ;;  %v5890_v2 = vpop.permute.xlu1 %1953  ;;  %v5894_v24 = vpop.permute.xlu0 %1963 }
 0x363   : > { %7354 = vst [vmem:[#allocation14_spill] sm:$0xff] %v5894_v24  ;;  %2311 = vmatprep.subr.mxu1 %v2129_v16  ;;  %v7355_v16 = vld [vmem:[#allocation20_spill] sm:$0xff] }
 0x364   : > { %2312 = vmatpush1.msra.mxu1 %v2128_v14  ;;  %2077 = vrot.lane.b32.xlu1 %v5539_v56, %s4469_s29  ;;  %v2122_v56 = vsel %vm2085_vm15, %v5601_v34, %v5703_v48  ;;  %v1778_v23 = vsel %vm760_vm2, %v5537_v57, %v7355_v16  ;;  %v2613_v34 = vld [vmem:[%s7188_s7] sm:$0xff]  ;;  %v2117_v57 = vsel %vm2085_vm15, %v5823_v42, %v5791_v10  ;;  %v2614_v14 = vld [vmem:[%s7188_s7 + $0x8] sm:$0xff]  ;;  %vm2709_vm2 = vcmask 965632  }
 0x365   : > { %2079 = vrot.lane.b32.xlu0 %v1777_v9, %s4469_s29  ;;  %2313 = vmatprep.subr.mxu1 %v2126_v12  ;;  %v5948_v9 = vld [vmem:[#allocation2] sm:$0xff]  ;;  %v2111_v42 = vsel %vm2085_vm15, %v5693_v63, %v5621_v31 }
 0x366   : > { %2314 = vmatpush1.msra.mxu1 %v2125_v62  ;;  %v5910_v35 = vpop.permute.xlu1 %1965  ;;  %v5915_v40 = vpop.permute.xlu0 %1967  ;;  %v5952_v12 = vpack.i.bf16 %v5948_v9, %v5948_v9  ;;  %v2113_v62 = vsel %vm2085_vm15, %v5681_v29, %v5783_v52  ;;  %v2108_v29 = vsel %vm2085_vm15, %v5847_v51, %v5855_v7  ;;  %v2107_v52 = vsel %vm2085_vm15, %v5831_v60, %v5847_v51 }
 0x367   : > { %2315 = vmatprep.subr.mxu1 %v2123_v1  ;;  %v2102_v51 = vsel %vm2085_vm15, %v5773_v55, %v5701_v20  ;;  %v2101_v60 = vsel %vm2085_vm15, %v5671_v0, %v5773_v55  ;;  %v6016_v0 = vld [vmem:[#allocation3 + $0x38] sm:$0xff]  ;;  %v2096_v55 = vsel %vm2085_vm15, %v5550_v36, %v5548_v50 }
 0x368   : > { %2316 = vmatpush1.msra.mxu1 %v2122_v56  ;;  %2081 = vrot.lane.b32.xlu1 %v1778_v23, %s4469_s29  ;;  %v2110_v56 = vsel %vm2085_vm15, %v5590_v32, %v5693_v63  ;;  %v2105_v63 = vsel %vm2085_vm15, %v5813_v41, %v5781_v6  ;;  %7360 = vst [vmem:[#allocation12_spill] sm:$0xff] %v6016_v0 }
 0x369   : > { %2083 = vrot.lane.b32.xlu0 %v7355_v16, %s4469_s29  ;;  %2317 = vmatprep.subr.mxu1 %v2120_v58  ;;  %v5969_v16 = vld [vmem:[#allocation3 + $0x8] sm:$0xff]  ;;  %v2104_v58 = vsel %vm2085_vm15, %v5751_v5, %v5813_v41  ;;  %v2099_v41 = vsel %vm2085_vm15, %v5683_v45, %v5611_v21  ;;  %s7370_s29 = smov 118  }
 0x36a   : > { %2318 = vmatpush1.msra.mxu1 %v2119_v8  ;;  %v5932_v48 = vpop.permute.xlu1 %1969  ;;  %v5937_v39 = vpop.permute.xlu0 %1971  ;;  %v5989_v8 = vld [vmem:[#allocation3 + $0x18] sm:$0xff] }
 0x36b   : > { %7356 = vst [vmem:[#allocation16_spill] sm:$0xff] %v5937_v39  ;;  %2319 = vmatprep.subr.mxu1 %v2117_v57  ;;  %v7358_v57 = vld [vmem:[#allocation9_spill] sm:$0xff] }
 0x36c   : > { %2320 = vmatpush1.msra.mxu1 %v2116_v30  ;;  %2617 = vperm.xlu1 %4309, %v2613_v34   ;;  %v2098_v30 = vsel %vm2085_vm15, %v5579_v26, %v5683_v45 }
 0x36d   : > { %2622 = vperm.xlu0 %4308, %v2614_v14   ;;  %2321 = vmatprep.subr.mxu1 %v2114_v49  ;;  %v4349_v14 = vunpack.i.h.bf16 %v7358_v57  ;;  %v6012_v49 = vld [vmem:[#allocation3 + $0x28] sm:$0xff] }
 0x36e   : > { %2322 = vmatpush1.msra.mxu1 %v2113_v62  ;;  %v5957_v46 = vpop.permute.xlu1 %1973  ;;  %v5962_v1 = vpop.permute.xlu0 %1975  ;;  %7359 = vst [vmem:[#allocation26_spill] sm:$0xff] %v6012_v49  ;;  %v4348_v62 = vunpack.i.l.bf16 %v7358_v57 }
 0x36f   : > { %2323 = vmatprep.subr.mxu1 %v2111_v42  ;;  %v2095_v26 = vsel %vm2085_vm15, %v4349_v14, %v5550_v36  ;;  %v7361_v42 = vld [vmem:[#allocation31_spill] sm:$0xff]  ;;  %v7365_v36 = vld [vmem:[#allocation28_spill] sm:$0xff] }
 0x370   : > { %2324 = vmatpush1.msra.mxu1 %v2110_v56  ;;  %4351 = vrot.lane.b32.xlu1 %v5952_v12, %s7281_s25  ;;  %v7362_v56 = vld [vmem:[#allocation30_spill] sm:$0xff] }
 0x371   : > { %2655 = vrot.lane.b32.xlu0 %v5969_v16, %s7281_s25  ;;  %2325 = vmatprep.subr.mxu1 %v2108_v29  ;;  %v2093_v29 = vsel %vm2085_vm15, %v7362_v56, %v7361_v42 }
 0x372   : > { %2326 = vmatpush1.msra.mxu1 %v2107_v52  ;;  %v5979_v32 = vpop.permute.xlu1 %1977  ;;  %v5984_v23 = vpop.permute.xlu0 %1979 }
 0x373   : > { %7357 = vst [vmem:[#allocation27_spill] sm:$0xff] %v5984_v23  ;;  %2327 = vmatprep.subr.mxu1 %v2105_v63  ;;  %v7364_v63 = vld [vmem:[#allocation8_spill] sm:$0xff] }
 0x374   : > { %2328 = vmatpush1.msra.mxu1 %v2104_v58  ;;  %2659 = vrot.lane.b32.xlu1 %v5989_v8, %s7281_s25  ;;  %v4344_v58 = vunpack.i.h.bf16 %v7364_v63  ;;  %v4343_v57 = vunpack.i.l.bf16 %v7364_v63 }
 0x375   : > { %4356 = vrot.lane.b32.xlu0 %v5952_v12, %s7281_s25  ;;  %2329 = vmatprep.subr.mxu1 %v2102_v51  ;;  %v2092_v51 = vsel %vm2085_vm15, %v4348_v62, %v7362_v56  ;;  %v7368_v62 = vld [vmem:[#allocation13_spill] sm:$0xff] }
 0x376   : > { %2330 = vmatpush1.msra.mxu1 %v2101_v60  ;;  %v6001_v5 = vpop.permute.xlu1 %1981  ;;  %v6006_v34 = vpop.permute.xlu0 %1983  ;;  %v7366_v60 = vld [vmem:[#allocation24_spill] sm:$0xff] }
 0x377   : > { %2331 = vmatprep.subr.mxu1 %v2099_v41  ;;  %v2090_v41 = vsel %vm2085_vm15, %v7366_v60, %v7365_v36  ;;  %v2089_v14 = vsel %vm2085_vm15, %v4344_v58, %v7366_v60 }
 0x378   : > { %2332 = vmatpush1.msra.mxu1 %v2098_v30  ;;  %2663 = vrot.lane.b32.xlu1 %v6012_v49, %s7281_s25 }
 0x379   : > { %2667 = vrot.lane.b32.xlu0 %v6016_v0, %s7281_s25  ;;  %2333 = vmatprep.subr.mxu1 %v2096_v55  ;;  %v7367_v55 = vld [vmem:[#allocation17_spill] sm:$0xff] }
 0x37a   : > { %2334 = vmatpush1.msra.mxu1 %v2095_v26  ;;  %v6026_v45 = vpop.permute.xlu1 %1985  ;;  %v6031_v52 = vpop.permute.xlu0 %1987  ;;  %v2087_v26 = vsel %vm2085_vm15, %v7368_v62, %v7367_v55 }
 0x37b   : > { %7363 = vst [vmem:[#allocation29_spill] sm:$0xff] %v6031_v52  ;;  %2335 = vmatprep.subr.mxu1 %v2093_v29  ;;  %v2086_v29 = vsel %vm2085_vm15, %v4343_v57, %v7368_v62 }
 0x37c   : > { %2336 = vmatpush1.msra.mxu1 %v2092_v51  ;;  %4361 = vrot.lane.b32.xlu1 %v5952_v12, %s7280_s28 }
 0x37d   : > { %2675 = vrot.lane.b32.xlu0 %v5969_v16, %s7280_s28  ;;  %2337 = vmatprep.subr.mxu1 %v2090_v41 }
 0x37e   : > { %2338 = vmatpush1.msra.mxu1 %v2089_v14  ;;  %v6046_v30 = vpop.permute.xlu1 %1989  ;;  %v6051_v56 = vpop.permute.xlu0 %1991 }
 0x37f   : > { %2339 = vmatprep.subr.mxu1 %v2087_v26 }
 0x380   : > { %2340 = vmatpush1.msra.mxu1 %v2086_v29  ;;  %2679 = vrot.lane.b32.xlu1 %v5989_v8, %s7280_s28 }
 0x381   : > { %4366 = vrot.lane.b32.xlu0 %v5952_v12, %s7280_s28 }
 0x382   : > { %v6059_v63 = vpop.permute.xlu1 %1993  ;;  %v6061_v58 = vpop.permute.xlu0 %1995 }
 0x383   : > { %7369 = vst [vmem:[#allocation23_spill] sm:$0xff] %v6061_v58 }
 0x384   : > { %2683 = vrot.lane.b32.xlu1 %v6012_v49, %s7280_s28 }
 0x385   : > { %2687 = vrot.lane.b32.xlu0 %v6016_v0, %s7280_s28 }
 0x386   : > { %v6067_v51 = vpop.permute.xlu1 %1997  ;;  %v6069_v60 = vpop.permute.xlu0 %1999 }
 0x388   : > { %4371 = vrot.lane.b32.xlu1 %v5952_v12, %s7370_s29 }
 0x389   : > { %2695 = vrot.lane.b32.xlu0 %v5969_v16, %s7370_s29 }
 0x38a   : > { %v6075_v41 = vpop.permute.xlu1 %2001  ;;  %v6077_v57 = vpop.permute.xlu0 %2003 }
 0x38b   : > { %7371 = vst [vmem:[#allocation20_spill] sm:$0xff] %v6077_v57 }
 0x38c   : > { %2699 = vrot.lane.b32.xlu1 %v5989_v8, %s7370_s29 }
 0x38d   : > { %4376 = vrot.lane.b32.xlu0 %v5952_v12, %s7370_s29 }
 0x38e   : > { %v6083_v14 = vpop.permute.xlu1 %2005  ;;  %v6085_v62 = vpop.permute.xlu0 %2007 }
 0x390   : > { %2703 = vrot.lane.b32.xlu1 %v6012_v49, %s7370_s29 }
 0x391   : > { %2707 = vrot.lane.b32.xlu0 %v6016_v0, %s7370_s29 }
 0x392   : > { %v6091_v26 = vpop.permute.xlu1 %2009  ;;  %v6093_v29 = vpop.permute.xlu0 %2011 }
 0x393   : > { %7372 = vst [vmem:[#allocation9_spill] sm:$0xff] %v6093_v29 }
 0x394   : > { %2714 = vrot.lane.b32.xlu1 %v5969_v16, %s7373_s26 }
 0x395   : > { %2716 = vrot.lane.b32.xlu0 %v5989_v8, %s7373_s26 }
 0x396   : > { %v6099_v55 = vpop.permute.xlu1 %2013  ;;  %v6101_v36 = vpop.permute.xlu0 %2015 }
 0x398   : > { %2718 = vrot.lane.b32.xlu1 %v6012_v49, %s7373_s26 }
 0x399   : > { %2720 = vrot.lane.b32.xlu0 %v6016_v0, %s7373_s26 }
 0x39a   : > { %v6107_v42 = vpop.permute.xlu1 %2017  ;;  %v6109_v50 = vpop.permute.xlu0 %2019 }
 0x39b   : > { %7374 = vst [vmem:[#allocation30_spill] sm:$0xff] %v6109_v50 }
 0x39c   : > { %2722 = vrot.lane.b32.xlu1 %v5969_v16, %s7284_s13 }
 0x39d   : > { %2724 = vrot.lane.b32.xlu0 %v5989_v8, %s7284_s13 }
 0x39e   : > { %v2022_v21 = vpop.permute.xlu1 %2021  ;;  %v2024_v24 = vpop.permute.xlu0 %2023 }
 0x3a0   : > { %2726 = vrot.lane.b32.xlu1 %v6012_v49, %s7284_s13 }
 0x3a1   : > { %2728 = vrot.lane.b32.xlu0 %v6016_v0, %s7284_s13 }
 0x3a2   : > { %v6119_v20 = vpop.permute.xlu1 %2025  ;;  %v6121_v39 = vpop.permute.xlu0 %2027 }
 0x3a3   : > { %7375 = vst [vmem:[#allocation8_spill] sm:$0xff] %v6121_v39  ;;  %v2774_v39 = vld [vmem:[%s7190_s9 + $0x10] sm:$0xff] }
 0x3a4   : > { %2730 = vrot.lane.b32.xlu1 %v5969_v16, %s7282_s0 }
 0x3a5   : > { %2732 = vrot.lane.b32.xlu0 %v5989_v8, %s7282_s0 }
 0x3a6   : > { %v2030_v6 = vpop.permute.xlu1 %2029  ;;  %v2032_v23 = vpop.permute.xlu0 %2031 }
 0x3a8   : > { %2734 = vrot.lane.b32.xlu1 %v6012_v49, %s7282_s0 }
 0x3a9   : > { %2736 = vrot.lane.b32.xlu0 %v6016_v0, %s7282_s0  ;;  %s7378_s0 = smov 106  }
 0x3aa   : > { %v6131_v7 = vpop.permute.xlu1 %2033  ;;  %v6133_v52 = vpop.permute.xlu0 %2035 }
 0x3ab   : > { %7376 = vst [vmem:[#allocation24_spill] sm:$0xff] %v6133_v52 }
 0x3ac   : > { %2738 = vrot.lane.b32.xlu1 %v5969_v16, %s7377_s24 }
 0x3ad   : > { %2740 = vrot.lane.b32.xlu0 %v5989_v8, %s7377_s24 }
 0x3ae   : > { %v2038_v31 = vpop.permute.xlu1 %2037  ;;  %v2040_v58 = vpop.permute.xlu0 %2039 }
 0x3af   : > { %v2176_v27 = vsel %vm2085_vm15, %v2038_v31, %v2040_v58 }
 0x3b0   : > { %2742 = vrot.lane.b32.xlu1 %v6012_v49, %s7377_s24 }
 0x3b1   : > { %2744 = vrot.lane.b32.xlu0 %v6016_v0, %s7377_s24 }
 0x3b2   : > { %v6143_v18 = vpop.permute.xlu1 %2041  ;;  %v6145_v57 = vpop.permute.xlu0 %2043 }
 0x3b4   : > { %2746 = vrot.lane.b32.xlu1 %v5969_v16, %s7378_s0  ;;  %v2773_v16 = vld [vmem:[%s7190_s9 + $0x8] sm:$0xff] }
 0x3b5   : > { %2748 = vrot.lane.b32.xlu0 %v5989_v8, %s7378_s0 }
 0x3b6   : > { %v2046_v10 = vpop.permute.xlu1 %2045  ;;  %v2048_v29 = vpop.permute.xlu0 %2047 }
 0x3b8   : > { %2750 = vrot.lane.b32.xlu1 %v6012_v49, %s7378_s0  ;;  %v2179_v49 = vsel %vm2085_vm15, %v2046_v10, %v2048_v29  ;;  %v2775_v10 = vld [vmem:[%s7190_s9 + $0x18] sm:$0xff] }
 0x3b9   : > { %2752 = vrot.lane.b32.xlu0 %v6016_v0, %s7378_s0  ;;  %v2177_v0 = vsel %vm2085_vm15, %v2040_v58, %v6143_v18  ;;  %v2170_v58 = vsel %vm2085_vm15, %v2022_v21, %v2024_v24 }
 0x3ba   : > { %v6158_v50 = vpop.permute.xlu1 %2049  ;;  %v6160_v59 = vpop.permute.xlu0 %2051 }
 0x3bb   : > { %v2180_v8 = vsel %vm2085_vm15, %v2048_v29, %v6158_v50 }
 0x3bc   : > { %2780 = vperm.xlu1 %4309, %v2772_v53   ;;  %2341 = vmatprep.subr.mxu1 %v2180_v8  ;;  %v2174_v53 = vsel %vm2085_vm15, %v2032_v23, %v6131_v7  ;;  %v2161_v8 = vsel %vm2085_vm15, %v6067_v51, %v6069_v60  ;;  %v2156_v51 = vsel %vm2085_vm15, %v6006_v34, %v6026_v45 }
 0x3bd   : > { %2785 = vperm.xlu0 %4308, %v2773_v16   ;;  %2342 = vmatpush2.msra.mxu1 %v2179_v49  ;;  %v2173_v49 = vsel %vm2085_vm15, %v2030_v6, %v2032_v23  ;;  %v6196_v6 = vld [vmem:[#allocation4 + $0x38] sm:$0xff]  ;;  %v2164_v16 = vsel %vm2085_vm15, %v6083_v14, %v6085_v62  ;;  %v2159_v14 = vsel %vm2085_vm15, %v6051_v56, %v6059_v63 }
 0x3be   : > { %v6173_v22 = vpop.permute.xlu1 %2053  ;;  %2343 = vmatprep.subr.mxu1 %v2177_v0  ;;  %v6175_v52 = vpop.permute.xlu0 %2055  ;;  %v2171_v0 = vsel %vm2085_vm15, %v2024_v24, %v6119_v20  ;;  %v2165_v24 = vsel %vm2085_vm15, %v6085_v62, %v6091_v26 }
 0x3bf   : > { %2344 = vmatpush2.msra.mxu1 %v2176_v27  ;;  %v2168_v27 = vsel %vm2085_vm15, %v6101_v36, %v6107_v42 }
 0x3c0   : > { %2790 = vperm.xlu1 %4309, %v2774_v39   ;;  %2345 = vmatprep.subr.mxu1 %v2174_v53  ;;  %v2167_v39 = vsel %vm2085_vm15, %v6099_v55, %v6101_v36  ;;  %v2162_v36 = vsel %vm2085_vm15, %v6069_v60, %v6075_v41  ;;  %v6218_v55 = vld [vmem:[#allocation4 + $0x28] sm:$0xff]  ;;  %v2158_v53 = vsel %vm2085_vm15, %v6046_v30, %v6051_v56 }
 0x3c1   : > { %2795 = vperm.xlu0 %4308, %v2775_v10   ;;  %2346 = vmatpush2.msra.mxu1 %v2173_v49  ;;  %v2155_v60 = vsel %vm2085_vm15, %v6001_v5, %v6006_v34  ;;  %v2153_v30 = vsel %vm2085_vm15, %v5962_v1, %v5979_v32  ;;  %v2150_v5 = vsel %vm2085_vm15, %v5915_v40, %v5932_v48 }
 0x3c2   : > { %v6186_v29 = vpop.permute.xlu1 %2057  ;;  %2347 = vmatprep.subr.mxu1 %v2171_v0  ;;  %v6188_v31 = vpop.permute.xlu0 %2059  ;;  %v2152_v0 = vsel %vm2085_vm15, %v5957_v46, %v5962_v1  ;;  %v2149_v34 = vsel %vm2085_vm15, %v5910_v35, %v5915_v40  ;;  %v2147_v46 = vsel %vm2085_vm15, %v5723_v19, %v5651_v54  ;;  %v2144_v35 = vsel %vm2085_vm15, %v5879_v13, %v5890_v2 }
 0x3c3   : > { %2348 = vmatpush2.msra.mxu1 %v2170_v58  ;;  %v6251_v58 = vld [vmem:[#allocation4 + $0x18] sm:$0xff] }
 0x3c4   : > { %4381 = vrot.lane.b32.xlu1 %v5952_v12, %s4465_s18  ;;  %2349 = vmatprep.subr.mxu1 %v2168_v27  ;;  %v2146_v27 = vsel %vm2085_vm15, %v5568_v33, %v5723_v19  ;;  %v2141_v33 = vsel %vm2085_vm15, %v5839_v11, %v5811_v15 }
 0x3c5   : > { %3291 = vrot.lane.b32.xlu0 %v6196_v6, %s4465_s18  ;;  %2350 = vmatpush2.msra.mxu1 %v2167_v39  ;;  %v6271_v39 = vld [vmem:[#allocation4 + $0x8] sm:$0xff] }
 0x3c6   : > { %v6206_v21 = vpop.permute.xlu1 %2061  ;;  %2351 = vmatprep.subr.mxu1 %v2165_v24  ;;  %v6208_v23 = vpop.permute.xlu0 %2063  ;;  %v2143_v24 = vsel %vm2085_vm15, %v5821_v44, %v5879_v13  ;;  %v2137_v44 = vsel %vm2085_vm15, %v5661_v37, %v5803_v4  ;;  %v2134_v37 = vsel %vm2085_vm15, %v5559_v61, %v5713_v28 }
 0x3c7   : > { %2352 = vmatpush2.msra.mxu1 %v2164_v16  ;;  %v2140_v16 = vsel %vm2085_vm15, %v5741_v3, %v5839_v11  ;;  %v2135_v11 = vsel %vm2085_vm15, %v5713_v28, %v5641_v25  ;;  %v6307_v3 = vld [vmem:[%s7186_s5] sm:$0xff] }
 0x3c8   : > { %3328 = vrot.lane.b32.xlu1 %v6196_v6, %s4468_s23  ;;  %2353 = vmatprep.subr.mxu1 %v2162_v36  ;;  %v2138_v36 = vsel %vm2085_vm15, %v5803_v4, %v5731_v43 }
 0x3c9   : > { %3287 = vrot.lane.b32.xlu0 %v6218_v55, %s4465_s18  ;;  %2354 = vmatpush2.msra.mxu1 %v2161_v8 }
 0x3ca   : > { %v6228_v62 = vpop.permute.xlu1 %2065  ;;  %2355 = vmatprep.subr.mxu1 %v2159_v14  ;;  %v6230_v10 = vpop.permute.xlu0 %2067  ;;  %v6319_v14 = vld [vmem:[%s7186_s5 + $0x20] sm:$0xff] }
 0x3cb   : > { %2356 = vmatpush2.msra.mxu1 %v2158_v53  ;;  %v6333_v53 = vld [vmem:[%s7186_s5 + $0x18] sm:$0xff] }
 0x3cc   : > { %3326 = vrot.lane.b32.xlu1 %v6218_v55, %s4468_s23  ;;  %2357 = vmatprep.subr.mxu1 %v2156_v51 }
 0x3cd   : > { %4386 = vrot.lane.b32.xlu0 %v5952_v12, %s4465_s18  ;;  %2358 = vmatpush2.msra.mxu1 %v2155_v60  ;;  %v2186_v60 = vsel %vm2085_vm15, %v6208_v23, %v6228_v62 }
 0x3ce   : > { %v2070_v56 = vpop.permute.xlu1 %2069  ;;  %2359 = vmatprep.subr.mxu1 %v2153_v30  ;;  %v2072_v49 = vpop.permute.xlu0 %2071  ;;  %v2185_v30 = vsel %vm2085_vm15, %v6206_v21, %v6208_v23  ;;  %v2181_v21 = vsel %vm2085_vm15, %v6158_v50, %v6160_v59  ;;  %v2133_v23 = vsel %vm2085_vm15, %v5877_v38, %v5663_v17  ;;  %v6381_v50 = vld [vmem:[%s7186_s5 + $0x28] sm:$0xff]  ;;  %v7379_v59 = vld [vmem:[#allocation54_spill] sm:$0xff] }
 0x3cf   : > { %2360 = vmatpush2.msra.mxu1 %v2152_v0  ;;  %v2188_v51 = vsel %vm2085_vm15, %v2070_v56, %v2072_v49  ;;  %v2183_v56 = vsel %vm2085_vm15, %v6175_v52, %v6186_v29 }
 0x3d0   : > { %3283 = vrot.lane.b32.xlu1 %v6251_v58, %s4465_s18  ;;  %2361 = vmatprep.subr.mxu1 %v2150_v5  ;;  %v2182_v5 = vsel %vm2085_vm15, %v6173_v22, %v6175_v52  ;;  %v2178_v22 = vsel %vm2085_vm15, %v6143_v18, %v6145_v57  ;;  %v7380_v18 = vld [vmem:[#allocation24_spill] sm:$0xff]  ;;  %v7382_v57 = vld [vmem:[#allocation49_spill] sm:$0xff] }
 0x3d1   : > { %3324 = vrot.lane.b32.xlu0 %v6251_v58, %s4468_s23  ;;  %2362 = vmatpush2.msra.mxu1 %v2149_v34  ;;  %v2130_v34 = vsel %vm2085_vm15, %v7379_v59, %v5753_v47  ;;  %v2175_v38 = vsel %vm2085_vm15, %v6131_v7, %v7380_v18  ;;  %v7386_v7 = vld [vmem:[#allocation42_spill] sm:$0xff]  ;;  %v7398_v18 = vld [vmem:[#allocation40_spill] sm:$0xff] }
 0x3d2   : > { %v6266_v1 = vpop.permute.xlu1 %2073  ;;  %2363 = vmatprep.subr.mxu1 %v2147_v46  ;;  %v6276_v40 = vpop.permute.xlu0 %2075  ;;  %v7383_v46 = vld [vmem:[#allocation8_spill] sm:$0xff] }
 0x3d3   : > { %2364 = vmatpush2.msra.mxu1 %v2146_v27  ;;  %v2189_v28 = vsel %vm2085_vm15, %v2072_v49, %v6266_v1  ;;  %v6353_v49 = vld [vmem:[%s7186_s5 + $0x10] sm:$0xff]  ;;  %v2172_v27 = vsel %vm2085_vm15, %v6119_v20, %v7383_v46 }
 0x3d4   : > { %3279 = vrot.lane.b32.xlu1 %v6271_v39, %s4465_s18  ;;  %2365 = vmatprep.subr.mxu1 %v2144_v35 }
 0x3d5   : > { %3322 = vrot.lane.b32.xlu0 %v6271_v39, %s4468_s23  ;;  %2366 = vmatpush2.msra.mxu1 %v2143_v24  ;;  %v7384_v24 = vld [vmem:[#allocation19_spill] sm:$0xff]  ;;  %s4274_s23 = smul.u32 48, %s7433_s30 }
 0x3d6   : > { %v2078_v19 = vpop.permute.xlu1 %2077  ;;  %2367 = vmatprep.subr.mxu1 %v2141_v33  ;;  %v7385_v33 = vld [vmem:[#allocation41_spill] sm:$0xff] }
 0x3d7   : > { %2368 = vmatpush2.msra.mxu1 %v2140_v16  ;;  %v2080_v13 = vpop.permute.xlu0 %2079  ;;  %s6826_s3 = scalar_lea.vmem %s7198_s17, %s4274_s23  ;;  %s7140_s20 = scalar_lea.vmem %s7429_s2, %s4274_s23 }
 0x3d8   : > { %4391 = vrot.lane.b32.xlu1 %v5952_v12, %s7280_s28  ;;  %2369 = vmatprep.subr.mxu1 %v2138_v36  ;;  %v2191_v61 = vsel %vm2085_vm15, %v2078_v19, %v2080_v13  ;;  %v2124_v19 = vsel %vm2085_vm15, %v7386_v7, %v7385_v33  ;;  %v7387_v36 = vld [vmem:[#allocation30_spill] sm:$0xff]  ;;  %s4275_s23 = smul.u32 40, %s7433_s30 }
 0x3d9   : > { %3271 = vrot.lane.b32.xlu0 %v6196_v6, %s7280_s28  ;;  %2370 = vmatpush2.msra.mxu1 %v2137_v44  ;;  %v2169_v20 = vsel %vm2085_vm15, %v6107_v42, %v7387_v36  ;;  %v7388_v44 = vld [vmem:[#allocation45_spill] sm:$0xff]  ;;  %v7393_v42 = vld [vmem:[#allocation20_spill] sm:$0xff]  ;;  %v7403_v7 = vld [vmem:[#allocation50_spill] sm:$0xff] }
 0x3da   : > { %v6309_v8 = vpop.permute.xlu1 %2081  ;;  %2371 = vmatprep.subr.mxu1 %v2135_v11  ;;  %v7389_v11 = vld [vmem:[#allocation18_spill] sm:$0xff] }
 0x3db   : > { %2372 = vmatpush2.msra.mxu1 %v2134_v37  ;;  %v2192_v4 = vsel %vm2085_vm15, %v2080_v13, %v6309_v8  ;;  %v6355_v0 = vpop.permute.xlu0 %2083  ;;  %v2121_v13 = vsel %vm2085_vm15, %v7389_v11, %v7388_v44  ;;  %v7390_v37 = vld [vmem:[#allocation9_spill] sm:$0xff]  ;;  %v7407_v44 = vld [vmem:[#allocation47_spill] sm:$0xff] }
 0x3dc   : > { %3320 = vrot.lane.b32.xlu1 %v6196_v6, %s7284_s13  ;;  %2374 = vmatmul.mubr.f32.vlgmr.msra.gmra.mxu1 %v6307_v3 }
 0x3dd   : > { %3267 = vrot.lane.b32.xlu0 %v6218_v55, %s7280_s28  ;;  %2410 = vmatprep.subr.mxu0 %v2192_v4  ;;  %v2166_v4 = vsel %vm2085_vm15, %v6091_v26, %v7390_v37  ;;  %v2163_v26 = vsel %vm2085_vm15, %v6075_v41, %v7393_v42  ;;  %v7399_v41 = vld [vmem:[#allocation29_spill] sm:$0xff] }
 0x3de   : > { %2411 = vmatpush1.msra.mxu0 %v2191_v61  ;;  %2379 = vmatprep.mubr.f32.mxu1 %v6319_v14 }
 0x3df   : > { %2412 = vmatprep.subr.mxu0 %v2189_v28  ;;  %v7391_v28 = vld [vmem:[#allocation51_spill] sm:$0xff] }
 0x3e0   : > { %2413 = vmatpush1.msra.mxu0 %v2188_v51  ;;  %3318 = vrot.lane.b32.xlu1 %v6218_v55, %s7284_s13  ;;  %v7392_v51 = vld [vmem:[#allocation11_spill] sm:$0xff] }
 0x3e1   : > { %4396 = vrot.lane.b32.xlu0 %v5952_v12, %s7280_s28  ;;  %2380 = vmatmul.mubr.f32.gmra.mxu1 %v6333_v53 }
 0x3e2   : > { %2414 = vmatprep.subr.mxu0 %v2186_v60  ;;  %v2118_v60 = vsel %vm2085_vm15, %v7392_v51, %v7391_v28  ;;  %v7409_v28 = vld [vmem:[#allocation37_spill] sm:$0xff]  ;;  %v7410_v51 = vld [vmem:[#allocation38_spill] sm:$0xff] }
 0x3e3   : > { %2415 = vmatpush1.msra.mxu0 %v2185_v30 }
 0x3e4   : > { %2416 = vmatprep.subr.mxu0 %v2183_v56  ;;  %3263 = vrot.lane.b32.xlu1 %v6251_v58, %s7280_s28  ;;  %v7394_v56 = vld [vmem:[#allocation34_spill] sm:$0xff] }
 0x3e5   : > { %2417 = vmatpush1.msra.mxu0 %v2182_v5  ;;  %3316 = vrot.lane.b32.xlu0 %v6251_v58, %s7284_s13  ;;  %v7395_v5 = vld [vmem:[#allocation48_spill] sm:$0xff] }
 0x3e6   : > { %3970 = vmatmul.mubr.msk.f32.vlgmr.msra.gmra.mxu0 %vm2302_vm1, %v6353_v49  ;;  %4014 = vmatprep.subr.mxu0 %v2181_v21  ;;  %v2115_v21 = vsel %vm2085_vm15, %v7395_v5, %v7394_v56  ;;  %v7413_v56 = vld [vmem:[#allocation32_spill] sm:$0xff] }
 0x3e7   : > { %4015 = vmatpush3.msra.mxu0 %v2133_v23  ;;  %v6375_v52 = vpop.permute.xlu1 %2617  ;;  %2456 = vmatprep.mubr.f32.mxu0 %v5948_v9  ;;  %v7381_v9 = vld [vmem:[#allocation35_spill] sm:$0xff] }
 0x3e8   : > { %4016 = vmatprep.subr.mxu0 %v2178_v22  ;;  %v6386_v17 = vpop.permute.xlu0 %2622  ;;  %3259 = vrot.lane.b32.xlu1 %v6271_v39, %s7280_s28  ;;  %v2127_v47 = vsel %vm2085_vm15, %v7382_v57, %v7381_v9  ;;  %v7396_v23 = vld [vmem:[#allocation23_spill] sm:$0xff]  ;;  %v7400_v57 = vld [vmem:[#allocation44_spill] sm:$0xff]  ;;  %s7423_s28 = smov 114  }
 0x3e9   : > { %4017 = vmatpush3.msra.mxu0 %v2130_v34  ;;  %3314 = vrot.lane.b32.xlu0 %v6271_v39, %s7284_s13  ;;  %v2160_v22 = vsel %vm2085_vm15, %v6059_v63, %v7396_v23  ;;  %v7397_v34 = vld [vmem:[#allocation39_spill] sm:$0xff]  ;;  %v2157_v63 = vsel %vm2085_vm15, %v6026_v45, %v7399_v41  ;;  %v7405_v45 = vld [vmem:[#allocation16_spill] sm:$0xff] }
 0x3ea   : > { %3971 = vmatmul.mubr.msk.f32.gmra.mxu0 %vm2302_vm1, %v6381_v50  ;;  %4018 = vmatprep.subr.mxu0 %v2175_v38  ;;  %v2112_v38 = vsel %vm2085_vm15, %v7398_v18, %v7397_v34  ;;  %v7415_v34 = vld [vmem:[#allocation25_spill] sm:$0xff]  ;;  %v7416_v18 = vld [vmem:[#allocation31_spill] sm:$0xff] }
 0x3eb   : > { %4019 = vmatpush3.msra.mxu0 %v2127_v47  ;;  %v6403_v35 = vpop.permute.xlu1 %4351  ;;  %2527 = vmatprep.mubr.f32.mxu0 %v7384_v24  ;;  %v7401_v47 = vld [vmem:[#allocation22_spill] sm:$0xff] }
 0x3ec   : > { %4020 = vmatprep.subr.mxu0 %v2172_v27  ;;  %v6409_v16 = vpop.permute.xlu0 %2655  ;;  %4401 = vrot.lane.b32.xlu1 %v5952_v12, %s7281_s25  ;;  %v2109_v46 = vsel %vm2085_vm15, %v7401_v47, %v7400_v57  ;;  %v7402_v27 = vld [vmem:[#allocation27_spill] sm:$0xff]  ;;  %v7419_v57 = vld [vmem:[#allocation28_spill] sm:$0xff] }
 0x3ed   : > { %4021 = vmatpush3.msra.mxu0 %v2124_v19  ;;  %3251 = vrot.lane.b32.xlu0 %v6196_v6, %s7281_s25  ;;  %v2154_v24 = vsel %vm2085_vm15, %v5979_v32, %v7402_v27  ;;  %v7404_v19 = vld [vmem:[#allocation53_spill] sm:$0xff]  ;;  %v2151_v32 = vsel %vm2085_vm15, %v5932_v48, %v7405_v45  ;;  %v7411_v48 = vld [vmem:[#allocation46_spill] sm:$0xff] }
 0x3ee   : > { %4022 = vmatprep.subr.mxu0 %v2169_v20  ;;  %v7406_v20 = vld [vmem:[#allocation33_spill] sm:$0xff] }
 0x3ef   : > { %4023 = vmatpush3.msra.mxu0 %v2121_v13  ;;  %v6424_v61 = vpop.permute.xlu1 %2659  ;;  %v2103_v11 = vsel %vm2085_vm15, %v7407_v44, %v7406_v20  ;;  %v7408_v13 = vld [vmem:[#allocation14_spill] sm:$0xff] }
 0x3f0   : > { %4024 = vmatprep.subr.mxu0 %v2166_v4  ;;  %v6429_v30 = vpop.permute.xlu0 %4356  ;;  %3312 = vrot.lane.b32.xlu1 %v6196_v6, %s4466_s22  ;;  %v2148_v37 = vsel %vm2085_vm15, %v5651_v54, %v7408_v13  ;;  %v2145_v54 = vsel %vm2085_vm15, %v5890_v2, %v7411_v48  ;;  %v7417_v2 = vld [vmem:[#allocation36_spill] sm:$0xff] }
 0x3f1   : > { %4025 = vmatpush3.msra.mxu0 %v2118_v60  ;;  %3247 = vrot.lane.b32.xlu0 %v6218_v55, %s7281_s25  ;;  %v2100_v60 = vsel %vm2085_vm15, %v7410_v51, %v7409_v28 }
 0x3f2   : > { %4026 = vmatprep.subr.mxu0 %v2163_v26  ;;  %v7412_v26 = vld [vmem:[#allocation21_spill] sm:$0xff] }
 0x3f3   : > { %4027 = vmatpush3.msra.mxu0 %v2115_v21  ;;  %v6444_v59 = vpop.permute.xlu1 %2663  ;;  %v2097_v5 = vsel %vm2085_vm15, %v7413_v56, %v7412_v26  ;;  %v7414_v21 = vld [vmem:[#allocation52_spill] sm:$0xff] }
 0x3f4   : > { %4028 = vmatprep.subr.mxu0 %v2160_v22  ;;  %v6449_v9 = vpop.permute.xlu0 %2667  ;;  %3310 = vrot.lane.b32.xlu1 %v6218_v55, %s4466_s22  ;;  %v2142_v23 = vsel %vm2085_vm15, %v5811_v15, %v7414_v21  ;;  %v2139_v15 = vsel %vm2085_vm15, %v5731_v43, %v7417_v2  ;;  %v2190_v43 = vsel %vm2085_vm15, %v6266_v1, %v6276_v40 }
 0x3f5   : > { %4029 = vmatpush3.msra.mxu0 %v2112_v38  ;;  %4406 = vrot.lane.b32.xlu0 %v5952_v12, %s7281_s25  ;;  %v2106_v12 = vsel %vm2085_vm15, %v7404_v19, %v7403_v7  ;;  %v2094_v38 = vsel %vm2085_vm15, %v7416_v18, %v7415_v34  ;;  %v7421_v7 = vld [vmem:[#allocation15_spill] sm:$0xff]  ;;  %v7422_v19 = vld [vmem:[#allocation17_spill] sm:$0xff]  ;;  %v2184_v1 = vsel %vm2085_vm15, %v6186_v29, %v6188_v31 }
 0x3f6   : > { %4030 = vmatprep.subr.mxu0 %v2157_v63  ;;  %v7418_v63 = vld [vmem:[#allocation10_spill] sm:$0xff] }
 0x3f7   : > { %4031 = vmatpush3.msra.mxu0 %v2109_v46  ;;  %v6464_v33 = vpop.permute.xlu1 %4361  ;;  %v2091_v47 = vsel %vm2085_vm15, %v7419_v57, %v7418_v63  ;;  %v7420_v46 = vld [vmem:[#allocation43_spill] sm:$0xff] }
 0x3f8   : > { %4032 = vmatprep.subr.mxu0 %v2154_v24  ;;  %v6469_v36 = vpop.permute.xlu0 %2675  ;;  %3243 = vrot.lane.b32.xlu1 %v6251_v58, %s7281_s25  ;;  %v2136_v27 = vsel %vm2085_vm15, %v5641_v25, %v7420_v46  ;;  %v2193_v25 = vsel %vm2085_vm15, %v6309_v8, %v6355_v0 }
 0x3f9   : > { %4033 = vmatpush3.msra.mxu0 %v2106_v12  ;;  %3308 = vrot.lane.b32.xlu0 %v6251_v58, %s4466_s22  ;;  %v2088_v12 = vsel %vm2085_vm15, %v7422_v19, %v7421_v7  ;;  %v4364_v7 = vunpack.i.h.bf16 %v6464_v33 }
 0x3fa   : > { %4034 = vmatprep.subr.mxu0 %v2151_v32 }
 0x3fb   : > { %4035 = vmatpush3.msra.mxu0 %v2103_v11  ;;  %v6484_v4 = vpop.permute.xlu1 %2679 }
 0x3fc   : > { %4036 = vmatprep.subr.mxu0 %v2148_v37  ;;  %v6489_v42 = vpop.permute.xlu0 %4366  ;;  %3239 = vrot.lane.b32.xlu1 %v6271_v39, %s7281_s25  ;;  %s4470_s25 = smov 11  }
 0x3fd   : > { %4037 = vmatpush3.msra.mxu0 %v2100_v60  ;;  %3306 = vrot.lane.b32.xlu0 %v6271_v39, %s4466_s22  ;;  %v4368_v63 = vunpack.i.l.bf16 %v6489_v42  ;;  %v4369_v57 = vunpack.i.h.bf16 %v6489_v42  ;;  %s4471_s22 = smov 7  }
 0x3fe   : > { %4038 = vmatprep.subr.mxu0 %v2145_v54 }
 0x3ff   : > { %4039 = vmatpush3.msra.mxu0 %v2097_v5  ;;  %v6504_v22 = vpop.permute.xlu1 %2683 }
 0x400   : > { %4040 = vmatprep.subr.mxu0 %v2142_v23  ;;  %v6509_v41 = vpop.permute.xlu0 %2687  ;;  %3304 = vrot.lane.b32.xlu1 %v6196_v6, %s4464_s19  ;;  %v2691_v46 = vsel %vm688_vm9, %v4368_v63, %v6504_v22 }
 0x401   : > { %4041 = vmatpush3.msra.mxu0 %v2094_v38  ;;  %3302 = vrot.lane.b32.xlu0 %v6218_v55, %s4464_s19 }
 0x402   : > { %4042 = vmatprep.subr.mxu0 %v2139_v15 }
 0x403   : > { %4043 = vmatpush3.msra.mxu0 %v2091_v47  ;;  %v6524_v24 = vpop.permute.xlu1 %4371 }
 0x404   : > { %4044 = vmatprep.subr.mxu0 %v2136_v27  ;;  %v6529_v45 = vpop.permute.xlu0 %2695  ;;  %3300 = vrot.lane.b32.xlu1 %v6251_v58, %s4464_s19  ;;  %v4373_v48 = vunpack.i.l.bf16 %v6524_v24  ;;  %v4374_v26 = vunpack.i.h.bf16 %v6524_v24  ;;  %v2692_v24 = vsel %vm688_vm9, %v4369_v57, %v6509_v41  ;;  %v6749_v57 = vld [vmem:[#allocation2] sm:$0xff] }
 0x405   : > { %4045 = vmatpush3.msra.mxu0 %v2088_v12  ;;  %3298 = vrot.lane.b32.xlu0 %v6271_v39, %s4464_s19 }
 0x406   : > { %2528 = vmatmul.mubr.f32.vlgmr.msra.gmra.mxu0 %v6307_v3  ;;  %4222 = vmatprep.subr.mxu0 %v2193_v25  ;;  %v2187_v3 = vsel %vm2085_vm15, %v6228_v62, %v6230_v10  ;;  %v2710_v21 = vsel %vm2709_vm2, %v4373_v48, %v6529_v45 }
 0x407   : > { %4223 = vmatpush3.msra.mxu0 %v2193_v25  ;;  %v2700_v32 = vpop.permute.xlu1 %2699  ;;  %2532 = vmatprep.mubr.f32.mxu0 %v6319_v14 }
 0x408   : > { %4224 = vmatprep.subr.mxu0 %v2190_v43  ;;  %v4377_v20 = vpop.permute.xlu0 %4376  ;;  %3336 = vrot.lane.b32.xlu1 %v6196_v6, %s7423_s28  ;;  %v2711_v34 = vsel %vm2709_vm2, %v4374_v26, %v2700_v32  ;;  %v4353_v26 = vunpack.i.l.bf16 %v6403_v35 }
 0x409   : > { %4225 = vmatpush3.msra.mxu0 %v2190_v43  ;;  %3334 = vrot.lane.b32.xlu0 %v6218_v55, %s7423_s28  ;;  %v4379_v55 = vunpack.i.h.bf16 %v4377_v20  ;;  %v4378_v10 = vunpack.i.l.bf16 %v4377_v20 }
 0x40a   : > { %2533 = vmatmul.mubr.f32.gmra.mxu0 %v6333_v53  ;;  %4226 = vmatprep.subr.mxu0 %v2187_v3 }
 0x40b   : > { %4227 = vmatpush3.msra.mxu0 %v2187_v3  ;;  %v2704_v40 = vpop.permute.xlu1 %2703  ;;  %4230 = vmatprep.mubr.msk.f32.mxu0 %vm2302_vm1, %v6353_v49 }
 0x40c   : > { %4228 = vmatprep.subr.mxu0 %v2184_v1  ;;  %v2708_v6 = vpop.permute.xlu0 %2707  ;;  %3332 = vrot.lane.b32.xlu1 %v6251_v58, %s7423_s28 }
 0x40d   : > { %4229 = vmatpush3.msra.mxu0 %v2184_v1  ;;  %3330 = vrot.lane.b32.xlu0 %v6271_v39, %s7423_s28  ;;  %v2713_v29 = vsel %vm2709_vm2, %v4379_v55, %v2708_v6  ;;  %v2712_v39 = vsel %vm2709_vm2, %v4378_v10, %v2704_v40  ;;  %s7430_s28 = sld [smem:[#allocation61_spill]] }
 0x40e   : > { %4231 = vmatmul.mubr.msk.f32.vlgmr.msra.gmra.mxu0 %vm2302_vm1, %v6381_v50 }
 0x40f   : > { %v6562_v62 = vpop.permute.xlu1 %2714 }
 0x410   : > { %v6565_v31 = vpop.permute.xlu0 %2716  ;;  %2868 = vrot.lane.b32.xlu1 %v2713_v29, %s4470_s25 }
 0x411   : > { %2870 = vrot.lane.b32.xlu0 %v2708_v6, %s4470_s25 }
 0x413   : > { %v6569_v58 = vpop.permute.xlu1 %2718 }
 0x414   : > { %v6571_v8 = vpop.permute.xlu0 %2720 }
 0x415   : > { %2864 = vrot.lane.b32.xlu0 %v2712_v39, %s4470_s25  ;;  %v4358_v39 = vunpack.i.l.bf16 %v6429_v30 }
 0x417   : > { %v6575_v14 = vpop.permute.xlu1 %2722 }
 0x418   : > { %v6577_v53 = vpop.permute.xlu0 %2724 }
 0x41b   : > { %v6579_v49 = vpop.permute.xlu1 %2726 }
 0x41c   : > { %v6581_v0 = vpop.permute.xlu0 %2728 }
 0x41f   : > { %v2731_v50 = vpop.permute.xlu1 %2730 }
 0x420   : > { %v2733_v44 = vpop.permute.xlu0 %2732 }
 0x423   : > { %v2735_v11 = vpop.permute.xlu1 %2734 }
 0x424   : > { %v2737_v13 = vpop.permute.xlu0 %2736 }
 0x427   : > { %v2739_v37 = vpop.permute.xlu1 %2738 }
 0x428   : > { %v2741_v28 = vpop.permute.xlu0 %2740 }
 0x42b   : > { %v2743_v51 = vpop.permute.xlu1 %2742 }
 0x42c   : > { %v2745_v60 = vpop.permute.xlu0 %2744  ;;  %2900 = vrot.lane.b32.xlu0 %v2743_v51, %s4470_s25 }
 0x42d   : > { %2902 = vrot.lane.b32.xlu1 %v2745_v60, %s4470_s25 }
 0x42f   : > { %v6586_v54 = vpop.permute.xlu1 %2746 }
 0x430   : > { %v2749_v56 = vpop.permute.xlu0 %2748  ;;  %2862 = vrot.lane.b32.xlu0 %v2700_v32, %s4470_s25 }
 0x431   : > { %2866 = vrot.lane.b32.xlu1 %v2704_v40, %s4470_s25  ;;  %v4359_v40 = vunpack.i.h.bf16 %v6429_v30  ;;  %v2756_v30 = vld [vmem:[%s7189_s8 + $0x10] sm:$0xff] }
 0x432   : > { %4241 = vmatprep.mubr.msk.f32.mxu1 %vm2302_vm1, %v2756_v30 }
 0x433   : > { %v2751_v5 = vpop.permute.xlu1 %2750  ;;  %v2672_v55 = vsel %vm676_vm3, %v4359_v40, %v6449_v9 }
 0x434   : > { %v2753_v23 = vpop.permute.xlu0 %2752  ;;  %2856 = vrot.lane.b32.xlu0 %v2710_v21, %s4470_s25 }
 0x435   : > { %2860 = vrot.lane.b32.xlu1 %v2711_v34, %s4470_s25 }
 0x437   : > { %v6596_v18 = vpop.permute.xlu1 %2780 }
 0x438   : > { %v6598_v38 = vpop.permute.xlu0 %2785  ;;  %2896 = vrot.lane.b32.xlu0 %v2739_v37, %s4470_s25 }
 0x439   : > { %2898 = vrot.lane.b32.xlu1 %v2741_v28, %s4470_s25 }
 0x43b   : > { %v6602_v2 = vpop.permute.xlu1 %2790 }
 0x43c   : > { %v6604_v15 = vpop.permute.xlu0 %2795  ;;  %2854 = vrot.lane.b32.xlu0 %v6509_v41, %s4470_s25  ;;  %v4363_v41 = vunpack.i.l.bf16 %v6464_v33 }
 0x43d   : > { %2858 = vrot.lane.b32.xlu1 %v6529_v45, %s4470_s25  ;;  %v2690_v45 = vsel %vm688_vm9, %v4364_v7, %v6484_v4 }
 0x43e   : > { %v2689_v3 = vsel %vm688_vm9, %v4363_v41, %v6469_v36  ;;  %v7425_v41 = vld [vmem:[#allocation26_spill] sm:$0xff] }
 0x43f   : > { %v6612_v47 = vpop.permute.xlu1 %4381 }
 0x440   : > { %v3292_v27 = vpop.permute.xlu0 %3291  ;;  %2848 = vrot.lane.b32.xlu0 %v2691_v46, %s4470_s25 }
 0x441   : > { %2852 = vrot.lane.b32.xlu1 %v2692_v24, %s4470_s25 }
 0x443   : > { %v3329_v19 = vpop.permute.xlu1 %3328 }
 0x444   : > { %v6621_v12 = vpop.permute.xlu0 %3287  ;;  %2892 = vrot.lane.b32.xlu0 %v2735_v11, %s4470_s25 }
 0x445   : > { %2894 = vrot.lane.b32.xlu1 %v2737_v13, %s4470_s25  ;;  %v4354_v13 = vunpack.i.h.bf16 %v6403_v35 }
 0x447   : > { %v6625_v42 = vpop.permute.xlu1 %3326  ;;  %v2670_v51 = vsel %vm676_vm3, %v4354_v13, %v6424_v61 }
 0x448   : > { %v6629_v25 = vpop.permute.xlu0 %4386  ;;  %2844 = vrot.lane.b32.xlu0 %v2690_v45, %s4470_s25 }
 0x449   : > { %2850 = vrot.lane.b32.xlu1 %v6504_v22, %s4470_s25  ;;  %v4388_v63 = vunpack.i.l.bf16 %v6629_v25 }
 0x44b   : > { %v6635_v43 = vpop.permute.xlu1 %3283 }
 0x44c   : > { %v6637_v32 = vpop.permute.xlu0 %3324  ;;  %2890 = vrot.lane.b32.xlu0 %v2733_v44, %s4470_s25  ;;  %v2671_v44 = vsel %vm676_vm3, %v4358_v39, %v6444_v59  ;;  %v4435_v39 = vld [vmem:[#allocation3 + $0x18] sm:$0xff] }
 0x44d   : > { %2910 = vrot.lane.b32.xlu1 %v2753_v23, %s4470_s25 }
 0x44f   : > { %v6641_v20 = vpop.permute.xlu1 %3279 }
 0x450   : > { %v6645_v1 = vpop.permute.xlu0 %3322  ;;  %2840 = vrot.lane.b32.xlu0 %v2689_v3, %s4470_s25 }
 0x451   : > { %2846 = vrot.lane.b32.xlu1 %v6484_v4, %s4470_s25 }
 0x453   : > { %v6650_v33 = vpop.permute.xlu1 %4391 }
 0x454   : > { %v6652_v22 = vpop.permute.xlu0 %3271  ;;  %2888 = vrot.lane.b32.xlu0 %v2731_v50, %s4470_s25  ;;  %v4394_v3 = vunpack.i.h.bf16 %v6650_v33 }
 0x455   : > { %2908 = vrot.lane.b32.xlu1 %v2751_v5, %s4470_s25 }
 0x457   : > { %v6657_v6 = vpop.permute.xlu1 %3320 }
 0x458   : > { %v6661_v29 = vpop.permute.xlu0 %3267  ;;  %2836 = vrot.lane.b32.xlu0 %v2672_v55, %s4470_s25 }
 0x459   : > { %2842 = vrot.lane.b32.xlu1 %v6469_v36, %s4470_s25 }
 0x45b   : > { %v6666_v4 = vpop.permute.xlu1 %3318 }
 0x45c   : > { %v6668_v10 = vpop.permute.xlu0 %4396  ;;  %2886 = vrot.lane.b32.xlu0 %v6581_v0, %s4470_s25 }
 0x45d   : > { %2906 = vrot.lane.b32.xlu1 %v2749_v56, %s4470_s25  ;;  %v4384_v56 = vunpack.i.h.bf16 %v6612_v47 }
 0x45f   : > { %v6674_v50 = vpop.permute.xlu1 %3263  ;;  %v3296_v35 = vsel %vm3293_vm4, %v4384_v56, %v6621_v12 }
 0x460   : > { %v6678_v11 = vpop.permute.xlu0 %3316  ;;  %2832 = vrot.lane.b32.xlu0 %v2671_v44, %s4470_s25 }
 0x461   : > { %2838 = vrot.lane.b32.xlu1 %v6449_v9, %s4470_s25  ;;  %v4383_v9 = vunpack.i.l.bf16 %v6612_v47  ;;  %v6753_v47 = vpack.i.bf16 %v6749_v57, %v6749_v57 }
 0x463   : > { %v6683_v36 = vpop.permute.xlu1 %3259  ;;  %v3297_v48 = vsel %vm3293_vm4, %v4383_v9, %v3292_v27 }
 0x464   : > { %v6688_v0 = vpop.permute.xlu0 %3314  ;;  %2884 = vrot.lane.b32.xlu0 %v6579_v49, %s4470_s25 }
 0x465   : > { %2904 = vrot.lane.b32.xlu1 %v6586_v54, %s4470_s25 }
 0x467   : > { %v6696_v37 = vpop.permute.xlu1 %4401 }
 0x468   : > { %v6699_v28 = vpop.permute.xlu0 %3251  ;;  %3445 = vrot.lane.b32.xlu0 %v3292_v27, %s4471_s22  ;;  %v3295_v27 = vsel %vm3293_vm4, %v4388_v63, %v6635_v43 }
 0x469   : > { %2834 = vrot.lane.b32.xlu1 %v6444_v59, %s4470_s25 }
 0x46b   : > { %v6704_v49 = vpop.permute.xlu1 %3312 }
 0x46c   : > { %v6708_v60 = vpop.permute.xlu0 %3247  ;;  %2828 = vrot.lane.b32.xlu0 %v2670_v51, %s4470_s25 }
 0x46d   : > { %3443 = vrot.lane.b32.xlu1 %v3297_v48, %s4471_s22  ;;  %v7426_v48 = vld [vmem:[#allocation6_spill] sm:$0xff] }
 0x46f   : > { %v6717_v59 = vpop.permute.xlu1 %3310 }
 0x470   : > { %v6713_v54 = vpop.permute.xlu0 %4406  ;;  %2882 = vrot.lane.b32.xlu0 %v6577_v53, %s4470_s25  ;;  %v2669_v53 = vsel %vm676_vm3, %v4353_v26, %v6409_v16 }
 0x471   : > { %3477 = vrot.lane.b32.xlu1 %v3329_v19, %s4471_s22  ;;  %v7424_v19 = vld [vmem:[#allocation12_spill] sm:$0xff] }
 0x473   : > { %v6728_v21 = vpop.permute.xlu1 %3243 }
 0x474   : > { %v6722_v5 = vpop.permute.xlu0 %3308  ;;  %3441 = vrot.lane.b32.xlu0 %v6621_v12, %s4471_s22 }
 0x475   : > { %2830 = vrot.lane.b32.xlu1 %v6424_v61, %s4470_s25 }
 0x477   : > { %v6742_v61 = vpop.permute.xlu1 %3239 }
 0x478   : > { %v6732_v23 = vpop.permute.xlu0 %3306  ;;  %2824 = vrot.lane.b32.xlu0 %v2669_v53, %s4470_s25 }
 0x479   : > { %3439 = vrot.lane.b32.xlu1 %v3296_v35, %s4471_s22 }
 0x47b   : > { %v6759_v46 = vpop.permute.xlu1 %3304 }
 0x47c   : > { %v6738_v34 = vpop.permute.xlu0 %3302  ;;  %2880 = vrot.lane.b32.xlu0 %v6575_v14, %s4470_s25 }
 0x47d   : > { %3475 = vrot.lane.b32.xlu1 %v6625_v42, %s4471_s22  ;;  %v4393_v42 = vunpack.i.l.bf16 %v6650_v33  ;;  %v2755_v33 = vld [vmem:[%s7189_s8 + $0x8] sm:$0xff] }
 0x47e   : > { %3047 = vmatprep.mubr.f32.mxu0 %v2755_v33 }
 0x47f   : > { %v6770_v7 = vpop.permute.xlu1 %3300 }
 0x480   : > { %3437 = vrot.lane.b32.xlu0 %v6635_v43, %s4471_s22  ;;  %v6757_v14 = vpop.permute.xlu0 %3298 }
 0x481   : > { %2826 = vrot.lane.b32.xlu1 %v6409_v16, %s4470_s25  ;;  %v4389_v16 = vunpack.i.h.bf16 %v6629_v25  ;;  %v3276_v25 = vsel %vm688_vm9, %v4393_v42, %v6652_v22 }
 0x483   : > { %v6782_v45 = vpop.permute.xlu1 %3336 }
 0x484   : > { %4411 = vrot.lane.b32.xlu0 %v6753_v47, %s4470_s25  ;;  %v6766_v24 = vpop.permute.xlu0 %3334 }
 0x485   : > { %3435 = vrot.lane.b32.xlu1 %v3295_v27, %s4471_s22 }
 0x488   : > { %2878 = vrot.lane.b32.xlu0 %v6571_v8, %s4470_s25  ;;  %v6779_v12 = vpop.permute.xlu0 %3330  ;;  %v3294_v8 = vsel %vm3293_vm4, %v4389_v16, %v6641_v20 }
 0x489   : > { %3473 = vrot.lane.b32.xlu1 %v6637_v32, %s4471_s22  ;;  %v6792_v32 = vpop.permute.xlu1 %3332 }
 0x48c   : > { %3433 = vrot.lane.b32.xlu0 %v6641_v20, %s4471_s22  ;;  %v2871_v43 = vpop.permute.xlu0 %2870 }
 0x48d   : > { %2822 = vrot.lane.b32.xlu1 %v7424_v19, %s4470_s25  ;;  %v2869_v40 = vpop.permute.xlu1 %2868  ;;  %v7427_v19 = vld [vmem:[#allocation7_spill] sm:$0xff] }
 0x490   : > { %2818 = vrot.lane.b32.xlu0 %v7425_v41, %s4470_s25  ;;  %v2865_v20 = vpop.permute.xlu0 %2864 }
 0x491   : > { %3431 = vrot.lane.b32.xlu1 %v3294_v8, %s4471_s22 }
 0x494   : > { %3427 = vrot.lane.b32.xlu0 %v3276_v25, %s4471_s22 }
 0x495   : > { %3471 = vrot.lane.b32.xlu1 %v6645_v1, %s4471_s22 }
 0x498   : > { %3469 = vrot.lane.b32.xlu0 %v6657_v6, %s4471_s22  ;;  %v3275_v6 = vsel %vm688_vm9, %v4394_v3, %v6661_v29 }
 0x499   : > { %2876 = vrot.lane.b32.xlu1 %v6569_v58, %s4470_s25  ;;  %v2928_v58 = vsel %vm2912_vm5, %v2869_v40, %v2871_v43  ;;  %v4399_v43 = vunpack.i.h.bf16 %v6668_v10 }
 0x49b   : > { %v3273_v33 = vsel %vm688_vm9, %v4399_v43, %v6683_v36 }
 0x49c   : > { %v2375_v55 = vpop.f32.mrf.mxu1  ;;  %2814 = vrot.lane.b32.xlu0 %v4435_v39, %s4470_s25 }
 0x49d   : > { %3429 = vrot.lane.b32.xlu1 %v6652_v22, %s4471_s22  ;;  %v2376_v26 = vadd.f32 %v2375_v55, %v7426_v48  ;;  %v4398_v55 = vunpack.i.l.bf16 %v6668_v10 }
 0x49e   : > { %v2901_v44 = vpop.permute.xlu0 %2900  ;;  %v2377_v30 = vpop.f32.mrf.mxu1 }
 0x49f   : > { %v2903_v1 = vpop.permute.xlu1 %2902  ;;  %v2378_v35 = vadd.f32 %v2377_v30, %v7426_v48 }
 0x4a0   : > { %4058 = vmatprep.subr.mxu0 %v2903_v1  ;;  %3423 = vrot.lane.b32.xlu0 %v3275_v6, %s4471_s22  ;;  %v4436_v6 = vld [vmem:[#allocation3 + $0x8] sm:$0xff] }
 0x4a1   : > { %4059 = vmatpush3.msra.mxu0 %v2928_v58  ;;  %4416 = vrot.lane.b32.xlu1 %v6753_v47, %s4470_s25  ;;  %v2381_v9 = vpop.f32.mrf.mxu1 }
 0x4a2   : > { %4060 = vmatprep.subr.mxu0 %v2901_v44  ;;  %v2863_v22 = vpop.permute.xlu0 %2862 }
 0x4a3   : > { %v2867_v13 = vpop.permute.xlu1 %2866  ;;  %v2383_v16 = vpop.f32.mrf.mxu1 }
 0x4a4   : > { %v2927_v51 = vsel %vm2912_vm5, %v2865_v20, %v2867_v13  ;;  %3467 = vrot.lane.b32.xlu0 %v6666_v4, %s4471_s22  ;;  %v2384_v20 = vadd.f32 %v2383_v16, %v7427_v19  ;;  %v3274_v13 = vsel %vm688_vm9, %v4398_v55, %v6674_v50 }
 0x4a5   : > { %4061 = vmatpush3.msra.mxu0 %v2927_v51  ;;  %2874 = vrot.lane.b32.xlu1 %v6565_v31, %s4470_s25  ;;  %v2382_v31 = vadd.f32 %v2381_v9, %v7427_v19 }
 0x4a6   : > { %v2452_v56 = vpop.f32.mrf.mxu0  ;;  %v2857_v53 = vpop.permute.xlu0 %2856 }
 0x4a7   : > { %v2453_v63 = vadd.f32 %v2452_v56, %v2376_v26  ;;  %v2861_v27 = vpop.permute.xlu1 %2860  ;;  %v4404_v56 = vunpack.i.h.bf16 %v6696_v37 }
 0x4a8   : > { %v2454_v4 = vpop.f32.mrf.mxu0  ;;  %2872 = vrot.lane.b32.xlu0 %v6562_v62, %s4470_s25  ;;  %v2926_v39 = vsel %vm2912_vm5, %v2861_v27, %v2863_v22 }
 0x4a9   : > { %v2625_v42 = vmul.f32 %v6375_v52, %v2453_v63  ;;  %v2455_v8 = vadd.f32 %v2454_v4, %v2378_v35  ;;  %3425 = vrot.lane.b32.xlu1 %v6661_v29, %s4471_s22 }
 0x4aa   : > { %v2458_v41 = vpop.f32.mrf.mxu0  ;;  %v2897_v25 = vpop.permute.xlu0 %2896 }
 0x4ab   : > { %2631 = vst [vmem:[%s6826_s3] sm:$0xff] %v2625_v42  ;;  %v2626_v3 = vmul.f32 %v6375_v52, %v2455_v8  ;;  %v2459_v62 = vadd.f32 %v2458_v41, %v2382_v31  ;;  %v2899_v40 = vpop.permute.xlu1 %2898  ;;  %v4409_v31 = vunpack.i.h.bf16 %v6713_v54  ;;  %v4408_v42 = vunpack.i.l.bf16 %v6713_v54 }
 0x4ac   : > { %v2460_v44 = vpop.f32.mrf.mxu0  ;;  %4062 = vmatprep.subr.mxu0 %v2899_v40  ;;  %3421 = vrot.lane.b32.xlu0 %v6674_v50, %s4471_s22  ;;  %v4403_v50 = vunpack.i.l.bf16 %v6696_v37 }
 0x4ad   : > { %2632 = vst [vmem:[%s6826_s3 + $0x8] sm:$0xff] %v2626_v3  ;;  %v2628_v29 = vmul.f32 %v6386_v17, %v2459_v62  ;;  %v2461_v1 = vadd.f32 %v2460_v44, %v2384_v20  ;;  %4063 = vmatpush3.msra.mxu0 %v2926_v39  ;;  %2810 = vrot.lane.b32.xlu1 %v4436_v6, %s4470_s25  ;;  %s7428_s25 = sld [smem:[#allocation59_spill]] }
 0x4ae   : > { %4064 = vmatprep.subr.mxu0 %v2897_v25  ;;  %v2855_v58 = vpop.permute.xlu0 %2854  ;;  %v3256_v37 = vsel %vm676_vm3, %v4403_v50, %v6699_v28  ;;  %v3254_v54 = vsel %vm676_vm3, %v4408_v42, %v6728_v21 }
 0x4af   : > { %2634 = vst [vmem:[%s6826_s3 + $0x18] sm:$0xff] %v2628_v29  ;;  %v2629_v10 = vmul.f32 %v6386_v17, %v2461_v1  ;;  %v2859_v30 = vpop.permute.xlu1 %2858 }
 0x4b0   : > { %v2925_v22 = vsel %vm2912_vm5, %v2857_v53, %v2859_v30  ;;  %3415 = vrot.lane.b32.xlu0 %v3273_v33, %s4471_s22 }
 0x4b1   : > { %2635 = vst [vmem:[%s6826_s3 + $0x20] sm:$0xff] %v2629_v10  ;;  %4065 = vmatpush3.msra.mxu0 %v2925_v22  ;;  %3419 = vrot.lane.b32.xlu1 %v3274_v13, %s4471_s22  ;;  %v4437_v10 = vld [vmem:[#allocation4 + $0x38] sm:$0xff]  ;;  %v4438_v13 = vld [vmem:[#allocation4 + $0x28] sm:$0xff] }
 0x4b2   : > { %v2849_v9 = vpop.permute.xlu0 %2848 }
 0x4b3   : > { %v2853_v51 = vpop.permute.xlu1 %2852 }
 0x4b4   : > { %3463 = vrot.lane.b32.xlu0 %v6688_v0, %s4471_s22  ;;  %v2924_v35 = vsel %vm2912_vm5, %v2853_v51, %v2855_v58 }
 0x4b5   : > { %3465 = vrot.lane.b32.xlu1 %v6678_v11, %s4471_s22  ;;  %v3255_v11 = vsel %vm676_vm3, %v4404_v56, %v6708_v60  ;;  %v2765_v56 = vld [vmem:[%s7189_s8 + $0x58] sm:$0xff] }
 0x4b6   : > { %v2893_v26 = vpop.permute.xlu0 %2892 }
 0x4b7   : > { %v2895_v53 = vpop.permute.xlu1 %2894 }
 0x4b8   : > { %4066 = vmatprep.subr.mxu0 %v2895_v53  ;;  %3413 = vrot.lane.b32.xlu0 %v6699_v28, %s4471_s22 }
 0x4b9   : > { %3417 = vrot.lane.b32.xlu1 %v6683_v36, %s4471_s22  ;;  %4067 = vmatpush3.msra.mxu0 %v2924_v35  ;;  %v2771_v35 = vld [vmem:[%s7189_s8 + $0x88] sm:$0xff] }
 0x4ba   : > { %4068 = vmatprep.subr.mxu0 %v2893_v26  ;;  %v2845_v0 = vpop.permute.xlu0 %2844 }
 0x4bb   : > { %v2851_v63 = vpop.permute.xlu1 %2850 }
 0x4bc   : > { %v2923_v27 = vsel %vm2912_vm5, %v2849_v9, %v2851_v63  ;;  %3407 = vrot.lane.b32.xlu0 %v3255_v11, %s4471_s22 }
 0x4bd   : > { %3411 = vrot.lane.b32.xlu1 %v3256_v37, %s4471_s22  ;;  %4069 = vmatpush3.msra.mxu0 %v2923_v27 }
 0x4be   : > { %v2891_v16 = vpop.permute.xlu0 %2890 }
 0x4bf   : > { %v2911_v4 = vpop.permute.xlu1 %2910  ;;  %4070 = vmatprep.subr.mxu0 %v2891_v16 }
 0x4c0   : > { %4233 = vmatprep.subr.mxu1 %v2911_v4  ;;  %3459 = vrot.lane.b32.xlu0 %v6717_v59, %s4471_s22 }
 0x4c1   : > { %3461 = vrot.lane.b32.xlu1 %v6704_v49, %s4471_s22  ;;  %4234 = vmatpush3.msra.mxu1 %v2911_v4  ;;  %v3253_v49 = vsel %vm676_vm3, %v4409_v31, %v6742_v61  ;;  %vm3487_vm3 = vcmask 56320   ;;  %v2777_v4 = vld [vmem:[%s7190_s9 + $0x28] sm:$0xff] }
 0x4c2   : > { %v2841_v36 = vpop.permute.xlu0 %2840  ;;  %v3354_v31 = vld [vmem:[%s7193_s12 + $0x8] sm:$0xff] }
 0x4c3   : > { %v2847_v28 = vpop.permute.xlu1 %2846 }
 0x4c4   : > { %v2922_v8 = vsel %vm2912_vm5, %v2845_v0, %v2847_v28  ;;  %3405 = vrot.lane.b32.xlu0 %v6728_v21, %s4471_s22 }
 0x4c5   : > { %3409 = vrot.lane.b32.xlu1 %v6708_v60, %s4471_s22  ;;  %4071 = vmatpush3.msra.mxu0 %v2922_v8 }
 0x4c6   : > { %v4046_v59 = vpop.f32.mrf.mxu0  ;;  %v2889_v41 = vpop.permute.xlu0 %2888 }
 0x4c7   : > { %v2909_v25 = vpop.permute.xlu1 %2908  ;;  %4072 = vmatprep.subr.mxu0 %v2889_v41 }
 0x4c8   : > { %v4047_v43 = vpop.f32.mrf.mxu0  ;;  %4235 = vmatprep.subr.mxu1 %v2909_v25  ;;  %3399 = vrot.lane.b32.xlu0 %v3253_v49, %s4471_s22  ;;  %v3173_v49 = vld [vmem:[%s7191_s10] sm:$0xff] }
 0x4c9   : > { %3403 = vrot.lane.b32.xlu1 %v3254_v54, %s4471_s22  ;;  %4236 = vmatpush3.msra.mxu1 %v2909_v25  ;;  %v4048_v3 = vadd.f32 %v4047_v43, %v4046_v59  ;;  %v3353_v59 = vld [vmem:[%s7193_s12] sm:$0xff]  ;;  %v3355_v54 = vld [vmem:[%s7193_s12 + $0x10] sm:$0xff] }
 0x4ca   : > { %v4049_v20 = vpop.f32.mrf.mxu0  ;;  %v2837_v60 = vpop.permute.xlu0 %2836 }
 0x4cb   : > { %v2843_v62 = vpop.permute.xlu1 %2842  ;;  %v2530_v1 = vadd.f32 %v4048_v3, %v7426_v48 }
 0x4cc   : > { %v4050_v40 = vpop.f32.mrf.mxu0  ;;  %v2921_v55 = vsel %vm2912_vm5, %v2841_v36, %v2843_v62  ;;  %3455 = vrot.lane.b32.xlu0 %v6732_v23, %s4471_s22  ;;  %v3357_v62 = vld [vmem:[%s7193_s12 + $0x20] sm:$0xff] }
 0x4cd   : > { %v4051_v39 = vadd.f32 %v4050_v40, %v4049_v20  ;;  %3457 = vrot.lane.b32.xlu1 %v6722_v5, %s4471_s22  ;;  %4073 = vmatpush3.msra.mxu0 %v2921_v55 }
 0x4ce   : > { %v4232_v21 = vpop.f32.mrf.mxu0  ;;  %v2887_v44 = vpop.permute.xlu0 %2886 }
 0x4cf   : > { %v2535_v29 = vadd.f32 %v4051_v39, %v7427_v19  ;;  %v2907_v6 = vpop.permute.xlu1 %2906  ;;  %4074 = vmatprep.subr.mxu0 %v2887_v44 }
 0x4d0   : > { %v2604_v58 = vpop.f32.mrf.mxu0  ;;  %4237 = vmatprep.subr.mxu1 %v2907_v6  ;;  %3397 = vrot.lane.b32.xlu0 %v4437_v10, %s4471_s22 }
 0x4d1   : > { %v2610_v23 = vadd.f32 %v4232_v21, %v2535_v29  ;;  %v2605_v30 = vadd.f32 %v2604_v58, %v2530_v1  ;;  %3401 = vrot.lane.b32.xlu1 %v6742_v61, %s4471_s22  ;;  %4238 = vmatpush3.msra.mxu1 %v2907_v6  ;;  %v3177_v21 = vld [vmem:[%s7191_s10 + $0x20] sm:$0xff]  ;;  %v3174_v29 = vld [vmem:[%s7191_s10 + $0x8] sm:$0xff] }
 0x4d2   : > { %v2833_v5 = vpop.permute.xlu0 %2832  ;;  %v3735_v58 = vld [vmem:[%s7428_s25] sm:$0xff] }
 0x4d3   : > { %v2630_v19 = vmul.f32 %v6386_v17, %v2610_v23  ;;  %v2627_v48 = vmul.f32 %v6375_v52, %v2605_v30  ;;  %v2839_v33 = vpop.permute.xlu1 %2838  ;;  %v2759_v52 = vld [vmem:[%s7189_s8 + $0x28] sm:$0xff]  ;;  %v2762_v17 = vld [vmem:[%s7189_s8 + $0x40] sm:$0xff]  ;;  %v3176_v23 = vld [vmem:[%s7191_s10 + $0x18] sm:$0xff] }
 0x4d4   : > { %v2920_v22 = vsel %vm2912_vm5, %v2837_v60, %v2839_v33  ;;  %3393 = vrot.lane.b32.xlu0 %v4438_v13, %s4471_s22  ;;  %v3175_v60 = vld [vmem:[%s7191_s10 + $0x10] sm:$0xff]  ;;  %v3739_v13 = vld [vmem:[%s7428_s25 + $0x20] sm:$0xff] }
 0x4d5   : > { %2636 = vst.msk [vmem:[%s6826_s3 + $0x28] sm:$0xff] %vm1061_vm13, %v2630_v19  ;;  %2633 = vst.msk [vmem:[%s6826_s3 + $0x10] sm:$0xff] %vm1061_vm13, %v2627_v48  ;;  %4421 = vrot.lane.b32.xlu1 %v6753_v47, %s4471_s22  ;;  %4075 = vmatpush3.msra.mxu0 %v2920_v22  ;;  %v3178_v48 = vld [vmem:[%s7191_s10 + $0x28] sm:$0xff] }
 0x4d6   : > { %v2885_v61 = vpop.permute.xlu0 %2884 }
 0x4d7   : > { %v2905_v9 = vpop.permute.xlu1 %2904  ;;  %4076 = vmatprep.subr.mxu0 %v2885_v61 }
 0x4d8   : > { %4239 = vmatprep.subr.mxu1 %v2905_v9  ;;  %4426 = vrot.lane.b32.xlu0 %v6753_v47, %s4471_s22 }
 0x4d9   : > { %3453 = vrot.lane.b32.xlu1 %v6759_v46, %s4471_s22  ;;  %4240 = vmatpush3.msra.mxu1 %v2905_v9  ;;  %v2768_v46 = vld [vmem:[%s7189_s8 + $0x70] sm:$0xff] }
 0x4da   : > { %v3446_v51 = vpop.permute.xlu0 %3445  ;;  %4242 = vmatmul.mubr.msk.f32.vlgmr.msra.gmra.mxu1 %vm2302_vm1, %v2759_v52  ;;  %v3736_v52 = vld [vmem:[%s7428_s25 + $0x8] sm:$0xff] }
 0x4db   : > { %v2835_v26 = vpop.permute.xlu1 %2834  ;;  %4244 = vmatprep.mubr.msk.f32.mxu1 %vm2302_vm1, %v2762_v17 }
 0x4dc   : > { %v2919_v47 = vsel %vm2912_vm5, %v2833_v5, %v2835_v26  ;;  %3449 = vrot.lane.b32.xlu0 %v6770_v7, %s4471_s22  ;;  %v3339_v7 = vld [vmem:[%s7192_s11 + $0x8] sm:$0xff]  ;;  %v3737_v5 = vld [vmem:[%s7428_s25 + $0x10] sm:$0xff] }
 0x4dd   : > { %3451 = vrot.lane.b32.xlu1 %v6738_v34, %s4471_s22  ;;  %4077 = vmatpush3.msra.mxu0 %v2919_v47  ;;  %v4439_v34 = vld [vmem:[#allocation4 + $0x18] sm:$0xff] }
 0x4de   : > { %v2829_v53 = vpop.permute.xlu0 %2828  ;;  %4245 = vmatmul.mubr.msk.f32.gmra.mxu1 %vm2302_vm1, %v2765_v56  ;;  %v3738_v56 = vld [vmem:[%s7428_s25 + $0x18] sm:$0xff] }
 0x4df   : > { %v3444_v50 = vpop.permute.xlu1 %3443  ;;  %4247 = vmatprep.mubr.msk.f32.mxu1 %vm2302_vm1, %v2768_v46 }
 0x4e0   : > { %3447 = vrot.lane.b32.xlu0 %v6757_v14, %s4471_s22  ;;  %v3503_v11 = vsel %vm3487_vm3, %v3444_v50, %v3446_v51  ;;  %v4440_v14 = vld [vmem:[#allocation4 + $0x8] sm:$0xff] }
 0x4e1   : > { %3389 = vrot.lane.b32.xlu1 %v4439_v34, %s4471_s22 }
 0x4e2   : > { %v2883_v0 = vpop.permute.xlu0 %2882  ;;  %4248 = vmatmul.mubr.msk.f32.gmra.mxu1 %vm2302_vm1, %v2771_v35 }
 0x4e3   : > { %v3478_v63 = vpop.permute.xlu1 %3477  ;;  %4078 = vmatprep.subr.mxu0 %v2883_v0  ;;  %3619 = vmatprep.mubr.f32.mxu1 %v3339_v7 }
 0x4e4   : > { %4118 = vmatprep.subr.mxu1 %v3478_v63  ;;  %3483 = vrot.lane.b32.xlu0 %v6766_v24, %s4471_s22 }
 0x4e5   : > { %3385 = vrot.lane.b32.xlu1 %v4440_v14, %s4471_s22  ;;  %4119 = vmatpush3.msra.mxu1 %v3503_v11 }
 0x4e6   : > { %v3442_v27 = vpop.permute.xlu0 %3441 }
 0x4e7   : > { %v2831_v37 = vpop.permute.xlu1 %2830 }
 0x4e8   : > { %v2918_v16 = vsel %vm2912_vm5, %v2829_v53, %v2831_v37  ;;  %3479 = vrot.lane.b32.xlu0 %v6779_v12, %s4471_s22  ;;  %v2776_v12 = vld [vmem:[%s7190_s9 + $0x20] sm:$0xff] }
 0x4e9   : > { %3485 = vrot.lane.b32.xlu1 %v6782_v45, %s4471_s22  ;;  %4079 = vmatpush3.msra.mxu0 %v2918_v16 }
 0x4ea   : > { %v2825_v24 = vpop.permute.xlu0 %2824 }
 0x4eb   : > { %v3440_v36 = vpop.permute.xlu1 %3439 }
 0x4ec   : > { %2805 = vperm.xlu0 %4308, %v2777_v4   ;;  %v3502_v42 = vsel %vm3487_vm3, %v3440_v36, %v3442_v27  ;;  %v2754_v4 = vld [vmem:[%s7189_s8] sm:$0xff] }
 0x4ed   : > { %3481 = vrot.lane.b32.xlu1 %v6792_v32, %s4471_s22  ;;  %v3356_v32 = vld [vmem:[%s7193_s12 + $0x18] sm:$0xff]  ;;  %v2758_v36 = vld [vmem:[%s7189_s8 + $0x20] sm:$0xff]  ;;  %s7162_s22 = scalar_lea.vmem %s7430_s28, %s4275_s23 }
 0x4ee   : > { %v2881_v28 = vpop.permute.xlu0 %2880 }
 0x4ef   : > { %v3476_v45 = vpop.permute.xlu1 %3475  ;;  %4080 = vmatprep.subr.mxu0 %v2881_v28 }
 0x4f0   : > { %4120 = vmatprep.subr.mxu1 %v3476_v45  ;;  %3365 = vperm.xlu0 %4308, %v3354_v31   ;;  %v2761_v45 = vld [vmem:[%s7189_s8 + $0x38] sm:$0xff] }
 0x4f1   : > { %2800 = vperm.xlu1 %4309, %v2776_v12   ;;  %4121 = vmatpush3.msra.mxu1 %v3502_v42  ;;  %v2757_v12 = vld [vmem:[%s7189_s8 + $0x18] sm:$0xff] }
 0x4f2   : > { %v3438_v8 = vpop.permute.xlu0 %3437 }
 0x4f3   : > { %v2827_v41 = vpop.permute.xlu1 %2826 }
 0x4f4   : > { %v2917_v25 = vsel %vm2912_vm5, %v2825_v24, %v2827_v41  ;;  %3375 = vperm.xlu0 %4308, %v3356_v32   ;;  %v2764_v41 = vld [vmem:[%s7189_s8 + $0x50] sm:$0xff] }
 0x4f5   : > { %3360 = vperm.xlu1 %4309, %v3353_v59   ;;  %4081 = vmatpush3.msra.mxu0 %v2917_v25 }
 0x4f6   : > { %v4412_v43 = vpop.permute.xlu0 %4411 }
 0x4f7   : > { %v3436_v20 = vpop.permute.xlu1 %3435  ;;  %v4413_v39 = vunpack.i.l.bf16 %v4412_v43  ;;  %v4414_v61 = vunpack.i.h.bf16 %v4412_v43  ;;  %v2763_v43 = vld [vmem:[%s7189_s8 + $0x48] sm:$0xff] }
 0x4f8   : > { %3181 = vperm.xlu0 %4308, %v3173_v49   ;;  %v3501_v55 = vsel %vm3487_vm3, %v3436_v20, %v3438_v8  ;;  %v2760_v8 = vld [vmem:[%s7189_s8 + $0x30] sm:$0xff]  ;;  %v2767_v20 = vld [vmem:[%s7189_s8 + $0x68] sm:$0xff] }
 0x4f9   : > { %3370 = vperm.xlu1 %4309, %v3355_v54  }
 0x4fa   : > { %v2879_v3 = vpop.permute.xlu0 %2878 }
 0x4fb   : > { %v3474_v40 = vpop.permute.xlu1 %3473  ;;  %4082 = vmatprep.subr.mxu0 %v2879_v3 }
 0x4fc   : > { %4122 = vmatprep.subr.mxu1 %v3474_v40  ;;  %3191 = vperm.xlu0 %4308, %v3175_v60   ;;  %v2770_v40 = vld [vmem:[%s7189_s8 + $0x80] sm:$0xff] }
 0x4fd   : > { %3380 = vperm.xlu1 %4309, %v3357_v62   ;;  %4123 = vmatpush3.msra.mxu1 %v3501_v55  ;;  %v2766_v62 = vld [vmem:[%s7189_s8 + $0x60] sm:$0xff] }
 0x4fe   : > { %v3434_v44 = vpop.permute.xlu0 %3433 }
 0x4ff   : > { %v2823_v1 = vpop.permute.xlu1 %2822 }
 0x500   : > { %v2916_v6 = vsel %vm2912_vm5, %v4413_v39, %v2823_v1  ;;  %3201 = vperm.xlu0 %4308, %v3177_v21   ;;  %v2769_v21 = vld [vmem:[%s7189_s8 + $0x78] sm:$0xff] }
 0x501   : > { %3186 = vperm.xlu1 %4309, %v3174_v29   ;;  %4083 = vmatpush3.msra.mxu0 %v2916_v6 }
 0x502   : > { %v2819_v10 = vpop.permute.xlu0 %2818 }
 0x503   : > { %v3432_v30 = vpop.permute.xlu1 %3431  ;;  %v2915_v51 = vsel %vm2912_vm5, %v4414_v61, %v2819_v10 }
 0x504   : > { %3742 = vperm.xlu0 %4308, %v3735_v58   ;;  %v3500_v22 = vsel %vm3487_vm3, %v3432_v30, %v3434_v44 }
 0x505   : > { %3196 = vperm.xlu1 %4309, %v3176_v23  }
 0x506   : > { %v3428_v19 = vpop.permute.xlu0 %3427 }
 0x507   : > { %v3472_v33 = vpop.permute.xlu1 %3471 }
 0x508   : > { %4124 = vmatprep.subr.mxu1 %v3472_v33  ;;  %3752 = vperm.xlu0 %4308, %v3737_v5  }
 0x509   : > { %3206 = vperm.xlu1 %4309, %v3178_v48   ;;  %4125 = vmatpush3.msra.mxu1 %v3500_v22 }
 0x50a   : > { %v3470_v9 = vpop.permute.xlu0 %3469 }
 0x50b   : > { %v2877_v17 = vpop.permute.xlu1 %2876  ;;  %4126 = vmatprep.subr.mxu1 %v3470_v9 }
 0x50c   : > { %4084 = vmatprep.subr.mxu0 %v2877_v17  ;;  %3762 = vperm.xlu0 %4308, %v3739_v13  }
 0x50d   : > { %3747 = vperm.xlu1 %4309, %v3736_v52   ;;  %4085 = vmatpush3.msra.mxu0 %v2915_v51 }
 0x50e   : > { %v2815_v26 = vpop.permute.xlu0 %2814 }
 0x50f   : > { %v3430_v47 = vpop.permute.xlu1 %3429 }
 0x510   : > { %v3499_v46 = vsel %vm3487_vm3, %v3428_v19, %v3430_v47 }
 0x511   : > { %3757 = vperm.xlu1 %4309, %v3738_v56   ;;  %4127 = vmatpush3.msra.mxu1 %v3499_v46 }
 0x512   : > { %v3424_v53 = vpop.permute.xlu0 %3423 }
 0x513   : > { %v4417_v50 = vpop.permute.xlu1 %4416 }
 0x514   : > { %v4418_v35 = vunpack.i.l.bf16 %v4417_v50  ;;  %v4419_v27 = vunpack.i.h.bf16 %v4417_v50 }
 0x516   : > { %v3468_v7 = vpop.permute.xlu0 %3467  ;;  %v2914_v0 = vsel %vm2912_vm5, %v4418_v35, %v2815_v26 }
 0x517   : > { %v2875_v34 = vpop.permute.xlu1 %2874  ;;  %4128 = vmatprep.subr.mxu1 %v3468_v7 }
 0x518   : > { %4086 = vmatprep.subr.mxu0 %v2875_v34 }
 0x519   : > { %4087 = vmatpush3.msra.mxu0 %v2914_v0  ;;  %v3338_v0 = vld [vmem:[%s7192_s11] sm:$0xff] }
 0x51a   : > { %v2873_v63 = vpop.permute.xlu0 %2872 }
 0x51b   : > { %v3426_v11 = vpop.permute.xlu1 %3425  ;;  %4088 = vmatprep.subr.mxu0 %v2873_v63 }
 0x51c   : > { %v3498_v14 = vsel %vm3487_vm3, %v3424_v53, %v3426_v11  ;;  %v3342_v11 = vld [vmem:[%s7192_s11 + $0x20] sm:$0xff] }
 0x51d   : > { %4129 = vmatpush3.msra.mxu1 %v3498_v14 }
 0x51e   : > { %v3422_v37 = vpop.permute.xlu0 %3421 }
 0x51f   : > { %v2811_v16 = vpop.permute.xlu1 %2810 }
 0x520   : > { %v2913_v24 = vsel %vm2912_vm5, %v4419_v27, %v2811_v16  ;;  %v3345_v16 = vld [vmem:[%s7192_s11 + $0x38] sm:$0xff] }
 0x521   : > { %4089 = vmatpush3.msra.mxu0 %v2913_v24  ;;  %v3344_v24 = vld [vmem:[%s7192_s11 + $0x30] sm:$0xff] }
 0x522   : > { %3048 = vmatmul.mubr.f32.vlgmr.msra.gmra.mxu0 %v2754_v4  ;;  %v3416_v31 = vpop.permute.xlu0 %3415  ;;  %4250 = vmatprep.subr.mxu0 %v6749_v57 }
 0x523   : > { %v3420_v28 = vpop.permute.xlu1 %3419  ;;  %3052 = vmatprep.mubr.f32.mxu0 %v2758_v36  ;;  %v3340_v36 = vld [vmem:[%s7192_s11 + $0x10] sm:$0xff] }
 0x524   : > { %v3497_v59 = vsel %vm3487_vm3, %v3420_v28, %v3422_v37  ;;  %v3341_v37 = vld [vmem:[%s7192_s11 + $0x18] sm:$0xff] }
 0x526   : > { %3053 = vmatmul.mubr.f32.gmra.mxu0 %v2757_v12  ;;  %v3464_v42 = vpop.permute.xlu0 %3463  ;;  %v3347_v12 = vld [vmem:[%s7192_s11 + $0x48] sm:$0xff] }
 0x527   : > { %v3466_v32 = vpop.permute.xlu1 %3465  ;;  %3057 = vmatprep.mubr.f32.mxu0 %v2761_v45  ;;  %v3343_v45 = vld [vmem:[%s7192_s11 + $0x28] sm:$0xff] }
 0x528   : > { %4130 = vmatprep.subr.mxu1 %v3466_v32  ;;  %v3350_v32 = vld [vmem:[%s7192_s11 + $0x60] sm:$0xff] }
 0x529   : > { %4131 = vmatpush3.msra.mxu1 %v3497_v59  ;;  %v3349_v59 = vld [vmem:[%s7192_s11 + $0x58] sm:$0xff] }
 0x52a   : > { %3058 = vmatmul.mubr.f32.gmra.mxu0 %v2760_v8  ;;  %4132 = vmatprep.subr.mxu1 %v3464_v42  ;;  %v3414_v25 = vpop.permute.xlu0 %3413  ;;  %v3351_v42 = vld [vmem:[%s7192_s11 + $0x68] sm:$0xff]  ;;  %v3346_v8 = vld [vmem:[%s7192_s11 + $0x40] sm:$0xff] }
 0x52b   : > { %v3418_v49 = vpop.permute.xlu1 %3417  ;;  %3062 = vmatprep.mubr.f32.mxu0 %v2764_v41  ;;  %v3352_v41 = vld [vmem:[%s7192_s11 + $0x70] sm:$0xff] }
 0x52c   : > { %v3496_v54 = vsel %vm3487_vm3, %v3416_v31, %v3418_v49  ;;  %v3348_v31 = vld [vmem:[%s7192_s11 + $0x50] sm:$0xff] }
 0x52d   : > { %4133 = vmatpush3.msra.mxu1 %v3496_v54 }
 0x52e   : > { %3063 = vmatmul.mubr.f32.gmra.mxu0 %v2763_v43  ;;  %v3408_v60 = vpop.permute.xlu0 %3407 }
 0x52f   : > { %v3412_v3 = vpop.permute.xlu1 %3411  ;;  %3067 = vmatprep.mubr.f32.mxu0 %v2767_v20 }
 0x530   : > { %v3495_v44 = vsel %vm3487_vm3, %v3412_v3, %v3414_v25 }
 0x532   : > { %3068 = vmatmul.mubr.f32.gmra.mxu0 %v2766_v62  ;;  %v3460_v55 = vpop.permute.xlu0 %3459 }
 0x533   : > { %v3462_v39 = vpop.permute.xlu1 %3461  ;;  %3072 = vmatprep.mubr.f32.mxu0 %v2770_v40 }
 0x534   : > { %4134 = vmatprep.subr.mxu1 %v3462_v39 }
 0x535   : > { %4135 = vmatpush3.msra.mxu1 %v3495_v44 }
 0x536   : > { %3073 = vmatmul.mubr.f32.gmra.mxu0 %v2769_v21  ;;  %4136 = vmatprep.subr.mxu1 %v3460_v55  ;;  %v3406_v29 = vpop.permute.xlu0 %3405 }
 0x537   : > { %v3410_v1 = vpop.permute.xlu1 %3409  ;;  %4258 = vmatprep.mubr.msk.f32.mxu0 %vm4472_vm6, %v6749_v57 }
 0x538   : > { %v3494_v6 = vsel %vm3487_vm3, %v3408_v60, %v3410_v1 }
 0x539   : > { %4137 = vmatpush3.msra.mxu1 %v3494_v6 }
 0x53a   : > { %v3400_v58 = vpop.permute.xlu0 %3399 }
 0x53b   : > { %v3404_v10 = vpop.permute.xlu1 %3403 }
 0x53c   : > { %v3493_v5 = vsel %vm3487_vm3, %v3404_v10, %v3406_v29 }
 0x53e   : > { %v3456_v23 = vpop.permute.xlu0 %3455 }
 0x53f   : > { %v3458_v30 = vpop.permute.xlu1 %3457 }
 0x540   : > { %4138 = vmatprep.subr.mxu1 %v3458_v30 }
 0x541   : > { %4139 = vmatpush3.msra.mxu1 %v3493_v5 }
 0x542   : > { %4140 = vmatprep.subr.mxu1 %v3456_v23  ;;  %v3398_v19 = vpop.permute.xlu0 %3397 }
 0x543   : > { %v3402_v48 = vpop.permute.xlu1 %3401 }
 0x544   : > { %v3492_v33 = vsel %vm3487_vm3, %v3400_v58, %v3402_v48 }
 0x545   : > { %4141 = vmatpush3.msra.mxu1 %v3492_v33 }
 0x546   : > { %v3394_v22 = vpop.permute.xlu0 %3393 }
 0x547   : > { %v4422_v13 = vpop.permute.xlu1 %4421 }
 0x548   : > { %v4423_v61 = vunpack.i.l.bf16 %v4422_v13  ;;  %v4424_v17 = vunpack.i.h.bf16 %v4422_v13 }
 0x54a   : > { %v4427_v9 = vpop.permute.xlu0 %4426  ;;  %v3491_v51 = vsel %vm3487_vm3, %v4423_v61, %v3398_v19  ;;  %v3490_v47 = vsel %vm3487_vm3, %v4424_v17, %v3394_v22 }
 0x54b   : > { %v3454_v52 = vpop.permute.xlu1 %3453  ;;  %v4428_v46 = vunpack.i.l.bf16 %v4427_v9  ;;  %v4429_v7 = vunpack.i.h.bf16 %v4427_v9 }
 0x54c   : > { %4142 = vmatprep.subr.mxu1 %v3454_v52 }
 0x54d   : > { %4143 = vmatpush3.msra.mxu1 %v3491_v51 }
 0x54e   : > { %v3450_v56 = vpop.permute.xlu0 %3449 }
 0x54f   : > { %v3452_v26 = vpop.permute.xlu1 %3451 }
 0x550   : > { %4144 = vmatprep.subr.mxu1 %v3452_v26 }
 0x551   : > { %4145 = vmatpush3.msra.mxu1 %v3490_v47 }
 0x552   : > { %4146 = vmatprep.subr.mxu1 %v3450_v56  ;;  %v3448_v35 = vpop.permute.xlu0 %3447 }
 0x553   : > { %v3390_v53 = vpop.permute.xlu1 %3389 }
 0x554   : > { %v3489_v50 = vsel %vm3487_vm3, %v4428_v46, %v3390_v53 }
 0x555   : > { %4147 = vmatpush3.msra.mxu1 %v3489_v50 }
 0x556   : > { %4148 = vmatprep.subr.mxu1 %v3448_v35  ;;  %v3484_v14 = vpop.permute.xlu0 %3483 }
 0x557   : > { %v3386_v34 = vpop.permute.xlu1 %3385 }
 0x558   : > { %v3488_v63 = vsel %vm3487_vm3, %v4429_v7, %v3386_v34 }
 0x559   : > { %4149 = vmatpush3.msra.mxu1 %v3488_v63 }
 0x55a   : > { %3620 = vmatmul.mubr.f32.vlgmr.msra.gmra.mxu1 %v3338_v0  ;;  %v3480_v28 = vpop.permute.xlu0 %3479 }
 0x55b   : > { %v3486_v27 = vpop.permute.xlu1 %3485  ;;  %3624 = vmatprep.mubr.f32.mxu1 %v3342_v11 }
 0x55c   : > { %4251 = vmatpush3.msra.mxu0 %v3486_v27 }
 0x55d   : > { %4252 = vmatprep.subr.mxu0 %v6749_v57 }
 0x55e   : > { %3625 = vmatmul.mubr.f32.gmra.mxu1 %v3341_v37  ;;  %4253 = vmatpush3.msra.mxu0 %v3484_v14 }
 0x55f   : > { %v3482_v4 = vpop.permute.xlu1 %3481  ;;  %4254 = vmatprep.subr.mxu0 %v6749_v57  ;;  %3629 = vmatprep.mubr.f32.mxu1 %v3345_v16 }
 0x560   : > { %4255 = vmatpush3.msra.mxu0 %v3482_v4 }
 0x561   : > { %4256 = vmatprep.subr.mxu0 %v6749_v57 }
 0x562   : > { %3630 = vmatmul.mubr.f32.gmra.mxu1 %v3344_v24  ;;  %4257 = vmatpush3.msra.mxu0 %v3480_v28 }
 0x563   : > { %4259 = vmatmul.mubr.msk.f32.vlgmr.msra.gmra.mxu0 %vm2302_vm1, %v3340_v36  ;;  %3634 = vmatprep.mubr.f32.mxu1 %v3348_v31 }
 0x564   : > { %4261 = vmatprep.mubr.msk.f32.mxu0 %vm4472_vm6, %v6749_v57 }
 0x566   : > { %3635 = vmatmul.mubr.f32.gmra.mxu1 %v3347_v12 }
 0x567   : > { %4262 = vmatmul.mubr.msk.f32.gmra.mxu0 %vm2302_vm1, %v3343_v45  ;;  %3639 = vmatprep.mubr.f32.mxu1 %v3351_v42  ;;  %v2806_v49 = vpop.permute.xlu0 %2805 }
 0x568   : > { %4264 = vmatprep.mubr.msk.f32.mxu0 %vm4472_vm6, %v6749_v57 }
 0x56a   : > { %3640 = vmatmul.mubr.f32.gmra.mxu1 %v3350_v32 }
 0x56b   : > { %4265 = vmatmul.mubr.msk.f32.gmra.mxu0 %vm2302_vm1, %v3346_v8  ;;  %v7126_v54 = vpop.permute.xlu0 %3365 }
 0x56c   : > { %4267 = vmatprep.mubr.msk.f32.mxu0 %vm4472_vm6, %v6749_v57  ;;  %v2801_v25 = vpop.permute.xlu1 %2800 }
 0x56f   : > { %4268 = vmatmul.mubr.msk.f32.gmra.mxu0 %vm2302_vm1, %v3349_v59  ;;  %v7130_v62 = vpop.permute.xlu0 %3375 }
 0x570   : > { %4270 = vmatprep.mubr.msk.f32.mxu0 %vm4472_vm6, %v6749_v57  ;;  %v7124_v43 = vpop.permute.xlu1 %3360 }
 0x573   : > { %4271 = vmatmul.mubr.msk.f32.gmra.mxu0 %vm2302_vm1, %v3352_v41  ;;  %v3182_v1 = vpop.permute.xlu0 %3181 }
 0x574   : > { %v7128_v20 = vpop.permute.xlu1 %3370 }
 0x577   : > { %v3192_v17 = vpop.permute.xlu0 %3191 }
 0x578   : > { %v7132_v21 = vpop.permute.xlu1 %3380 }
 0x57c   : > { %v3187_v48 = vpop.permute.xlu1 %3186 }
 0x580   : > { %v3197_v50 = vpop.permute.xlu1 %3196 }
 0x584   : > { %v3207_v24 = vpop.permute.xlu1 %3206 }
 0x59a   : > { %v4243_v3 = vpop.f32.mrf.mxu1 }
 0x59c   : > { %v3144_v39 = vpop.f32.mrf.mxu1 }
 0x59e   : > { %v4246_v23 = vpop.f32.mrf.mxu1 }
 0x5a0   : > { %v3154_v13 = vpop.f32.mrf.mxu1 }
 0x5a2   : > { %v4249_v56 = vpop.f32.mrf.mxu1 }
 0x5a4   : > { %v3164_v34 = vpop.f32.mrf.mxu1 }
 0x5e2   : > { %v4090_v60 = vpop.f32.mrf.mxu0 }
 0x5e4   : > { %v4091_v57 = vpop.f32.mrf.mxu0 }
 0x5e5   : > { %v4092_v40 = vadd.f32 %v4091_v57, %v4090_v60 }
 0x5e6   : > { %v4093_v55 = vpop.f32.mrf.mxu0 }
 0x5e7   : > { %v3050_v44 = vadd.f32 %v4092_v40, %v6596_v18 }
 0x5e8   : > { %v4094_v29 = vpop.f32.mrf.mxu0 }
 0x5e9   : > { %v4095_v6 = vadd.f32 %v4094_v29, %v4093_v55  ;;  %v3145_v58 = vadd.f32 %v3144_v39, %v3050_v44 }
 0x5ea   : > { %v4096_v10 = vpop.f32.mrf.mxu0 }
 0x5eb   : > { %v3055_v30 = vadd.f32 %v4095_v6, %v6598_v38  ;;  %v3209_v5 = vmul.f32 %v3182_v1, %v3145_v58  ;;  %v3748_v1 = vpop.permute.xlu1 %3747 }
 0x5ec   : > { %v4097_v19 = vpop.f32.mrf.mxu0 }
 0x5ed   : > { %v3150_v18 = vadd.f32 %v4243_v3, %v3055_v30  ;;  %3215 = vst.msk [vmem:[%s7140_s20] sm:$0xff] %vm1259_vm14, %v3209_v5  ;;  %v4098_v33 = vadd.f32 %v4097_v19, %v4096_v10 }
 0x5ee   : > { %v4099_v22 = vpop.f32.mrf.mxu0 }
 0x5ef   : > { %v3210_v61 = vmul.f32 %v3187_v48, %v3150_v18  ;;  %v3060_v9 = vadd.f32 %v4098_v33, %v6602_v2 }
 0x5f0   : > { %v4100_v52 = vpop.f32.mrf.mxu0 }
 0x5f1   : > { %3216 = vst.msk [vmem:[%s7140_s20 + $0x8] sm:$0xff] %vm1259_vm14, %v3210_v61  ;;  %v4101_v51 = vadd.f32 %v4100_v52, %v4099_v22  ;;  %v3155_v38 = vadd.f32 %v3154_v13, %v3060_v9  ;;  %v3758_v52 = vpop.permute.xlu1 %3757 }
 0x5f2   : > { %v4102_v26 = vpop.f32.mrf.mxu0 }
 0x5f3   : > { %v3065_v47 = vadd.f32 %v4101_v51, %v6604_v15  ;;  %v3211_v46 = vmul.f32 %v3192_v17, %v3155_v38  ;;  %v3202_v15 = vpop.permute.xlu0 %3201 }
 0x5f4   : > { %v4103_v53 = vpop.f32.mrf.mxu0 }
 0x5f5   : > { %v3160_v35 = vadd.f32 %v4246_v23, %v3065_v47  ;;  %3217 = vst.msk [vmem:[%s7140_s20 + $0x10] sm:$0xff] %vm1259_vm14, %v3211_v46  ;;  %v4104_v7 = vadd.f32 %v4103_v53, %v4102_v26 }
 0x5f6   : > { %v4105_v2 = vpop.f32.mrf.mxu0 }
 0x5f7   : > { %v3212_v0 = vmul.f32 %v3197_v50, %v3160_v35  ;;  %v3070_v63 = vadd.f32 %v4104_v7, %v2801_v25  ;;  %v3743_v60 = vpop.permute.xlu0 %3742 }
 0x5f8   : > { %v4106_v11 = vpop.f32.mrf.mxu0 }
 0x5f9   : > { %3218 = vst.msk [vmem:[%s7140_s20 + $0x18] sm:$0xff] %vm1259_vm14, %v3212_v0  ;;  %v4107_v14 = vadd.f32 %v4106_v11, %v4105_v2  ;;  %v3165_v27 = vadd.f32 %v3164_v34, %v3070_v63 }
 0x5fb   : > { %v3075_v37 = vadd.f32 %v4107_v14, %v2806_v49  ;;  %v3213_v16 = vmul.f32 %v3202_v15, %v3165_v27 }
 0x5fd   : > { %v3170_v4 = vadd.f32 %v4249_v56, %v3075_v37  ;;  %3219 = vst.msk [vmem:[%s7140_s20 + $0x20] sm:$0xff] %vm1259_vm14, %v3213_v16 }
 0x5ff   : > { %v3214_v36 = vmul.f32 %v3207_v24, %v3170_v4 }
 0x601   : > { %3220 = vst.msk [vmem:[%s7140_s20 + $0x28] sm:$0xff] %vm1259_vm14, %v3214_v36 }
 0x61a   : > { %v4150_v31 = vpop.f32.mrf.mxu1 }
 0x61c   : > { %v4151_v28 = vpop.f32.mrf.mxu1 }
 0x61d   : > { %v4152_v12 = vadd.f32 %v4151_v28, %v4150_v31 }
 0x61e   : > { %v4153_v45 = vpop.f32.mrf.mxu1 }
 0x61f   : > { %v3622_v59 = vadd.f32 %v4152_v12, %v7124_v43 }
 0x620   : > { %v4154_v42 = vpop.f32.mrf.mxu1 }
 0x621   : > { %v4155_v32 = vadd.f32 %v4154_v42, %v4153_v45 }
 0x622   : > { %v4156_v8 = vpop.f32.mrf.mxu1 }
 0x623   : > { %v3711_v41 = vpop.f32.mrf.mxu0  ;;  %v3627_v39 = vadd.f32 %v4155_v32, %v7126_v54  ;;  %v3753_v54 = vpop.permute.xlu0 %3752 }
 0x624   : > { %v3712_v25 = vadd.f32 %v3711_v41, %v3622_v59  ;;  %v4157_v49 = vpop.f32.mrf.mxu1 }
 0x625   : > { %v4260_v3 = vpop.f32.mrf.mxu0  ;;  %v4158_v40 = vadd.f32 %v4157_v49, %v4156_v8 }
 0x626   : > { %v3765_v57 = vmul.f32 %v3743_v60, %v3712_v25  ;;  %v4159_v55 = vpop.f32.mrf.mxu1 }
 0x627   : > { %v3716_v44 = vpop.f32.mrf.mxu0  ;;  %v3632_v30 = vadd.f32 %v4158_v40, %v7128_v20  ;;  %v3763_v56 = vpop.permute.xlu0 %3762 }
 0x628   : > { %3770 = vst.msk [vmem:[%s7162_s22] sm:$0xff] %vm804_vm0, %v3765_v57  ;;  %v3717_v43 = vadd.f32 %v3716_v44, %v3627_v39  ;;  %v4160_v29 = vpop.f32.mrf.mxu1 }
 0x629   : > { %v4263_v6 = vpop.f32.mrf.mxu0  ;;  %v4161_v10 = vadd.f32 %v4160_v29, %v4159_v55 }
 0x62a   : > { %v3766_v58 = vmul.f32 %v3748_v1, %v3717_v43  ;;  %v4162_v23 = vpop.f32.mrf.mxu1 }
 0x62b   : > { %v3721_v5 = vpop.f32.mrf.mxu0  ;;  %v3637_v13 = vadd.f32 %v4161_v10, %v7130_v62 }
 0x62c   : > { %3771 = vst.msk [vmem:[%s7162_s22 + $0x8] sm:$0xff] %vm804_vm0, %v3766_v58  ;;  %v3722_v19 = vadd.f32 %v3721_v5, %v3632_v30  ;;  %v4163_v48 = vpop.f32.mrf.mxu1 }
 0x62d   : > { %v4266_v18 = vpop.f32.mrf.mxu0  ;;  %v4164_v22 = vadd.f32 %v4163_v48, %v4162_v23 }
 0x62e   : > { %v3767_v33 = vmul.f32 %v3753_v54, %v3722_v19 }
 0x62f   : > { %v3726_v61 = vpop.f32.mrf.mxu0  ;;  %v3642_v51 = vadd.f32 %v4164_v22, %v7132_v21 }
 0x630   : > { %3772 = vst.msk [vmem:[%s7162_s22 + $0x10] sm:$0xff] %vm804_vm0, %v3767_v33  ;;  %v3727_v9 = vadd.f32 %v3726_v61, %v3637_v13 }
 0x631   : > { %v4269_v17 = vpop.f32.mrf.mxu0 }
 0x632   : > { %v3768_v20 = vmul.f32 %v3758_v52, %v3727_v9 }
 0x633   : > { %v3731_v38 = vpop.f32.mrf.mxu0 }
 0x634   : > { %3773 = vst.msk [vmem:[%s7162_s22 + $0x18] sm:$0xff] %vm804_vm0, %v3768_v20  ;;  %v3732_v26 = vadd.f32 %v3731_v38, %v3642_v51 }
 0x635   : > { %v4272_v47 = vpop.f32.mrf.mxu0 }
 0x636   : > { %v3769_v46 = vmul.f32 %v3763_v56, %v3732_v26 }
 0x638   : > { %3774 = vst.msk [vmem:[%s7162_s22 + $0x20] sm:$0xff] %vm804_vm0, %v3769_v46 }
 0x639 PF: > { %s7431_s30 = sld [smem:[#allocation5_spill]] }
 0x63f   : > { %s30_s0 = sadd.s32 1, %s7431_s30  }
 0x640   : > { %p27_p4 = scmp.ge.s32.totalorder %s30_s0, 4  }
 0x642   :  { %29 = sbr.rel (!%p27_p4) target bundleno = 8 (0x8), region = 152 }

</bundles_post_ra>
